<compile_context>
chip_gen: v7x
topology: tpu7x:2x2x1
jax: 0.10.0
libtpu: 0.0.40
codegen_flags: <defaults>
</compile_context>

<pallas_src>
import math
from functools import partial

import numpy as np
import jax
import jax.numpy as jnp
from jax import lax
from jax.experimental import pallas as pl
from jax.experimental.pallas import tpu as pltpu


def _pick_tile(dim, pref):
    """Largest power-of-two-ish tile <= pref that divides dim (fallback: dim)."""
    if dim <= pref:
        return dim
    t = pref
    while t > 1 and dim % t != 0:
        t //= 2
    return t if (t > 1 and dim % t == 0) else dim


# --------------------- fused q/k/v projection + RoPE epilogue ---------------------

def _fused_qkv_rope_kernel(x_ref, w_ref, s_ref, cos_ref, sin_ref, o_ref, acc_ref,
                           *, n_rope_tiles, head_dim):
    # x: (tm, tk) f32, w: (tn, tk) f32 [nn.Linear layout], s: (1, tn) f32,
    # cos/sin: (tm, D) f32 (sin already sign-folded for the roll formulation).
    k_step = pl.program_id(2)

    @pl.when(k_step == 0)
    def _():
        acc_ref[...] = jnp.zeros_like(acc_ref)

    # bf16 MXU operands, f32 accumulation; contract K axes directly (no .T).
    acc_ref[...] += lax.dot_general(
        x_ref[...].astype(jnp.bfloat16), w_ref[...].astype(jnp.bfloat16),
        dimension_numbers=(((1,), (1,)), ((), ())),
        preferred_element_type=jnp.float32)

    is_last = k_step == pl.num_programs(2) - 1
    is_rope = pl.program_id(1) < n_rope_tiles        # q/k tiles get RoPE, v tiles don't

    @pl.when(jnp.logical_and(is_last, is_rope))
    def _():
        y = acc_ref[...] * s_ref[...]                # sparse-mask scale in f32
        cos = cos_ref[...]
        sin = sin_ref[...]
        tn = y.shape[1]
        cols = []
        for h in range(tn // head_dim):              # per 128-lane head slab
            sub = y[:, h * head_dim:(h + 1) * head_dim]
            rot = pltpu.roll(sub, shift=head_dim // 2, axis=1)   # XLU, ~free
            cols.append(sub * cos + rot * sin)
        o_ref[...] = jnp.concatenate(cols, axis=-1).astype(o_ref.dtype)

    @pl.when(jnp.logical_and(is_last, jnp.logical_not(is_rope)))
    def _():
        o_ref[...] = (acc_ref[...] * s_ref[...]).astype(o_ref.dtype)


def fused_qkv_rope(x2d, qkv_w, scale, cos_rows, sin_rows, *, head_dim, n_rope_cols,
                   out_dtype=jnp.bfloat16, tm=256, tn=512, tk=512):
    """qkv = rope(x2d @ qkv_w.T * scale).  x2d:(M,K), qkv_w:(N,K), scale:(N,)."""
    M, K = x2d.shape
    N, Kw = qkv_w.shape
    assert K == Kw and N % head_dim == 0 and n_rope_cols % head_dim == 0
    tm = _pick_tile(M, tm)
    tk = _pick_tile(K, tk)

    # tn must be a multiple of head_dim that divides both N and the q+k (rope)
    # section, so every output tile is either fully-RoPE or fully-plain.
    g = math.gcd(N, n_rope_cols)
    cand = (min(tn, g) // head_dim) * head_dim
    tn = head_dim
    while cand >= head_dim:
        if g % cand == 0:
            tn = cand
            break
        cand -= head_dim
    n_rope_tiles = n_rope_cols // tn
    grid = (M // tm, N // tn, K // tk)

    cost = pl.CostEstimate(
        flops=2 * M * N * K,
        transcendentals=0,
        bytes_accessed=(M * K + N * K) * 4 + M * N * jnp.dtype(out_dtype).itemsize)

    kernel = partial(_fused_qkv_rope_kernel, n_rope_tiles=n_rope_tiles,
                     head_dim=head_dim)
    return pl.pallas_call(
        kernel,
        out_shape=jax.ShapeDtypeStruct((M, N), out_dtype),
        grid_spec=pltpu.PrefetchScalarGridSpec(
            num_scalar_prefetch=0,
            grid=grid,
            in_specs=[
                pl.BlockSpec((tm, tk), lambda i, j, k: (i, k)),
                pl.BlockSpec((tn, tk), lambda i, j, k: (j, k)),
                pl.BlockSpec((1, tn), lambda i, j, k: (0, j)),
                pl.BlockSpec((tm, head_dim), lambda i, j, k: (i, 0)),
                pl.BlockSpec((tm, head_dim), lambda i, j, k: (i, 0)),
            ],
            out_specs=pl.BlockSpec((tm, tn), lambda i, j, k: (i, j)),
            scratch_shapes=[pltpu.VMEM((tm, tn), jnp.float32)]),
        compiler_params=pltpu.CompilerParams(
            dimension_semantics=("parallel", "parallel", "arbitrary"),
            vmem_limit_bytes=32 * 1024 * 1024),
        cost_estimate=cost,
    )(x2d, qkv_w, scale.astype(jnp.float32).reshape(1, N), cos_rows, sin_rows)


# ------------------------------- plain linear (o_proj) -------------------------------

def _linear_kernel(x_ref, w_ref, o_ref, acc_ref):
    @pl.when(pl.program_id(2) == 0)
    def _():
        acc_ref[...] = jnp.zeros_like(acc_ref)

    acc_ref[...] += lax.dot_general(
        x_ref[...].astype(jnp.bfloat16), w_ref[...].astype(jnp.bfloat16),
        dimension_numbers=(((1,), (1,)), ((), ())),
        preferred_element_type=jnp.float32)

    @pl.when(pl.program_id(2) == pl.num_programs(2) - 1)
    def _():
        o_ref[...] = acc_ref[...].astype(o_ref.dtype)


def linear(x, w, *, out_dtype=None, tm=256, tn=512, tk=512):
    """y = x @ w.T.  x:(M,K), w:(N,K) in torch nn.Linear layout."""
    M, K = x.shape
    N, Kw = w.shape
    assert K == Kw
    out_dtype = out_dtype or x.dtype
    tm = _pick_tile(M, tm)
    tn = _pick_tile(N, tn)
    tk = _pick_tile(K, tk)
    grid = (M // tm, N // tn, K // tk)

    cost = pl.CostEstimate(
        flops=2 * M * N * K, transcendentals=0,
        bytes_accessed=M * K * jnp.dtype(x.dtype).itemsize + N * K * 4
                       + M * N * jnp.dtype(out_dtype).itemsize)

    return pl.pallas_call(
        _linear_kernel,
        out_shape=jax.ShapeDtypeStruct((M, N), out_dtype),
        grid_spec=pltpu.PrefetchScalarGridSpec(
            num_scalar_prefetch=0,
            grid=grid,
            in_specs=[pl.BlockSpec((tm, tk), lambda i, j, k: (i, k)),
                      pl.BlockSpec((tn, tk), lambda i, j, k: (j, k))],
            out_specs=pl.BlockSpec((tm, tn), lambda i, j, k: (i, j)),
            scratch_shapes=[pltpu.VMEM((tm, tn), jnp.float32)]),
        compiler_params=pltpu.CompilerParams(
            dimension_semantics=("parallel", "parallel", "arbitrary"),
            vmem_limit_bytes=32 * 1024 * 1024),
        cost_estimate=cost,
    )(x, w)


# ------------------------ causal flash attention (GQA, fused qkv) ------------------------

def _flash_attn_causal_kernel(q_ref, k_ref, v_ref, o_ref, m_sc, l_sc, acc_sc,
                              *, n_rep, head_dim):
    # q_ref: (1, tq, n_rep*D) bf16   (all query heads of one GQA group)
    # k_ref/v_ref: (1, tk, D) bf16   (the group's shared kv head)
    qi = pl.program_id(2)
    ki = pl.program_id(3)
    tq = q_ref.shape[1]
    tk = k_ref.shape[1]

    @pl.when(ki == 0)
    def _():
        m_sc[...] = jnp.full(m_sc.shape, -1e30, dtype=m_sc.dtype)
        l_sc[...] = jnp.zeros_like(l_sc)
        acc_sc[...] = jnp.zeros_like(acc_sc)

    q_start = qi * tq
    k_start = ki * tk
    # Causal block skipping: fully masked (q, kv) tiles do no MXU/EUP work.
    not_fully_masked = k_start <= q_start + (tq - 1)

    @pl.when(not_fully_masked)
    def _():
        k = k_ref[0]                                   # (tk, D) bf16
        v = v_ref[0]                                   # (tk, D) bf16
        # In-kernel causal bias (no (B,1,S,S) mask streamed from HBM).
        q_pos = q_start + lax.broadcasted_iota(jnp.int32, (tq, tk), 0)
        k_pos = k_start + lax.broadcasted_iota(jnp.int32, (tq, tk), 1)
        causal = q_pos >= k_pos

        # All n_rep query heads of this GQA group reuse the single K/V block.
        for r in range(n_rep):
            hsl = slice(r * head_dim, (r + 1) * head_dim)
            q = q_ref[0, :, hsl]                       # (tq, D) bf16; 1/sqrt(D) pre-folded
            s = lax.dot_general(q, k,
                                dimension_numbers=(((1,), (1,)), ((), ())),
                                preferred_element_type=jnp.float32)
            s = jnp.where(causal, s, -1e30)

            m_prev = m_sc[r]                           # (tq, 1)
            m_new = jnp.maximum(m_prev, jnp.max(s, axis=-1, keepdims=True))
            alpha = jnp.exp(m_prev - m_new)
            p = jnp.exp(s - m_new)                     # unnormalized probabilities
            l_sc[r] = alpha * l_sc[r] + jnp.sum(p, axis=-1, keepdims=True)
            acc_sc[:, hsl] = alpha * acc_sc[:, hsl] + jnp.dot(
                p.astype(v.dtype), v, preferred_element_type=jnp.float32)
            m_sc[r] = m_new

    @pl.when(ki == pl.num_programs(3) - 1)
    def _():
        # Deferred softmax normalization (reciprocal on the EUP slot).
        for r in range(n_rep):
            hsl = slice(r * head_dim, (r + 1) * head_dim)
            inv_l = pl.reciprocal(l_sc[r], approx=True)
            o_ref[0, :, hsl] = (acc_sc[:, hsl] * inv_l).astype(o_ref.dtype)


def flash_attention_causal(qkv, *, num_q_heads, num_kv_heads, head_dim,
                           tq=256, tk=512):
    """Causal GQA flash attention over the fused qkv tensor.

    qkv: (B, S, (H + 2*Hk)*D) with [q | k | v] along lanes -> (B, S, H*D).
    """
    B, S, TD = qkv.shape
    H, Hk, D = num_q_heads, num_kv_heads, head_dim
    n_rep = H // Hk
    GD = n_rep * D
    assert TD == (H + 2 * Hk) * D
    tq = _pick_tile(S, tq)
    tk = _pick_tile(S, tk)
    grid = (B, Hk, S // tq, S // tk)

    # q view: width GD group blocks; k/v views: width D head blocks at offsets
    # H+g / H+Hk+g inside the fused tensor (no q/k/v split copies needed).
    if TD % GD == 0:
        q_arr = qkv
        q_spec = pl.BlockSpec((1, tq, GD), lambda b, g, qi, ki: (b, qi, g))
    else:
        q_arr = qkv[:, :, :H * D]      # lane-aligned slice fallback
        q_spec = pl.BlockSpec((1, tq, GD), lambda b, g, qi, ki: (b, qi, g))
    k_spec = pl.BlockSpec((1, tk, D), lambda b, g, qi, ki: (b, ki, H + g))
    v_spec = pl.BlockSpec((1, tk, D), lambda b, g, qi, ki: (b, ki, H + Hk + g))

    elt = jnp.dtype(qkv.dtype).itemsize
    cost = pl.CostEstimate(
        flops=2 * B * H * S * S * D,                       # ~causal half of 4*B*H*S^2*D
        transcendentals=B * H * S * S // 2,
        bytes_accessed=(B * S * H * D * 2                  # q read + out write
                        + (S // tq) * B * Hk * S * D * 2) * elt)

    kernel = partial(_flash_attn_causal_kernel, n_rep=n_rep, head_dim=D)
    return pl.pallas_call(
        kernel,
        out_shape=jax.ShapeDtypeStruct((B, S, H * D), qkv.dtype),
        grid_spec=pltpu.PrefetchScalarGridSpec(
            num_scalar_prefetch=0,
            grid=grid,
            in_specs=[q_spec, k_spec, v_spec],
            out_specs=pl.BlockSpec((1, tq, GD), lambda b, g, qi, ki: (b, qi, g)),
            scratch_shapes=[
                pltpu.VMEM((n_rep, tq, 1), jnp.float32),   # running max m (lane-clean)
                pltpu.VMEM((n_rep, tq, 1), jnp.float32),   # running sum l
                pltpu.VMEM((tq, GD), jnp.float32),         # unnormalized P@V acc
            ]),
        compiler_params=pltpu.CompilerParams(
            dimension_semantics=("parallel", "parallel", "parallel", "arbitrary"),
            vmem_limit_bytes=32 * 1024 * 1024),
        cost_estimate=cost,
    )(q_arr, qkv, qkv)


# ------------------------------ rotary tables (glue) ------------------------------

def rotary_cos_sin(seq_len, head_dim, rope_theta):
    inv_freq = 1.0 / (rope_theta ** (jnp.arange(0, head_dim, 2, dtype=jnp.float32)
                                     / head_dim))
    t = jnp.arange(seq_len, dtype=jnp.float32)
    freqs = jnp.outer(t, inv_freq)                     # (S, D/2)
    emb = jnp.concatenate([freqs, freqs], axis=-1)     # (S, D)
    return jnp.cos(emb), jnp.sin(emb)


def rotate_half(x):
    d = x.shape[-1]
    return jnp.concatenate([-x[..., d // 2:], x[..., :d // 2]], axis=-1)


# ------------------------------ full forward ------------------------------

def llama_sparse_attn_forward(params, hidden_states, position_ids, cfg):
    """LlamaSparseAttn.forward (training path, causal mask, no KV cache)."""
    B, S, hidden = hidden_states.shape
    H, D, Hk = cfg["num_heads"], cfg["head_dim"], cfg["num_kv_heads"]
    n_rep = H // Hk

    mask = params["mask"].astype(jnp.float32)             # (D + Hk*D,)
    # Training-mode sparse masks; fold 1/sqrt(D) into the q scale (RoPE is
    # linear, so pre-scaling q is equivalent to scaling the scores).
    q_scale = jnp.tile(mask[:D], (H,)) * (1.0 / math.sqrt(D))
    k_scale = jnp.tile(mask[:D], (Hk,))
    v_scale = mask[D:]
    scale = jnp.concatenate([q_scale, k_scale, v_scale])  # ((H+2Hk)*D,)

    qkv_w = jnp.concatenate([params["q_w"], params["k_w"], params["v_w"]], axis=0)

    # RoPE tables, gathered by position_ids (row order matches x2d); sin is
    # sign-folded so the kernel epilogue only needs x*cos + roll(x, D/2)*sin.
    cos, sin = rotary_cos_sin(S, D, cfg["rope_theta"])
    sin_signed = jnp.concatenate([-sin[:, :D // 2], sin[:, D // 2:]], axis=-1)
    cos_rows = cos[position_ids].reshape(B * S, D).astype(jnp.float32)
    sin_rows = sin_signed[position_ids].reshape(B * S, D).astype(jnp.float32)

    x2d = hidden_states.reshape(B * S, hidden)
    qkv = fused_qkv_rope(x2d, qkv_w, scale, cos_rows, sin_rows,
                         head_dim=D, n_rope_cols=(H + Hk) * D,
                         out_dtype=jnp.bfloat16)          # (B*S, (H+2Hk)*D) bf16

    attn = flash_attention_causal(qkv.reshape(B, S, (H + 2 * Hk) * D),
                                  num_q_heads=H, num_kv_heads=Hk, head_dim=D)

    out = linear(attn.reshape(B * S, H * D), params["o_w"],
                 out_dtype=hidden_states.dtype)
    return out.reshape(B, S, hidden)


# ----------------------------- pure-JAX reference -----------------------------

def reference_forward(params, hidden_states, attention_mask, position_ids, cfg):
    B, S, hidden = hidden_states.shape
    H, D, Hk = cfg["num_heads"], cfg["head_dim"], cfg["num_kv_heads"]
    n_rep = H // Hk
    mask = params["mask"]
    q = hidden_states @ params["q_w"].T * jnp.tile(mask[:D], (H,))
    k = hidden_states @ params["k_w"].T * jnp.tile(mask[:D], (Hk,))
    v = hidden_states @ params["v_w"].T * mask[D:]
    q = q.reshape(B, S, H, D).transpose(0, 2, 1, 3)
    k = k.reshape(B, S, Hk, D).transpose(0, 2, 1, 3)
    v = v.reshape(B, S, Hk, D).transpose(0, 2, 1, 3)
    cos, sin = rotary_cos_sin(S, D, cfg["rope_theta"])
    cosb = cos[position_ids][:, None, :, :]
    sinb = sin[position_ids][:, None, :, :]
    q = q * cosb + rotate_half(q) * sinb
    k = k * cosb + rotate_half(k) * sinb
    k = jnp.repeat(k, n_rep, axis=1)
    v = jnp.repeat(v, n_rep, axis=1)
    scores = jnp.einsum("bhqd,bhkd->bhqk", q, k) / math.sqrt(D)
    scores = scores + attention_mask
    p = jax.nn.softmax(scores.astype(jnp.float32), axis=-1).astype(q.dtype)
    o = jnp.einsum("bhqk,bhkd->bhqd", p, v)
    o = o.transpose(0, 2, 1, 3).reshape(B, S, hidden)
    return o @ params["o_w"].T


# ----------------------------------- main -----------------------------------

if __name__ == "__main__":
    # Small Llama-like config (D=128 as in real Llama so head lane blocks are
    # 128-wide); GQA with n_repeat=2.  hidden = num_heads * head_dim.
    cfg = dict(num_heads=4, head_dim=128, num_kv_heads=2, rope_theta=10000.0)
    bsz, q_len = 2, 256
    hidden = cfg["num_heads"] * cfg["head_dim"]           # 512
    kv_dim = cfg["num_kv_heads"] * cfg["head_dim"]        # 256
    n_rep = cfg["num_heads"] // cfg["num_kv_heads"]

    key = jax.random.PRNGKey(0)
    kx, kq, kk, kv_, ko, km = jax.random.split(key, 6)
    wscale = 1.0 / math.sqrt(hidden)
    params = {
        "q_w": jax.random.normal(kq, (hidden, hidden), jnp.float32) * wscale,
        "k_w": jax.random.normal(kk, (kv_dim, hidden), jnp.float32) * wscale,
        "v_w": jax.random.normal(kv_, (kv_dim, hidden), jnp.float32) * wscale,
        "o_w": jax.random.normal(ko, (hidden, hidden), jnp.float32) * wscale,
        # module init uses ones; perturb deterministically to exercise the
        # training-mode sparse-mask multiply path.
        "mask": 0.5 + 0.5 * jax.random.uniform(
            km, (cfg["head_dim"] + hidden // n_rep,), jnp.float32),
    }

    hidden_states = jax.random.normal(kx, (bsz, q_len, hidden), jnp.float32)
    position_ids = jnp.broadcast_to(jnp.arange(q_len, dtype=jnp.int32),
                                    (bsz, q_len))

    out = llama_sparse_attn_forward(params, hidden_states, position_ids, cfg)
    out = jax.block_until_ready(out)

    # Reference uses the standard HF-style additive causal mask (the module's
    # attention_mask input for the causal case).
    causal = jnp.where(jnp.arange(q_len)[:, None] >= jnp.arange(q_len)[None, :],
                       0.0, -1e9).astype(jnp.float32)
    attention_mask = jnp.broadcast_to(causal, (bsz, 1, q_len, q_len))
    ref = reference_forward(params, hidden_states, attention_mask,
                            position_ids, cfg)
    # bf16 MXU operands (3 chained matmuls) vs. an all-f32 reference.
    np.testing.assert_allclose(np.asarray(out), np.asarray(ref),
                               rtol=3e-2, atol=3e-2)
    print("KERNEL_OK")
</pallas_src>

<mosaic_0001>
module attributes {stable_mosaic.version = 11 : i64} {
  func.func @_fused_qkv_rope_kernel(%arg0: i32, %arg1: i32, %arg2: i32, %arg3: memref<256x512xf32, #tpu.memory_space<vmem>>, %arg4: memref<256x512xf32, #tpu.memory_space<vmem>>, %arg5: memref<1x256xf32, #tpu.memory_space<vmem>>, %arg6: memref<256x128xf32, #tpu.memory_space<vmem>>, %arg7: memref<256x128xf32, #tpu.memory_space<vmem>>, %arg8: memref<256x256xbf16, #tpu.memory_space<vmem>>, %arg9: memref<256x256xf32, #tpu.memory_space<vmem>>) attributes {dimension_semantics = [#tpu.dimension_semantics<parallel>, #tpu.dimension_semantics<parallel>, #tpu.dimension_semantics<arbitrary>], iteration_bounds = array<i64: 2, 4, 1>, scalar_prefetch = 0 : i64, scratch_operands = 1 : i64, tpu.core_type = #tpu.core_type<tc>, window_params = [{transform_indices = @transform_0, window_bounds = array<i64: 256, 512>}, {transform_indices = @transform_1, window_bounds = array<i64: 256, 512>}, {transform_indices = @transform_2, window_bounds = array<i64: 1, 256>}, {transform_indices = @transform_3, window_bounds = array<i64: 256, 128>}, {transform_indices = @transform_4, window_bounds = array<i64: 256, 128>}, {transform_indices = @transform_5, window_bounds = array<i64: 256, 256>}]} {
    %c0_i32 = arith.constant 0 : i32
    %0 = arith.cmpi eq, %arg2, %c0_i32 : i32
    %1 = arith.extui %0 : i1 to i32
    %c0_i32_0 = arith.constant 0 : i32
    %2 = arith.cmpi ne, %1, %c0_i32_0 : i32
    scf.if %2 {
      %cst_11 = arith.constant 0.000000e+00 : f32
      %20 = vector.broadcast %cst_11 : f32 to vector<256x256xf32>
      %c0_12 = arith.constant 0 : index
      %c0_13 = arith.constant 0 : index
      %21 = vector.load %arg9[%c0_12, %c0_13] : memref<256x256xf32, #tpu.memory_space<vmem>>, vector<256x256xf32>
      tpu.vector_store %arg9[%c0_12, %c0_13], %20 {strides = array<i32>} : memref<256x256xf32, #tpu.memory_space<vmem>>, vector<256x256xf32>,
    } else {
    }
    %c0 = arith.constant 0 : index
    %c0_1 = arith.constant 0 : index
    %3 = vector.load %arg9[%c0, %c0_1] : memref<256x256xf32, #tpu.memory_space<vmem>>, vector<256x256xf32>
    %c0_2 = arith.constant 0 : index
    %c0_3 = arith.constant 0 : index
    %4 = vector.load %arg3[%c0_2, %c0_3] : memref<256x512xf32, #tpu.memory_space<vmem>>, vector<256x512xf32>
    %5 = arith.truncf %4 : vector<256x512xf32> to vector<256x512xbf16>
    %c0_4 = arith.constant 0 : index
    %c0_5 = arith.constant 0 : index
    %6 = vector.load %arg4[%c0_4, %c0_5] : memref<256x512xf32, #tpu.memory_space<vmem>>, vector<256x512xf32>
    %7 = arith.truncf %6 : vector<256x512xf32> to vector<256x512xbf16>
    %cst = arith.constant dense<0.000000e+00> : vector<256x256xf32>
    %8 = tpu.matmul %5, %7, %cst {dimension_numbers = #tpu.dot_dimension_numbers<[1], [1], [0], [0], [0, 0, 1, 0], [], []>} : vector<256x512xbf16>, vector<256x512xbf16>, vector<256x256xf32> -> vector<256x256xf32>
    %9 = arith.addf %3, %8 : vector<256x256xf32>
    %c0_6 = arith.constant 0 : index
    %c0_7 = arith.constant 0 : index
    %10 = vector.load %arg9[%c0_6, %c0_7] : memref<256x256xf32, #tpu.memory_space<vmem>>, vector<256x256xf32>
    tpu.vector_store %arg9[%c0_6, %c0_7], %9 {strides = array<i32>} : memref<256x256xf32, #tpu.memory_space<vmem>>, vector<256x256xf32>,
    %c0_i32_8 = arith.constant 0 : i32
    %11 = arith.cmpi eq, %arg2, %c0_i32_8 : i32
    %c3_i32 = arith.constant 3 : i32
    %12 = arith.cmpi slt, %arg1, %c3_i32 : i32
    %13 = arith.andi %11, %12 : i1
    %14 = arith.extui %13 : i1 to i32
    %c0_i32_9 = arith.constant 0 : i32
    %15 = arith.cmpi ne, %14, %c0_i32_9 : i32
    scf.if %15 {
      %c0_11 = arith.constant 0 : index
      %c0_12 = arith.constant 0 : index
      %20 = vector.load %arg9[%c0_11, %c0_12] : memref<256x256xf32, #tpu.memory_space<vmem>>, vector<256x256xf32>
      %c0_13 = arith.constant 0 : index
      %c0_14 = arith.constant 0 : index
      %21 = vector.load %arg5[%c0_13, %c0_14] : memref<1x256xf32, #tpu.memory_space<vmem>>, vector<1x256xf32>
      %22 = vector.broadcast %21 : vector<1x256xf32> to vector<256x256xf32>
      %23 = arith.mulf %20, %22 : vector<256x256xf32>
      %c0_15 = arith.constant 0 : index
      %c0_16 = arith.constant 0 : index
      %24 = vector.load %arg6[%c0_15, %c0_16] : memref<256x128xf32, #tpu.memory_space<vmem>>, vector<256x128xf32>
      %c0_17 = arith.constant 0 : index
      %c0_18 = arith.constant 0 : index
      %25 = vector.load %arg7[%c0_17, %c0_18] : memref<256x128xf32, #tpu.memory_space<vmem>>, vector<256x128xf32>
      %26 = vector.extract_strided_slice %23 {offsets = [0, 0], sizes = [256, 128], strides = [1, 1]} : vector<256x256xf32> to vector<256x128xf32>
      %c64_i32 = arith.constant 64 : i32
      %27 = tpu.dynamic_rotate %26 by %c64_i32 dim 1 : vector<256x128xf32>, i32 -> vector<256x128xf32>
      %28 = arith.mulf %26, %24 : vector<256x128xf32>
      %29 = arith.mulf %27, %25 : vector<256x128xf32>
      %30 = arith.addf %28, %29 : vector<256x128xf32>
      %31 = vector.extract_strided_slice %23 {offsets = [0, 128], sizes = [256, 128], strides = [1, 1]} : vector<256x256xf32> to vector<256x128xf32>
      %c64_i32_19 = arith.constant 64 : i32
      %32 = tpu.dynamic_rotate %31 by %c64_i32_19 dim 1 : vector<256x128xf32>, i32 -> vector<256x128xf32>
      %33 = arith.mulf %31, %24 : vector<256x128xf32>
      %34 = arith.mulf %32, %25 : vector<256x128xf32>
      %35 = arith.addf %33, %34 : vector<256x128xf32>
      %36 = tpu.concatenate %30, %35 in 1 : vector<256x128xf32>, vector<256x128xf32> -> vector<256x256xf32>
      %37 = arith.truncf %36 : vector<256x256xf32> to vector<256x256xbf16>
      %c0_20 = arith.constant 0 : index
      %c0_21 = arith.constant 0 : index
      %38 = vector.load %arg8[%c0_20, %c0_21] : memref<256x256xbf16, #tpu.memory_space<vmem>>, vector<256x256xbf16>
      tpu.vector_store %arg8[%c0_20, %c0_21], %37 {strides = array<i32>} : memref<256x256xbf16, #tpu.memory_space<vmem>>, vector<256x256xbf16>,
    } else {
    }
    %true = arith.constant true
    %16 = arith.xori %12, %true : i1
    %17 = arith.andi %11, %16 : i1
    %18 = arith.extui %17 : i1 to i32
    %c0_i32_10 = arith.constant 0 : i32
    %19 = arith.cmpi ne, %18, %c0_i32_10 : i32
    scf.if %19 {
      %c0_11 = arith.constant 0 : index
      %c0_12 = arith.constant 0 : index
      %20 = vector.load %arg9[%c0_11, %c0_12] : memref<256x256xf32, #tpu.memory_space<vmem>>, vector<256x256xf32>
      %c0_13 = arith.constant 0 : index
      %c0_14 = arith.constant 0 : index
      %21 = vector.load %arg5[%c0_13, %c0_14] : memref<1x256xf32, #tpu.memory_space<vmem>>, vector<1x256xf32>
      %22 = vector.broadcast %21 : vector<1x256xf32> to vector<256x256xf32>
      %23 = arith.mulf %20, %22 : vector<256x256xf32>
      %24 = arith.truncf %23 : vector<256x256xf32> to vector<256x256xbf16>
      %c0_15 = arith.constant 0 : index
      %c0_16 = arith.constant 0 : index
      %25 = vector.load %arg8[%c0_15, %c0_16] : memref<256x256xbf16, #tpu.memory_space<vmem>>, vector<256x256xbf16>
      tpu.vector_store %arg8[%c0_15, %c0_16], %24 {strides = array<i32>} : memref<256x256xbf16, #tpu.memory_space<vmem>>, vector<256x256xbf16>,
    } else {
    }
    return
  }
  func.func @transform_0(%arg0: i32, %arg1: i32, %arg2: i32) -> (i32, i32) {
    %c0_i32 = arith.constant 0 : i32
    return %arg0, %arg2 : i32, i32
  }
  func.func @transform_1(%arg0: i32, %arg1: i32, %arg2: i32) -> (i32, i32) {
    %c0_i32 = arith.constant 0 : i32
    return %arg1, %arg2 : i32, i32
  }
  func.func @transform_2(%arg0: i32, %arg1: i32, %arg2: i32) -> (i32, i32) {
    %c0_i32 = arith.constant 0 : i32
    %c0_i32_0 = arith.constant 0 : i32
    return %c0_i32, %arg1 : i32, i32
  }
  func.func @transform_3(%arg0: i32, %arg1: i32, %arg2: i32) -> (i32, i32) {
    %c0_i32 = arith.constant 0 : i32
    %c0_i32_0 = arith.constant 0 : i32
    return %arg0, %c0_i32 : i32, i32
  }
  func.func @transform_4(%arg0: i32, %arg1: i32, %arg2: i32) -> (i32, i32) {
    %c0_i32 = arith.constant 0 : i32
    %c0_i32_0 = arith.constant 0 : i32
    return %arg0, %c0_i32 : i32, i32
  }
  func.func @transform_5(%arg0: i32, %arg1: i32, %arg2: i32) -> (i32, i32) {
    %c0_i32 = arith.constant 0 : i32
    return %arg0, %arg1 : i32, i32
  }
}

</mosaic_0001>

<bundles_post_ra>
// kernel: tpu_custom_call.1
= control target key start
LH: loop header
LB: loop body
LE: loop exit
PB: predicated region body
PF: predicated region fallthrough
CT: control target
= control target key end

     0   :  { %s5221_s0 = inlined_call_operand.hbm [shape: f32[512,512], index: 0, kind: input, shape index: {}]   ;;  %s5222_s1 = inlined_call_operand.hbm [shape: f32[1024,512], index: 1, kind: input, shape index: {}]   ;;  %s5223_s2 = inlined_call_operand.hbm [shape: f32[1,1024], index: 2, kind: input, shape index: {}]   ;;  %s5224_s3 = inlined_call_operand.hbm [shape: f32[512,128], index: 3, kind: input, shape index: {}]   ;;  %s5225_s4 = inlined_call_operand.hbm [shape: f32[512,128], index: 4, kind: input, shape index: {}]   ;;  %s5226_s5 = inlined_call_operand.hbm [shape: bf16[512,1024], index: 5, kind: output, shape index: {}]  }
   0x1   :  { %5318 = sst [smem:[#allocation112_spill]] %s5221_s0 }
   0x2   :  { %5319 = sst [smem:[#allocation113_spill]] %s5222_s1 }
   0x3   :  { %5320 = sst [smem:[#allocation114_spill]] %s5224_s3 }
   0x4   :  { %5321 = sst [smem:[#allocation115_spill]] %s5226_s5 }
   0x5   :  { %10 = vsyncpa [#allocation4], 0 }
   0x6   :  { %12 = vsyncpa [#allocation4 + $0x1], 0 }
   0x7   :  { %13 = vsyncpa [#allocation7], 0 }
   0x8   :  { %15 = vsyncpa [#allocation7 + $0x1], 0 }
   0x9   :  { %16 = vsyncpa [#allocation10], 0 }
   0xa   :  { %18 = vsyncpa [#allocation10 + $0x1], 0 }
   0xb   :  { %19 = vsyncpa [#allocation5], 0 }
   0xc   :  { %21 = vsyncpa [#allocation5 + $0x1], 0  ;;  %s3530_s18 = smov 0   ;;  %s3532_s19 = smov 0  }
   0xd   :  { %s3534_s20 = smov 0   ;;  %s3536_s21 = smov 0  }
   0xe   :  { %s3538_s22 = smov 0   ;;  %s3540_s23 = smov 0  }
   0xf   :  { %s3542_s24 = smov 0   ;;  %s3544_s25 = smov 0  }
  0x10   :  { %s3546_s26 = smov 0   ;;  %s3548_s27 = smov 0  }
  0x11   :  { %s3550_s28 = smov 0   ;;  %s3552_s29 = smov 0  }
  0x12   :  { %s3554_s30 = smov 0   ;;  %s3556_s6 = smov 0  }
  0x13 LB: > { %5322 = sst [smem:[#allocation17_spill]] %s3432_s18  ;;  %s3599_s7 = sadd.s32 4294967295, %s3484_s6   ;;  %s3484_s6 = sphi %s3556_s6, %s27_s6   ;;  %s3480_s30 = sphi %s3554_s30, %s5554_s30   ;;  %s3476_s29 = sphi %s3552_s29, %s5560_s29   ;;  %s3472_s28 = sphi %s3550_s28, %s5552_s28   ;;  %s3468_s27 = sphi %s3548_s27, %s5559_s27   ;;  %s3464_s26 = sphi %s3546_s26, %s5551_s26   ;;  %s3460_s25 = sphi %s3544_s25, %s5558_s25   ;;  %s3456_s24 = sphi %s3542_s24, %s5557_s24   ;;  %s3452_s23 = sphi %s3540_s23, %s5556_s23   ;;  %s3448_s22 = sphi %s3538_s22, %s5555_s22   ;;  %s3444_s21 = sphi %s3536_s21, %s5548_s21   ;;  %s3440_s20 = sphi %s3534_s20, %s5547_s20   ;;  %s3436_s19 = sphi %s3532_s19, %s5546_s19   ;;  %s3432_s18 = sphi %s3530_s18, %s5545_s18  }
  0x14   : > { %5323 = sst [smem:[#allocation18_spill]] %s3436_s19  ;;  %s2787_s8 = sadd.s32 4294967294, %s3484_s6  }
  0x15   : > { %5324 = sst [smem:[#allocation19_spill]] %s3440_s20  ;;  %s42_s9 = sadd.s32 1, %s3476_s29 }
  0x16   : > { %5325 = sst [smem:[#allocation20_spill]] %s3448_s22  ;;  %p5235_p0 = scmp.eq.s32.totalorder %s3484_s6, 0 }
  0x17   : > { %5326 = sst [smem:[#allocation21_spill]] %s3464_s26  ;;  %p3604_p1 = scmp.ge.s32.totalorder %s42_s9, 4 }
  0x18   : > { %5327 = sst [smem:[#allocation22_spill]] %s3468_s27  ;;  %p5234_p2 = scmp.eq.s32.totalorder %s3599_s7, 0 }
  0x19   : > { %5328 = sst [smem:[#allocation23_spill]] %s3472_s28  ;;  %s83_s11 = sadd.s32 1, %s3452_s23 }
  0x1a   : > { %5329 = sst [smem:[#allocation24_spill]] %s3480_s30  ;;  %p90_p3 = scmp.ne.s32.totalorder %s3452_s23, %s3448_s22 }
  0x1b   : > { %5330 = sst [smem:[#allocation25_spill]] %s3484_s6  ;;  %s5562_s9 = smov (%p3604_p1, %s42_s9), 0 }
  0x1c   : > { %5331 = sst [smem:[#allocation26_spill]] %s3599_s7  ;;  %p3618_p4 = por %p90_p3, %p5235_p0 }
  0x1d   : > { %5333 = sst [smem:[#allocation27_spill]] %s5562_s9  ;;  %p96_p5 = scmp.ne.s32.totalorder %s3448_s22, %s3444_s21 }
  0x1e   : > { %s3625_s13 = ssub.s32 %s3476_s29, %s5562_s9  ;;  %p199_p6 = scmp.ne.s32.totalorder %s3440_s20, %s3436_s19 }
  0x1f   : > { %p81_p7 = scmp.eq.s32.totalorder %s3625_s13, 0  ;;  %p3632_p8 = por %p96_p5, %p5234_p2 }
  0x20   : > { %p200_p9 = scmp.eq.s32.totalorder %s3599_s7, 7  ;;  %p205_p10 = scmp.ne.s32.totalorder %s3436_s19, %s3432_s18 }
  0x21   : > { %s5335_s14 = scalar_select %p3632_p8, 1, 0 }
  0x22   : > { %s3640_s15 = scalar_select %p81_p7, %s3452_s23, %s83_s11  }
  0x23   : > { %5336 = sst [smem:[#allocation28_spill]] %s5335_s14  ;;  %p3642_p11 = por %p200_p9, %p199_p6 }
  0x24   : > { %5337 = sst [smem:[#allocation29_spill]] %s3640_s15  ;;  %p206_p12 = scmp.eq.s32.totalorder %s2787_s8, 7 }
  0x25   : > { %s5338_s16 = scalar_select %p3642_p11, 1, 0 }
  0x26   : > { %p5233_p13 = scmp.lt.s32.totalorder %s3484_s6, 8  ;;  %p3647_p3 = por %p206_p12, %p205_p10 }
  0x27   : > { %5339 = sst [smem:[#allocation30_spill]] %s5338_s16  ;;  %s5236_s21 = sand.u32 1, %s3484_s6  }
  0x28   : > { %s5340_s17 = scalar_select %p3647_p3, 1, 0 }
  0x29   : > { %s5232_s9 = sand.u32 1, %s3452_s23   ;;  %s2890_s28 = sshll.u32 %s3476_s29, 14 }
  0x2a   : > { %5341 = sst [smem:[#allocation31_spill]] %s5340_s17  ;;  %s2794_s5 = sshll.u32 %s5232_s9, 10 }
  0x2b   : > { %s5342_s1 = sld [smem:[#allocation113_spill]]  ;;  %s254_s15 = scalar_lea.vmem [#allocation6], %s2794_s5 }
  0x2c   : > { %s264_s8 = sshll.u32 %s254_s15, 4  ;;  %p3665_p5 = pnand %p5233_p13, %p3618_p4  ;;  %s3669_s8 = int_to_ptr.vmem [resolvable:$true] %s264_s8 }
  0x2d   : > { %s3675_s18 = scalar_lea.sflag [#allocation7], %s5236_s21 }
  0x2e   : > { %s5343_s17 = scalar_select %p3665_p5, 1, 0 }
  0x2f   : > { %p5251_p10 = pneg %p3665_p5 }
  0x31   : > { %s3659_s11 = scalar_lea.hbm %s5342_s1, %s2890_s28  ;;  %s3185_s12 = scalar_lea.hbm %s5342_s1, 65536 }
  0x32   : > { %s3180_s27 = scalar_lea.hbm %s3659_s11, 16384  ;;  %p3186_p13 = scmp.lt.u32.totalorder %s3659_s11, %s5342_s1 }
  0x33   : > { %p3181_p9 = scmp.ne.s32.totalorder %s3659_s11, %s3180_s27  ;;  %p3187_p2 = scmp.lt.u32.totalorder %s3185_s12, %s3180_s27 }
  0x34   : > { %p3189_p6 = scmp.lt.u32.totalorder %s3180_s27, %s3659_s11 }
  0x35   : > { %p3183_p12 = pnand %p5251_p10, %p3181_p9  ;;  %p3188_p0 = por %p3187_p2, %p3186_p13 }
  0x37   : > { %p3184_p4 = pneg %p3183_p12  ;;  %p3190_p7 = por %p3189_p6, %p3188_p0 }
  0x39   : > { %p3191_p3 = pnand %p3190_p7, %p3184_p4 }
  0x3b   : > { %3194 = shalt.err (!%p3191_p3)
}
  0x3c   : > { %s3195_s21 = scalar_lea.vmem %s3669_s8, 16384  ;;  %s3486_s5 = smov [#allocation6]  }
  0x3d   : > { %p3196_p9 = scmp.ne.s32.totalorder %s3669_s8, %s3195_s21  ;;  %s3200_s28 = sshll.u32 %s3486_s5, 4  ;;  %s3201_s28 = int_to_ptr.vmem [resolvable:$false] %s3200_s28 }
  0x3e   : > { %s3202_s9 = scalar_lea.vmem %s3201_s28, 32768  ;;  %p3203_p8 = scmp.lt.s32.totalorder %s3669_s8, %s3201_s28 }
  0x3f   : > { %p3198_p12 = pnand %p3196_p9, %p5251_p10  ;;  %p3204_p2 = scmp.lt.s32.totalorder %s3202_s9, %s3195_s21 }
  0x41   : > { %p3199_p11 = pneg %p3198_p12  ;;  %p3205_p13 = por %p3204_p2, %p3203_p8 }
  0x43   : > { %p3206_p0 = pnand %p3205_p13, %p3199_p11 }
  0x45   : > { %3209 = shalt.err (!%p3206_p0)
}
  0x46   : > { %s5239_s27 = smov 512   ;;  %s5240_s21 = smov 32  }
  0x47   : > { %3043 = dma.hbm_to_vmem [thread:$0]  (!%p3665_p5), %s3659_s11, 16384, %s3669_s8, %s3675_s18, %s5239_s27, %s5239_s27, %s5240_s21  }
  0x48   : > { %p5344_p8 = scmp.lt.s32.totalorder %s3484_s6, 9  ;;  %p5345_p11 = scmp.ge.s32.totalorder %s3484_s6, 1 }
  0x49   : > { %s46_s15 = sadd.s32 1, %s3480_s30  ;;  %s55_s5 = sadd.s32 1, %s3464_s26 }
  0x4a   : > { %p3710_p3 = pnand %p5345_p11, %p5344_p8  ;;  %s5564_s15 = smov (!%p3604_p1, %s46_s15), %s3480_s30 }
  0x4b   : > { %p62_p6 = scmp.ne.s32.totalorder %s3464_s26, %s3460_s25  ;;  %p48_p7 = scmp.ge.s32.totalorder %s5564_s15, 2 }
  0x4c   : > { %s5346_s12 = scalar_select %p3710_p3, 1, 0 }
  0x4d   : > { %p68_p4 = scmp.ne.s32.totalorder %s3460_s25, %s3456_s24  ;;  %p5347_p9 = scmp.eq.s32.totalorder %s3484_s6, 0 }
  0x4e   : > { %s189_s11 = sadd.s32 1, %s3440_s20  ;;  %s5566_s15 = smov (%p48_p7, %s5564_s15), 0 }
  0x4f   : > { %p64_p12 = por %p5347_p9, %p62_p6  ;;  %5348 = sst [smem:[#allocation32_spill]] %s5566_s15 }
  0x50   : > { %p5349_p2 = scmp.eq.s32.totalorder %s3599_s7, 0  ;;  %s3735_s10 = sand.u32 1, %s3464_s26  }
  0x51   : > { %s50_s28 = ssub.s32 %s3480_s30, %s5566_s15  ;;  %p5351_p1 = scmp.lt.s32.totalorder %s3484_s6, 8 }
  0x52   : > { %p3730_p13 = por %p5349_p2, %p68_p4  ;;  %p53_p8 = scmp.eq.s32.totalorder %s50_s28, 0 }
  0x53   : > { %p3741_p0 = pnand %p5351_p1, %p64_p12  ;;  %s186_s9 = sor.u32 %s3625_s13, %s50_s28 }
  0x54   : > { %s5350_s8 = scalar_select %p3730_p13, 1, 0 }
  0x55   : > { %s5352_s24 = scalar_select %p3741_p0, 1, 0 }
  0x56   : > { %p187_p11 = scmp.eq.s32.totalorder %s186_s9, 0  ;;  %s5249_s1 = sshll.u32 %s3735_s10, 8 }
  0x57   : > { %s3747_s27 = scalar_select %p53_p8, %s3464_s26, %s55_s5  }
  0x58   : > { %s3750_s21 = scalar_select %p187_p11, %s3440_s20, %s189_s11  }
  0x59   : > { %5353 = sst [smem:[#allocation33_spill]] %s3747_s27  ;;  %s5250_s16 = sshll.u32 %s3480_s30, 12 }
  0x5a   : > { %5354 = sst [smem:[#allocation34_spill]] %s3750_s21  ;;  %s5355_s3 = sld [smem:[#allocation114_spill]] }
  0x5b   : > { %s297_s22 = scalar_lea.vmem [#allocation9], %s5249_s1  ;;  %s5356_s5 = sand.u32 1, %s3484_s6  }
  0x5c   : > { %s304_s13 = sshll.u32 %s297_s22, 4  ;;  %s3767_s11 = scalar_lea.sflag [#allocation10], %s5356_s5  ;;  %s3763_s13 = int_to_ptr.vmem [resolvable:$true] %s304_s13 }
  0x5d   : > { %p3773_p7 = pneg %p3741_p0 }
  0x5f   : > { %s5357_s9 = scalar_select %p3773_p7, 1, 0 }
  0x60   : > { %s3759_s15 = scalar_lea.hbm %s5355_s3, %s5250_s16  ;;  %s3215_s22 = scalar_lea.hbm %s5355_s3, 8192 }
  0x61   : > { %s3210_s28 = scalar_lea.hbm %s3759_s15, 4096  ;;  %p3216_p12 = scmp.lt.u32.totalorder %s3759_s15, %s5355_s3 }
  0x62   : > { %p3211_p6 = scmp.ne.s32.totalorder %s3759_s15, %s3210_s28  ;;  %p3217_p2 = scmp.lt.u32.totalorder %s3215_s22, %s3210_s28 }
  0x63   : > { %p3219_p8 = scmp.lt.u32.totalorder %s3210_s28, %s3759_s15 }
  0x64   : > { %p3213_p4 = pnand %p3773_p7, %p3211_p6  ;;  %p3218_p1 = por %p3217_p2, %p3216_p12 }
  0x66   : > { %p3214_p9 = pneg %p3213_p4  ;;  %p3220_p11 = por %p3219_p8, %p3218_p1 }
  0x68   : > { %p3221_p10 = pnand %p3220_p11, %p3214_p9 }
  0x6a   : > { %3224 = shalt.err (!%p3221_p10)
}
  0x6b   : > { %s3225_s5 = scalar_lea.vmem %s3763_s13, 4096  ;;  %s3489_s19 = smov [#allocation9]  }
  0x6c   : > { %p3226_p6 = scmp.ne.s32.totalorder %s3763_s13, %s3225_s5  ;;  %s3230_s14 = sshll.u32 %s3489_s19, 4  ;;  %s3231_s14 = int_to_ptr.vmem [resolvable:$false] %s3230_s14 }
  0x6d   : > { %s3232_s1 = scalar_lea.vmem %s3231_s14, 8192  ;;  %p3233_p3 = scmp.lt.s32.totalorder %s3763_s13, %s3231_s14 }
  0x6e   : > { %p3228_p4 = pnand %p3226_p6, %p3773_p7  ;;  %p3234_p5 = scmp.lt.s32.totalorder %s3232_s1, %s3225_s5 }
  0x70   : > { %p3229_p13 = pneg %p3228_p4  ;;  %p3235_p12 = por %p3234_p5, %p3233_p3 }
  0x72   : > { %p3236_p2 = pnand %p3235_p12, %p3229_p13 }
  0x74   : > { %3239 = shalt.err (!%p3236_p2)
}
  0x75   : > { %s5260_s16 = smov 128   ;;  %s5261_s28 = smov 8  }
  0x76   : > { %3049 = dma.hbm_to_vmem [thread:$0]  (!%p3741_p0), %s3759_s15, 4096, %s3763_s13, %s3767_s11, %s5260_s16, %s5260_s16, %s5261_s28  }
  0x77   : > { %s5358_s22 = sshll.u32 %s3480_s30, 12  ;;  %s5359_s1 = sshll.u32 %s3735_s10, 8 }
  0x78   : > { %s3805_s14 = scalar_lea.hbm %s5225_s4, %s5358_s22  ;;  %s318_s3 = scalar_lea.vmem [#allocation11], %s5359_s1 }
  0x79   : > { %s325_s27 = sshll.u32 %s318_s3, 4  ;;  %s2790_s26 = sshll.u32 %s3735_s10, 10  ;;  %s3809_s27 = int_to_ptr.vmem [resolvable:$true] %s325_s27 }
  0x7a   : > { %s2888_s21 = sshll.u32 %s3480_s30, 14  ;;  %s5360_s0 = sld [smem:[#allocation112_spill]] }
  0x7b   : > { %s230_s15 = scalar_lea.vmem [#allocation3], %s2790_s26  ;;  %s5361_s22 = sand.u32 1, %s3452_s23  }
  0x7c   : > { %s240_s13 = sshll.u32 %s230_s15, 4  ;;  %s3820_s5 = sshll.u32 %s5361_s22, 1  ;;  %s3822_s13 = int_to_ptr.vmem [resolvable:$true] %s240_s13 }
  0x7d   : > { %s227_s3 = scalar_lea.sflag [#allocation4], %s3735_s10 }
  0x80   : > { %s3816_s7 = scalar_lea.hbm %s5360_s0, %s2888_s21  ;;  %s3245_s21 = scalar_lea.hbm %s5360_s0, 32768 }
  0x81   : > { %s3240_s19 = scalar_lea.hbm %s3816_s7, 16384  ;;  %p3246_p13 = scmp.lt.u32.totalorder %s3816_s7, %s5360_s0 }
  0x82   : > { %p3241_p5 = scmp.ne.s32.totalorder %s3816_s7, %s3240_s19  ;;  %p3247_p9 = scmp.lt.u32.totalorder %s3245_s21, %s3240_s19 }
  0x83   : > { %p3249_p8 = scmp.lt.u32.totalorder %s3240_s19, %s3816_s7 }
  0x84   : > { %p3243_p10 = pnand %p3241_p5, %p3773_p7  ;;  %p3248_p1 = por %p3247_p9, %p3246_p13 }
  0x86   : > { %p3244_p3 = pneg %p3243_p10  ;;  %p3250_p11 = por %p3249_p8, %p3248_p1 }
  0x88   : > { %p3251_p6 = pnand %p3250_p11, %p3244_p3 }
  0x8a   : > { %3254 = shalt.err (!%p3251_p6)
}
  0x8b   : > { %s3255_s26 = scalar_lea.vmem %s3822_s13, 16384  ;;  %s3492_s15 = smov [#allocation3]  }
  0x8c   : > { %p3256_p4 = scmp.ne.s32.totalorder %s3822_s13, %s3255_s26  ;;  %s3260_s22 = sshll.u32 %s3492_s15, 4  ;;  %s3261_s22 = int_to_ptr.vmem [resolvable:$false] %s3260_s22 }
  0x8d   : > { %s3262_s16 = scalar_lea.vmem %s3261_s22, 32768  ;;  %p3263_p5 = scmp.lt.s32.totalorder %s3822_s13, %s3261_s22 }
  0x8e   : > { %p3258_p12 = pnand %p3256_p4, %p3773_p7  ;;  %p3264_p10 = scmp.lt.s32.totalorder %s3262_s16, %s3255_s26 }
  0x90   : > { %p3259_p2 = pneg %p3258_p12  ;;  %p3265_p13 = por %p3264_p10, %p3263_p5 }
  0x92   : > { %p3266_p9 = pnand %p3265_p13, %p3259_p2 }
  0x94   : > { %3269 = shalt.err (!%p3266_p9)
}
  0x95   : > { %s5362_s19 = smov 32   ;;  %s5363_s20 = smov 512  }
  0x96   : > { %3040 = dma.hbm_to_vmem [thread:$0]  (!%p3741_p0), %s3816_s7, 16384, %s3822_s13, %s227_s3, %s5363_s20, %s5363_s20, %s5362_s19  }
  0x97   : > { %s2891_s6 = sshll.u32 %s3476_s29, 5  ;;  %s278_s21 = scalar_lea.vmem [#allocation8], %s3820_s5 }
  0x98   : > { %s286_s1 = sshll.u32 %s278_s21, 4  ;;  %s284_s22 = scalar_lea.hbm %s5223_s2, %s2891_s6  ;;  %s287_s1 = int_to_ptr.vmem [resolvable:$true] %s286_s1 }
  0x99   : > { %s3270_s16 = scalar_lea.hbm %s284_s22, 32  ;;  %p5364_p1 = scmp.ne.s32.totalorder %s5343_s17, 0 }
  0x9a   : > { %p3271_p3 = scmp.ne.s32.totalorder %s284_s22, %s3270_s16  ;;  %s3275_s0 = scalar_lea.hbm %s5223_s2, 128 }
  0x9b   : > { %p5365_p8 = pneg %p5364_p1  ;;  %p3276_p4 = scmp.lt.u32.totalorder %s284_s22, %s5223_s2 }
  0x9c   : > { %p3277_p12 = scmp.lt.u32.totalorder %s3275_s0, %s3270_s16  ;;  %p3279_p5 = scmp.lt.u32.totalorder %s3270_s16, %s284_s22 }
  0x9d   : > { %p3273_p11 = pnand %p3271_p3, %p5365_p8 }
  0x9e   : > { %p3278_p2 = por %p3277_p12, %p3276_p4 }
  0x9f   : > { %p3274_p6 = pneg %p3273_p11 }
  0xa0   : > { %p3280_p10 = por %p3279_p5, %p3278_p2 }
  0xa2   : > { %p3281_p13 = pnand %p3280_p10, %p3274_p6 }
  0xa4   : > { %3284 = shalt.err (!%p3281_p13)
}
  0xa5   : > { %s3285_s13 = scalar_lea.vmem %s287_s1, 32  ;;  %p5366_p3 = pmov %p5365_p8 }
  0xa6   : > { %p3286_p9 = scmp.ne.s32.totalorder %s287_s1, %s3285_s13  ;;  %s3493_s5 = smov [#allocation8]  }
  0xa7   : > { %s3290_s28 = sshll.u32 %s3493_s5, 4  ;;  %s3291_s28 = int_to_ptr.vmem [resolvable:$false] %s3290_s28 }
  0xa8   : > { %p3288_p8 = pnand %p3286_p9, %p5366_p3  ;;  %s3292_s3 = scalar_lea.vmem %s3291_s28, 64 }
  0xa9   : > { %p3293_p0 = scmp.lt.s32.totalorder %s287_s1, %s3291_s28  ;;  %p3294_p7 = scmp.lt.s32.totalorder %s3292_s3, %s3285_s13 }
  0xaa   : > { %p3289_p11 = pneg %p3288_p8 }
  0xab   : > { %p3295_p4 = por %p3294_p7, %p3293_p0 }
  0xad   : > { %p3296_p12 = pnand %p3295_p4, %p3289_p11 }
  0xaf   : > { %3299 = shalt.err (!%p3296_p12)
}
  0xb0   : > { %3046 = dma.hbm_to_vmem [thread:$0]  (!%p5364_p1), %s284_s22, 32, %s287_s1, %s3675_s18  }
  0xb1   : > { %s3300_s0 = scalar_lea.hbm %s3805_s14, 4096  ;;  %p5367_p2 = scmp.ne.s32.totalorder %s5357_s9, 0 }
  0xb2   : > { %p3301_p6 = scmp.ne.s32.totalorder %s3805_s14, %s3300_s0  ;;  %s3305_s20 = scalar_lea.hbm %s5225_s4, 8192 }
  0xb3   : > { %p3306_p0 = scmp.lt.u32.totalorder %s3805_s14, %s5225_s4  ;;  %p3307_p7 = scmp.lt.u32.totalorder %s3305_s20, %s3300_s0 }
  0xb4   : > { %p3303_p5 = pnand %p3301_p6, %p5367_p2  ;;  %p3309_p9 = scmp.lt.u32.totalorder %s3300_s0, %s3805_s14 }
  0xb5   : > { %p3308_p13 = por %p3307_p7, %p3306_p0 }
  0xb6   : > { %p3304_p10 = pneg %p3303_p5 }
  0xb7   : > { %p3310_p3 = por %p3309_p9, %p3308_p13 }
  0xb9   : > { %p3311_p8 = pnand %p3310_p3, %p3304_p10 }
  0xbb   : > { %3314 = shalt.err (!%p3311_p8)
}
  0xbc   : > { %s3315_s17 = scalar_lea.vmem %s3809_s27, 4096  ;;  %s3494_s18 = smov [#allocation11]  }
  0xbd   : > { %p3316_p1 = scmp.ne.s32.totalorder %s3809_s27, %s3315_s17  ;;  %s3320_s1 = sshll.u32 %s3494_s18, 4  ;;  %s3321_s1 = int_to_ptr.vmem [resolvable:$false] %s3320_s1 }
  0xbe   : > { %s3322_s26 = scalar_lea.vmem %s3321_s1, 8192  ;;  %p3323_p12 = scmp.lt.s32.totalorder %s3809_s27, %s3321_s1 }
  0xbf   : > { %p3318_p11 = pnand %p3316_p1, %p5367_p2  ;;  %p3324_p6 = scmp.lt.s32.totalorder %s3322_s26, %s3315_s17 }
  0xc1   : > { %p3319_p4 = pneg %p3318_p11  ;;  %p3325_p5 = por %p3324_p6, %p3323_p12 }
  0xc3   : > { %p3326_p0 = pnand %p3325_p5, %p3319_p4 }
  0xc5   : > { %3329 = shalt.err (!%p3326_p0)
}
  0xc6   : > { %p5368_p10 = scmp.ne.s32.totalorder %s5352_s24, 0  ;;  %s5369_s15 = smov 8  }
  0xc7   : > { %s5370_s22 = smov 128   ;;  %p5371_p2 = scmp.ne.s32.totalorder %s5346_s12, 0 }
  0xc8   : > { %3052 = dma.hbm_to_vmem [thread:$0]  (!%p5368_p10), %s3805_s14, 4096, %s3809_s27, %s3767_s11, %s5370_s22, %s5370_s22, %s5369_s15  }
  0xc9   : > { %337 = sbr.rel (%p5371_p2) target bundleno = 1025 (0x401), region = 40  ;;  %s3899_s9 = sand.u32 (!%p5371_p2), 1, %s3460_s25  }
  0xca   : > { %s2808_s16 = sshll.u32 (!%p5371_p2), %s3899_s9, 10  ;;  %s340_s10 = scalar_lea.sflag (!%p5371_p2), [#allocation4], %s3899_s9 }
  0xcb   : > { %s3903_s7 = scalar_lea.vmem (!%p5371_p2), [#allocation3], %s2808_s16  ;;  %p5372_p7 = scmp.ne.s32.totalorder (!%p5371_p2), %s5350_s8, 0 }
  0xd0   : > { %3415 = dma.done.wait (%p5372_p7), %s340_s10, 16384  }
  0xd1   : > { %3417 = vsyncadd (%p5372_p7), %s340_s10, 4294950912  ;;  %s5373_s24 = sld [smem:[#allocation26_spill]]  ;;  %s5374_s27 = sld [smem:[#allocation20_spill]] }
  0xd2   : > { %s5375_s11 = sld [smem:[#allocation28_spill]] }
  0xd7   : > { %s348_s12 = sand.u32 1, %s5373_s24   ;;  %s350_s14 = sand.u32 1, %s5374_s27  }
  0xd8   : > { %s2809_s13 = sshll.u32 %s350_s14, 10  ;;  %s349_s5 = scalar_lea.sflag [#allocation7], %s348_s12 }
  0xd9   : > { %s3911_s28 = scalar_lea.vmem [#allocation6], %s2809_s13  ;;  %p5376_p13 = scmp.ne.s32.totalorder %s5375_s11, 0 }
  0xdb   : > { %3419 = dma.done.wait (%p5376_p13), %s349_s5, 16416  }
  0xdc   : > { %3421 = vsyncadd (%p5376_p13), %s349_s5, 4294950880  ;;  %s3917_s3 = sshll.u32 %s350_s14, 1  ;;  %s2811_s0 = sshll.u32 %s3899_s9, 8 }
  0xdd   : > { %s361_s30 = scalar_lea.vmem [#allocation8], %s3917_s3  ;;  %s367_s19 = scalar_lea.sflag [#allocation10], %s348_s12 }
  0xde   : > { %s3923_s20 = scalar_lea.vmem [#allocation9], %s2811_s0 }
  0xdf   : > { %3423 = dma.done.wait (%p5372_p7), %s367_s19, 8192  }
  0xe0   : > { %3425 = vsyncadd (%p5372_p7), %s367_s19, 4294959104  ;;  %s5377_s6 = sld [smem:[#allocation18_spill]]  ;;  %v760_v0 = vld [vmem:[%s3911_s28 + $0x8] sm:$0xff]  ;;  %v762_v2 = vld [vmem:[%s3911_s28 + $0x18] sm:$0xff]  ;;  %s5378_s8 = sld [smem:[#allocation22_spill]] }
  0xe1   : > { %v764_v1 = vld [vmem:[%s3911_s28 + $0x28] sm:$0xff]  ;;  %v766_v4 = vld [vmem:[%s3911_s28 + $0x38] sm:$0xff]  ;;  %v759_v5 = vld [vmem:[%s3911_s28] sm:$0xff]  ;;  %s4193_s18 = scalar_lea.vmem [#allocation11], %s2811_s0 }
  0xe2   : > { %v888_v3 = vpack.c.bf16 %v764_v1, %v760_v0  ;;  %v763_v6 = vld [vmem:[%s3911_s28 + $0x20] sm:$0xff]  ;;  %v890_v7 = vpack.c.bf16 %v766_v4, %v762_v2  ;;  %v761_v9 = vld [vmem:[%s3911_s28 + $0x10] sm:$0xff]  ;;  %v768_v11 = vld [vmem:[%s3911_s28 + $0x48] sm:$0xff] }
  0xe3   : > { %v887_v8 = vpack.c.bf16 %v763_v6, %v759_v5  ;;  %v765_v10 = vld [vmem:[%s3911_s28 + $0x30] sm:$0xff]  ;;  %v772_v13 = vld [vmem:[%s3911_s28 + $0x68] sm:$0xff]  ;;  %v770_v14 = vld [vmem:[%s3911_s28 + $0x58] sm:$0xff] }
  0xe4   : > { %951 = vmatprep.subr.bf16.mxu1 %v888_v3  ;;  %v889_v12 = vpack.c.bf16 %v765_v10, %v761_v9  ;;  %v774_v15 = vld [vmem:[%s3911_s28 + $0x78] sm:$0xff]  ;;  %1144 = vmatprep.subr.bf16.mxu0 %v890_v7  ;;  %v892_v16 = vpack.c.bf16 %v772_v13, %v768_v11  ;;  %v767_v18 = vld [vmem:[%s3911_s28 + $0x40] sm:$0xff]  ;;  %v769_v20 = vld [vmem:[%s3911_s28 + $0x50] sm:$0xff] }
  0xe5   : > { %952 = vmatpush1.bf16.xpose.msra.mxu1 %v887_v8  ;;  %v894_v17 = vpack.c.bf16 %v774_v15, %v770_v14  ;;  %v771_v19 = vld [vmem:[%s3911_s28 + $0x60] sm:$0xff]  ;;  %v773_v21 = vld [vmem:[%s3911_s28 + $0x70] sm:$0xff]  ;;  %v776_v22 = vld [vmem:[%s3911_s28 + $0x88] sm:$0xff] }
  0xe6   : > { %s423_s21 = sand.u32 1, %s5377_s6   ;;  %1145 = vmatpush1.bf16.xpose.msra.mxu0 %v889_v12  ;;  %953 = vmatprep.subr.bf16.mxu1 %v892_v16  ;;  %v780_v23 = vld [vmem:[%s3911_s28 + $0xa8] sm:$0xff]  ;;  %v778_v24 = vld [vmem:[%s3911_s28 + $0x98] sm:$0xff]  ;;  %v891_v26 = vpack.c.bf16 %v771_v19, %v767_v18  ;;  %v893_v27 = vpack.c.bf16 %v773_v21, %v769_v20  ;;  %v775_v30 = vld [vmem:[%s3911_s28 + $0x80] sm:$0xff]  ;;  %p1465_p9 = scmp.lt.s32.totalorder %s5378_s8, 3 }
  0xe7   : > { %s3932_s17 = sshll.u32 %s423_s21, 8  ;;  %1146 = vmatprep.subr.bf16.mxu0 %v894_v17  ;;  %v782_v25 = vld [vmem:[%s3911_s28 + $0xb8] sm:$0xff]  ;;  %v896_v28 = vpack.c.bf16 %v780_v23, %v776_v22  ;;  %v779_v31 = vld [vmem:[%s3911_s28 + $0xa0] sm:$0xff]  ;;  %v777_v32 = vld [vmem:[%s3911_s28 + $0x90] sm:$0xff] }
  0xe8   : > { %v898_v29 = vpack.c.bf16 %v782_v25, %v778_v24  ;;  %v781_v33 = vld [vmem:[%s3911_s28 + $0xb0] sm:$0xff]  ;;  %v784_v34 = vld [vmem:[%s3911_s28 + $0xc8] sm:$0xff]  ;;  %v786_v36 = vld [vmem:[%s3911_s28 + $0xd8] sm:$0xff]  ;;  %v895_v38 = vpack.c.bf16 %v779_v31, %v775_v30  ;;  %s4196_s1 = scalar_lea.vmem [#allocation12], %s3932_s17 }
  0xe9   : > { %v788_v35 = vld [vmem:[%s3911_s28 + $0xe8] sm:$0xff]  ;;  %v790_v37 = vld [vmem:[%s3911_s28 + $0xf8] sm:$0xff]  ;;  %v897_v39 = vpack.c.bf16 %v781_v33, %v777_v32  ;;  %v783_v42 = vld [vmem:[%s3911_s28 + $0xc0] sm:$0xff] }
  0xea   : > { %v900_v40 = vpack.c.bf16 %v788_v35, %v784_v34  ;;  %v902_v41 = vpack.c.bf16 %v790_v37, %v786_v36  ;;  %v787_v43 = vld [vmem:[%s3911_s28 + $0xe0] sm:$0xff]  ;;  %v785_v44 = vld [vmem:[%s3911_s28 + $0xd0] sm:$0xff]  ;;  %v792_v46 = vld [vmem:[%s3911_s28 + $0x108] sm:$0xff] }
  0xeb   : > { %v789_v45 = vld [vmem:[%s3911_s28 + $0xf0] sm:$0xff]  ;;  %v796_v47 = vld [vmem:[%s3911_s28 + $0x128] sm:$0xff]  ;;  %v794_v48 = vld [vmem:[%s3911_s28 + $0x118] sm:$0xff]  ;;  %v899_v50 = vpack.c.bf16 %v787_v43, %v783_v42 }
  0xec   : > { %v798_v49 = vld [vmem:[%s3911_s28 + $0x138] sm:$0xff]  ;;  %v901_v51 = vpack.c.bf16 %v789_v45, %v785_v44  ;;  %v904_v52 = vpack.c.bf16 %v796_v47, %v792_v46  ;;  %v791_v54 = vld [vmem:[%s3911_s28 + $0x100] sm:$0xff]  ;;  %v793_v56 = vld [vmem:[%s3911_s28 + $0x110] sm:$0xff] }
  0xed   : > { %954 = vmatpush1.bf16.xpose.msra.mxu1 %v891_v26  ;;  %v906_v53 = vpack.c.bf16 %v798_v49, %v794_v48  ;;  %v795_v55 = vld [vmem:[%s3911_s28 + $0x120] sm:$0xff]  ;;  %v797_v57 = vld [vmem:[%s3911_s28 + $0x130] sm:$0xff]  ;;  %v800_v58 = vld [vmem:[%s3911_s28 + $0x148] sm:$0xff] }
  0xee   : > { %1147 = vmatpush1.bf16.xpose.msra.mxu0 %v893_v27  ;;  %955 = vmatprep.subr.bf16.mxu1 %v896_v28  ;;  %v804_v59 = vld [vmem:[%s3911_s28 + $0x168] sm:$0xff]  ;;  %v802_v60 = vld [vmem:[%s3911_s28 + $0x158] sm:$0xff]  ;;  %v903_v62 = vpack.c.bf16 %v795_v55, %v791_v54  ;;  %v905_v63 = vpack.c.bf16 %v797_v57, %v793_v56  ;;  %v799_v2 = vld [vmem:[%s3911_s28 + $0x140] sm:$0xff] }
  0xef   : > { %1148 = vmatprep.subr.bf16.mxu0 %v898_v29  ;;  %v806_v61 = vld [vmem:[%s3911_s28 + $0x178] sm:$0xff]  ;;  %v908_v0 = vpack.c.bf16 %v804_v59, %v800_v58  ;;  %v803_v3 = vld [vmem:[%s3911_s28 + $0x160] sm:$0xff]  ;;  %v801_v4 = vld [vmem:[%s3911_s28 + $0x150] sm:$0xff] }
  0xf0   : > { %v910_v1 = vpack.c.bf16 %v806_v61, %v802_v60  ;;  %v805_v5 = vld [vmem:[%s3911_s28 + $0x170] sm:$0xff]  ;;  %v808_v6 = vld [vmem:[%s3911_s28 + $0x188] sm:$0xff]  ;;  %v810_v8 = vld [vmem:[%s3911_s28 + $0x198] sm:$0xff]  ;;  %v907_v10 = vpack.c.bf16 %v803_v3, %v799_v2 }
  0xf1   : > { %v812_v7 = vld [vmem:[%s3911_s28 + $0x1a8] sm:$0xff]  ;;  %v814_v9 = vld [vmem:[%s3911_s28 + $0x1b8] sm:$0xff]  ;;  %v909_v11 = vpack.c.bf16 %v805_v5, %v801_v4  ;;  %v807_v20 = vld [vmem:[%s3911_s28 + $0x180] sm:$0xff] }
  0xf2   : > { %v912_v12 = vpack.c.bf16 %v812_v7, %v808_v6  ;;  %v914_v13 = vpack.c.bf16 %v814_v9, %v810_v8  ;;  %v568_v14 = vld [vmem:[%s3903_s7 + $0x8] sm:$0xff]  ;;  %v570_v16 = vld [vmem:[%s3903_s7 + $0x18] sm:$0xff]  ;;  %v811_v21 = vld [vmem:[%s3911_s28 + $0x1a0] sm:$0xff] }
  0xf3   : > { %v572_v15 = vld [vmem:[%s3903_s7 + $0x28] sm:$0xff]  ;;  %v574_v17 = vld [vmem:[%s3903_s7 + $0x38] sm:$0xff]  ;;  %v809_v22 = vld [vmem:[%s3911_s28 + $0x190] sm:$0xff]  ;;  %v911_v28 = vpack.c.bf16 %v811_v21, %v807_v20 }
  0xf4   : > { %v696_v18 = vpack.c.bf16 %v572_v15, %v568_v14  ;;  %v698_v19 = vpack.c.bf16 %v574_v17, %v570_v16  ;;  %v813_v23 = vld [vmem:[%s3911_s28 + $0x1b0] sm:$0xff]  ;;  %v816_v24 = vld [vmem:[%s3911_s28 + $0x1c8] sm:$0xff]  ;;  %v818_v26 = vld [vmem:[%s3911_s28 + $0x1d8] sm:$0xff] }
  0xf5   : > { %956 = vmatpush1.bf16.xpose.msra.mxu1 %v895_v38  ;;  %v820_v25 = vld [vmem:[%s3911_s28 + $0x1e8] sm:$0xff]  ;;  %v822_v27 = vld [vmem:[%s3911_s28 + $0x1f8] sm:$0xff]  ;;  %v913_v29 = vpack.c.bf16 %v813_v23, %v809_v22  ;;  %v815_v32 = vld [vmem:[%s3911_s28 + $0x1c0] sm:$0xff] }
  0xf6   : > { %1149 = vmatpush1.bf16.xpose.msra.mxu0 %v897_v39  ;;  %957 = vmatprep.subr.bf16.mxu1 %v900_v40  ;;  %v916_v30 = vpack.c.bf16 %v820_v25, %v816_v24  ;;  %v918_v31 = vpack.c.bf16 %v822_v27, %v818_v26  ;;  %v819_v33 = vld [vmem:[%s3911_s28 + $0x1e0] sm:$0xff]  ;;  %v817_v34 = vld [vmem:[%s3911_s28 + $0x1d0] sm:$0xff]  ;;  %v824_v36 = vld [vmem:[%s3911_s28 + $0x208] sm:$0xff] }
  0xf7   : > { %1150 = vmatprep.subr.bf16.mxu0 %v902_v41  ;;  %983 = vmatprep.mubr.bf16.mxu1 %v696_v18  ;;  %v821_v35 = vld [vmem:[%s3911_s28 + $0x1f0] sm:$0xff]  ;;  %v828_v37 = vld [vmem:[%s3911_s28 + $0x228] sm:$0xff]  ;;  %v826_v38 = vld [vmem:[%s3911_s28 + $0x218] sm:$0xff]  ;;  %v915_v40 = vpack.c.bf16 %v819_v33, %v815_v32 }
  0xf8   : > { %1176 = vmatprep.mubr.bf16.mxu0 %v698_v19  ;;  %v830_v39 = vld [vmem:[%s3911_s28 + $0x238] sm:$0xff]  ;;  %v917_v41 = vpack.c.bf16 %v821_v35, %v817_v34  ;;  %v920_v42 = vpack.c.bf16 %v828_v37, %v824_v36  ;;  %v823_v44 = vld [vmem:[%s3911_s28 + $0x200] sm:$0xff]  ;;  %v825_v46 = vld [vmem:[%s3911_s28 + $0x210] sm:$0xff] }
  0xf9   : > { %v922_v43 = vpack.c.bf16 %v830_v39, %v826_v38  ;;  %v827_v45 = vld [vmem:[%s3911_s28 + $0x220] sm:$0xff]  ;;  %v829_v47 = vld [vmem:[%s3911_s28 + $0x230] sm:$0xff]  ;;  %v832_v48 = vld [vmem:[%s3911_s28 + $0x248] sm:$0xff] }
  0xfa   : > { %v836_v49 = vld [vmem:[%s3911_s28 + $0x268] sm:$0xff]  ;;  %v831_v56 = vld [vmem:[%s3911_s28 + $0x240] sm:$0xff]  ;;  %v833_v58 = vld [vmem:[%s3911_s28 + $0x250] sm:$0xff] }
  0xfb   : > { %v924_v54 = vpack.c.bf16 %v836_v49, %v832_v48  ;;  %v835_v57 = vld [vmem:[%s3911_s28 + $0x260] sm:$0xff]  ;;  %v837_v59 = vld [vmem:[%s3911_s28 + $0x270] sm:$0xff]  ;;  %v840_v60 = vld [vmem:[%s3911_s28 + $0x288] sm:$0xff] }
  0xfc   : > { %v844_v61 = vld [vmem:[%s3911_s28 + $0x2a8] sm:$0xff]  ;;  %v839_v4 = vld [vmem:[%s3911_s28 + $0x280] sm:$0xff]  ;;  %v841_v6 = vld [vmem:[%s3911_s28 + $0x290] sm:$0xff] }
  0xfd   : > { %958 = vmatpush1.bf16.xpose.msra.mxu1 %v899_v50  ;;  %v834_v50 = vld [vmem:[%s3911_s28 + $0x258] sm:$0xff]  ;;  %v928_v2 = vpack.c.bf16 %v844_v61, %v840_v60  ;;  %v843_v5 = vld [vmem:[%s3911_s28 + $0x2a0] sm:$0xff]  ;;  %v845_v7 = vld [vmem:[%s3911_s28 + $0x2b0] sm:$0xff] }
  0xfe   : > { %1151 = vmatpush1.bf16.xpose.msra.mxu0 %v901_v51  ;;  %959 = vmatprep.subr.bf16.mxu1 %v904_v52  ;;  %v838_v51 = vld [vmem:[%s3911_s28 + $0x278] sm:$0xff]  ;;  %v919_v52 = vpack.c.bf16 %v827_v45, %v823_v44  ;;  %v848_v8 = vld [vmem:[%s3911_s28 + $0x2c8] sm:$0xff]  ;;  %v847_v16 = vld [vmem:[%s3911_s28 + $0x2c0] sm:$0xff] }
  0xff   : > { %1152 = vmatprep.subr.bf16.mxu0 %v906_v53  ;;  %v921_v53 = vpack.c.bf16 %v829_v47, %v825_v46  ;;  %v926_v55 = vpack.c.bf16 %v838_v51, %v834_v50  ;;  %v852_v9 = vld [vmem:[%s3911_s28 + $0x2e8] sm:$0xff]  ;;  %v851_v17 = vld [vmem:[%s3911_s28 + $0x2e0] sm:$0xff]  ;;  %v849_v18 = vld [vmem:[%s3911_s28 + $0x2d0] sm:$0xff] }
 0x100   : > { %v932_v14 = vpack.c.bf16 %v852_v9, %v848_v8  ;;  %v853_v19 = vld [vmem:[%s3911_s28 + $0x2f0] sm:$0xff]  ;;  %v856_v20 = vld [vmem:[%s3911_s28 + $0x308] sm:$0xff]  ;;  %v858_v22 = vld [vmem:[%s3911_s28 + $0x318] sm:$0xff]  ;;  %v931_v24 = vpack.c.bf16 %v851_v17, %v847_v16 }
 0x101   : > { %v860_v21 = vld [vmem:[%s3911_s28 + $0x328] sm:$0xff]  ;;  %v862_v23 = vld [vmem:[%s3911_s28 + $0x338] sm:$0xff]  ;;  %v933_v25 = vpack.c.bf16 %v853_v19, %v849_v18  ;;  %v569_v8 = vld [vmem:[%s3903_s7 + $0x10] sm:$0xff] }
 0x102   : > { %v936_v26 = vpack.c.bf16 %v860_v21, %v856_v20  ;;  %v938_v27 = vpack.c.bf16 %v862_v23, %v858_v22  ;;  %v864_v32 = vld [vmem:[%s3911_s28 + $0x348] sm:$0xff]  ;;  %v866_v34 = vld [vmem:[%s3911_s28 + $0x358] sm:$0xff]  ;;  %v573_v9 = vld [vmem:[%s3903_s7 + $0x30] sm:$0xff] }
 0x103   : > { %v868_v33 = vld [vmem:[%s3911_s28 + $0x368] sm:$0xff]  ;;  %v870_v35 = vld [vmem:[%s3911_s28 + $0x378] sm:$0xff]  ;;  %v575_v18 = vld [vmem:[%s3903_s7 + $0x40] sm:$0xff] }
 0x104   : > { %v940_v38 = vpack.c.bf16 %v868_v33, %v864_v32  ;;  %v942_v39 = vpack.c.bf16 %v870_v35, %v866_v34  ;;  %v872_v44 = vld [vmem:[%s3911_s28 + $0x388] sm:$0xff]  ;;  %v874_v46 = vld [vmem:[%s3911_s28 + $0x398] sm:$0xff]  ;;  %v579_v19 = vld [vmem:[%s3903_s7 + $0x60] sm:$0xff] }
 0x105   : > { %960 = vmatpush1.bf16.xpose.msra.mxu1 %v903_v62  ;;  %v842_v62 = vld [vmem:[%s3911_s28 + $0x298] sm:$0xff]  ;;  %v876_v45 = vld [vmem:[%s3911_s28 + $0x3a8] sm:$0xff]  ;;  %v577_v20 = vld [vmem:[%s3903_s7 + $0x50] sm:$0xff] }
 0x106   : > { %1153 = vmatpush1.bf16.xpose.msra.mxu0 %v905_v63  ;;  %961 = vmatprep.subr.bf16.mxu1 %v908_v0  ;;  %v846_v63 = vld [vmem:[%s3911_s28 + $0x2b8] sm:$0xff]  ;;  %v923_v0 = vpack.c.bf16 %v835_v57, %v831_v56  ;;  %v944_v50 = vpack.c.bf16 %v876_v45, %v872_v44  ;;  %v880_v56 = vld [vmem:[%s3911_s28 + $0x3c8] sm:$0xff]  ;;  %v581_v21 = vld [vmem:[%s3903_s7 + $0x70] sm:$0xff] }
 0x107   : > { %1154 = vmatprep.subr.bf16.mxu0 %v910_v1  ;;  %v925_v1 = vpack.c.bf16 %v837_v59, %v833_v58  ;;  %v930_v3 = vpack.c.bf16 %v846_v63, %v842_v62  ;;  %v878_v47 = vld [vmem:[%s3911_s28 + $0x3b8] sm:$0xff]  ;;  %v884_v57 = vld [vmem:[%s3911_s28 + $0x3e8] sm:$0xff]  ;;  %v585_v32 = vld [vmem:[%s3903_s7 + $0x90] sm:$0xff] }
 0x108   : > { %v946_v51 = vpack.c.bf16 %v878_v47, %v874_v46  ;;  %v882_v58 = vld [vmem:[%s3911_s28 + $0x3d8] sm:$0xff]  ;;  %v948_v62 = vpack.c.bf16 %v884_v57, %v880_v56  ;;  %v584_v22 = vld [vmem:[%s3903_s7 + $0x88] sm:$0xff]  ;;  %v589_v33 = vld [vmem:[%s3903_s7 + $0xb0] sm:$0xff] }
 0x109   : > { %v886_v59 = vld [vmem:[%s3911_s28 + $0x3f8] sm:$0xff]  ;;  %v588_v23 = vld [vmem:[%s3903_s7 + $0xa8] sm:$0xff]  ;;  %v593_v44 = vld [vmem:[%s3903_s7 + $0xd0] sm:$0xff] }
 0x10a   : > { %v950_v63 = vpack.c.bf16 %v886_v59, %v882_v58  ;;  %v592_v34 = vld [vmem:[%s3903_s7 + $0xc8] sm:$0xff]  ;;  %v597_v45 = vld [vmem:[%s3903_s7 + $0xf0] sm:$0xff] }
 0x10b   : > { %v596_v35 = vld [vmem:[%s3903_s7 + $0xe8] sm:$0xff]  ;;  %v601_v56 = vld [vmem:[%s3903_s7 + $0x110] sm:$0xff] }
 0x10c   : > { %v600_v46 = vld [vmem:[%s3903_s7 + $0x108] sm:$0xff]  ;;  %v605_v57 = vld [vmem:[%s3903_s7 + $0x130] sm:$0xff] }
 0x10d   : > { %962 = vmatpush1.bf16.xpose.msra.mxu1 %v907_v10  ;;  %v850_v10 = vld [vmem:[%s3911_s28 + $0x2d8] sm:$0xff]  ;;  %v604_v47 = vld [vmem:[%s3903_s7 + $0x128] sm:$0xff] }
 0x10e   : > { %1155 = vmatpush1.bf16.xpose.msra.mxu0 %v909_v11  ;;  %963 = vmatprep.subr.bf16.mxu1 %v912_v12  ;;  %v854_v11 = vld [vmem:[%s3911_s28 + $0x2f8] sm:$0xff]  ;;  %v927_v12 = vpack.c.bf16 %v843_v5, %v839_v4  ;;  %v608_v58 = vld [vmem:[%s3903_s7 + $0x148] sm:$0xff] }
 0x10f   : > { %1156 = vmatprep.subr.bf16.mxu0 %v914_v13  ;;  %v929_v13 = vpack.c.bf16 %v845_v7, %v841_v6  ;;  %v934_v15 = vpack.c.bf16 %v854_v11, %v850_v10  ;;  %v567_v6 = vld [vmem:[%s3903_s7] sm:$0xff]  ;;  %v576_v10 = vld [vmem:[%s3903_s7 + $0x48] sm:$0xff] }
 0x110   : > { %v571_v7 = vld [vmem:[%s3903_s7 + $0x20] sm:$0xff]  ;;  %v580_v11 = vld [vmem:[%s3903_s7 + $0x68] sm:$0xff] }
 0x111   : > { %v700_v16 = vpack.c.bf16 %v580_v11, %v576_v10  ;;  %v612_v59 = vld [vmem:[%s3903_s7 + $0x168] sm:$0xff] }
 0x115   : > { %964 = vmatpush1.bf16.xpose.msra.mxu1 %v911_v28  ;;  %v855_v28 = vld [vmem:[%s3911_s28 + $0x300] sm:$0xff] }
 0x116   : > { %1157 = vmatpush1.bf16.xpose.msra.mxu0 %v913_v29  ;;  %965 = vmatprep.subr.bf16.mxu1 %v916_v30  ;;  %v859_v29 = vld [vmem:[%s3911_s28 + $0x320] sm:$0xff]  ;;  %v857_v30 = vld [vmem:[%s3911_s28 + $0x310] sm:$0xff] }
 0x117   : > { %1158 = vmatprep.subr.bf16.mxu0 %v918_v31  ;;  %v861_v31 = vld [vmem:[%s3911_s28 + $0x330] sm:$0xff]  ;;  %v935_v36 = vpack.c.bf16 %v859_v29, %v855_v28  ;;  %v704_v28 = vpack.c.bf16 %v588_v23, %v584_v22 }
 0x118   : > { %v937_v37 = vpack.c.bf16 %v861_v31, %v857_v30  ;;  %v583_v30 = vld [vmem:[%s3903_s7 + $0x80] sm:$0xff] }
 0x119   : > { %v587_v31 = vld [vmem:[%s3903_s7 + $0xa0] sm:$0xff] }
 0x11d   : > { %966 = vmatpush1.bf16.xpose.msra.mxu1 %v915_v40  ;;  %v863_v40 = vld [vmem:[%s3911_s28 + $0x340] sm:$0xff] }
 0x11e   : > { %1159 = vmatpush1.bf16.xpose.msra.mxu0 %v917_v41  ;;  %967 = vmatprep.subr.bf16.mxu1 %v920_v42  ;;  %v867_v41 = vld [vmem:[%s3911_s28 + $0x360] sm:$0xff]  ;;  %v865_v42 = vld [vmem:[%s3911_s28 + $0x350] sm:$0xff] }
 0x11f   : > { %1160 = vmatprep.subr.bf16.mxu0 %v922_v43  ;;  %v869_v43 = vld [vmem:[%s3911_s28 + $0x370] sm:$0xff]  ;;  %v939_v48 = vpack.c.bf16 %v867_v41, %v863_v40  ;;  %v708_v40 = vpack.c.bf16 %v596_v35, %v592_v34 }
 0x120   : > { %v941_v49 = vpack.c.bf16 %v869_v43, %v865_v42  ;;  %v591_v42 = vld [vmem:[%s3903_s7 + $0xc0] sm:$0xff] }
 0x121   : > { %v595_v43 = vld [vmem:[%s3903_s7 + $0xe0] sm:$0xff] }
 0x125   : > { %968 = vmatpush1.bf16.xpose.msra.mxu1 %v919_v52  ;;  %v871_v52 = vld [vmem:[%s3911_s28 + $0x380] sm:$0xff] }
 0x126   : > { %1161 = vmatpush1.bf16.xpose.msra.mxu0 %v921_v53  ;;  %969 = vmatprep.subr.bf16.mxu1 %v924_v54  ;;  %v875_v53 = vld [vmem:[%s3911_s28 + $0x3a0] sm:$0xff]  ;;  %v873_v54 = vld [vmem:[%s3911_s28 + $0x390] sm:$0xff] }
 0x127   : > { %1162 = vmatprep.subr.bf16.mxu0 %v926_v55  ;;  %v877_v55 = vld [vmem:[%s3911_s28 + $0x3b0] sm:$0xff]  ;;  %v943_v60 = vpack.c.bf16 %v875_v53, %v871_v52  ;;  %v712_v52 = vpack.c.bf16 %v604_v47, %v600_v46 }
 0x128   : > { %v945_v61 = vpack.c.bf16 %v877_v55, %v873_v54  ;;  %v599_v54 = vld [vmem:[%s3903_s7 + $0x100] sm:$0xff] }
 0x129   : > { %v603_v55 = vld [vmem:[%s3903_s7 + $0x120] sm:$0xff] }
 0x12d   : > { %970 = vmatpush1.bf16.xpose.msra.mxu1 %v923_v0  ;;  %v879_v0 = vld [vmem:[%s3911_s28 + $0x3c0] sm:$0xff] }
 0x12e   : > { %1163 = vmatpush1.bf16.xpose.msra.mxu0 %v925_v1  ;;  %971 = vmatprep.subr.bf16.mxu1 %v928_v2  ;;  %v883_v1 = vld [vmem:[%s3911_s28 + $0x3e0] sm:$0xff]  ;;  %v881_v2 = vld [vmem:[%s3911_s28 + $0x3d0] sm:$0xff] }
 0x12f   : > { %1164 = vmatprep.subr.bf16.mxu0 %v930_v3  ;;  %v885_v3 = vld [vmem:[%s3911_s28 + $0x3f0] sm:$0xff]  ;;  %v947_v4 = vpack.c.bf16 %v883_v1, %v879_v0  ;;  %v716_v0 = vpack.c.bf16 %v612_v59, %v608_v58 }
 0x130   : > { %v949_v5 = vpack.c.bf16 %v885_v3, %v881_v2  ;;  %v607_v2 = vld [vmem:[%s3903_s7 + $0x140] sm:$0xff] }
 0x131   : > { %v611_v3 = vld [vmem:[%s3903_s7 + $0x160] sm:$0xff] }
 0x132   : > { %v715_v10 = vpack.c.bf16 %v611_v3, %v607_v2  ;;  %v656_v2 = vld [vmem:[%s3903_s7 + $0x2c8] sm:$0xff] }
 0x133   : > { %v660_v3 = vld [vmem:[%s3903_s7 + $0x2e8] sm:$0xff] }
 0x135   : > { %972 = vmatpush1.bf16.xpose.msra.mxu1 %v927_v12  ;;  %v578_v12 = vld [vmem:[%s3903_s7 + $0x58] sm:$0xff] }
 0x136   : > { %1165 = vmatpush1.bf16.xpose.msra.mxu0 %v929_v13  ;;  %973 = vmatprep.subr.bf16.mxu1 %v932_v14  ;;  %v582_v13 = vld [vmem:[%s3903_s7 + $0x78] sm:$0xff]  ;;  %v695_v14 = vpack.c.bf16 %v571_v7, %v567_v6  ;;  %v616_v6 = vld [vmem:[%s3903_s7 + $0x188] sm:$0xff] }
 0x137   : > { %1166 = vmatprep.subr.bf16.mxu0 %v934_v15  ;;  %v697_v15 = vpack.c.bf16 %v573_v9, %v569_v8  ;;  %v702_v17 = vpack.c.bf16 %v582_v13, %v578_v12  ;;  %v620_v7 = vld [vmem:[%s3903_s7 + $0x1a8] sm:$0xff]  ;;  %v618_v8 = vld [vmem:[%s3903_s7 + $0x198] sm:$0xff] }
 0x138   : > { %v622_v9 = vld [vmem:[%s3903_s7 + $0x1b8] sm:$0xff]  ;;  %v720_v12 = vpack.c.bf16 %v620_v7, %v616_v6 }
 0x139   : > { %v722_v13 = vpack.c.bf16 %v622_v9, %v618_v8  ;;  %v740_v8 = vpack.c.bf16 %v660_v3, %v656_v2 }
 0x13d   : > { %974 = vmatpush1.bf16.xpose.msra.mxu1 %v931_v24  ;;  %v586_v24 = vld [vmem:[%s3903_s7 + $0x98] sm:$0xff] }
 0x13e   : > { %1167 = vmatpush1.bf16.xpose.msra.mxu0 %v933_v25  ;;  %975 = vmatprep.subr.bf16.mxu1 %v936_v26  ;;  %v590_v25 = vld [vmem:[%s3903_s7 + $0xb8] sm:$0xff]  ;;  %v699_v26 = vpack.c.bf16 %v579_v19, %v575_v18  ;;  %v624_v18 = vld [vmem:[%s3903_s7 + $0x1c8] sm:$0xff] }
 0x13f   : > { %1168 = vmatprep.subr.bf16.mxu0 %v938_v27  ;;  %v701_v27 = vpack.c.bf16 %v581_v21, %v577_v20  ;;  %v706_v29 = vpack.c.bf16 %v590_v25, %v586_v24  ;;  %v628_v19 = vld [vmem:[%s3903_s7 + $0x1e8] sm:$0xff]  ;;  %v626_v20 = vld [vmem:[%s3903_s7 + $0x1d8] sm:$0xff] }
 0x140   : > { %v630_v21 = vld [vmem:[%s3903_s7 + $0x1f8] sm:$0xff]  ;;  %v724_v24 = vpack.c.bf16 %v628_v19, %v624_v18 }
 0x141   : > { %v726_v25 = vpack.c.bf16 %v630_v21, %v626_v20 }
 0x145   : > { %976 = vmatpush1.bf16.xpose.msra.mxu1 %v935_v36  ;;  %v594_v36 = vld [vmem:[%s3903_s7 + $0xd8] sm:$0xff] }
 0x146   : > { %1169 = vmatpush1.bf16.xpose.msra.mxu0 %v937_v37  ;;  %977 = vmatprep.subr.bf16.mxu1 %v940_v38  ;;  %v598_v37 = vld [vmem:[%s3903_s7 + $0xf8] sm:$0xff]  ;;  %v703_v38 = vpack.c.bf16 %v587_v31, %v583_v30  ;;  %v632_v30 = vld [vmem:[%s3903_s7 + $0x208] sm:$0xff] }
 0x147   : > { %1170 = vmatprep.subr.bf16.mxu0 %v942_v39  ;;  %v705_v39 = vpack.c.bf16 %v589_v33, %v585_v32  ;;  %v710_v41 = vpack.c.bf16 %v598_v37, %v594_v36  ;;  %v636_v31 = vld [vmem:[%s3903_s7 + $0x228] sm:$0xff]  ;;  %v634_v32 = vld [vmem:[%s3903_s7 + $0x218] sm:$0xff] }
 0x148   : > { %v638_v33 = vld [vmem:[%s3903_s7 + $0x238] sm:$0xff]  ;;  %v728_v36 = vpack.c.bf16 %v636_v31, %v632_v30 }
 0x149   : > { %v730_v37 = vpack.c.bf16 %v638_v33, %v634_v32 }
 0x14d   : > { %978 = vmatpush1.bf16.xpose.msra.mxu1 %v939_v48  ;;  %v602_v48 = vld [vmem:[%s3903_s7 + $0x118] sm:$0xff] }
 0x14e   : > { %1171 = vmatpush1.bf16.xpose.msra.mxu0 %v941_v49  ;;  %979 = vmatprep.subr.bf16.mxu1 %v944_v50  ;;  %v606_v49 = vld [vmem:[%s3903_s7 + $0x138] sm:$0xff]  ;;  %v707_v50 = vpack.c.bf16 %v595_v43, %v591_v42  ;;  %v640_v42 = vld [vmem:[%s3903_s7 + $0x248] sm:$0xff] }
 0x14f   : > { %1172 = vmatprep.subr.bf16.mxu0 %v946_v51  ;;  %v709_v51 = vpack.c.bf16 %v597_v45, %v593_v44  ;;  %v714_v53 = vpack.c.bf16 %v606_v49, %v602_v48  ;;  %v644_v43 = vld [vmem:[%s3903_s7 + $0x268] sm:$0xff]  ;;  %v642_v44 = vld [vmem:[%s3903_s7 + $0x258] sm:$0xff] }
 0x150   : > { %v646_v45 = vld [vmem:[%s3903_s7 + $0x278] sm:$0xff]  ;;  %v732_v48 = vpack.c.bf16 %v644_v43, %v640_v42 }
 0x151   : > { %v734_v49 = vpack.c.bf16 %v646_v45, %v642_v44 }
 0x155   : > { %980 = vmatpush1.bf16.xpose.msra.mxu1 %v943_v60  ;;  %v610_v60 = vld [vmem:[%s3903_s7 + $0x158] sm:$0xff] }
 0x156   : > { %1173 = vmatpush1.bf16.xpose.msra.mxu0 %v945_v61  ;;  %981 = vmatprep.subr.bf16.mxu1 %v948_v62  ;;  %v614_v61 = vld [vmem:[%s3903_s7 + $0x178] sm:$0xff]  ;;  %v711_v62 = vpack.c.bf16 %v603_v55, %v599_v54  ;;  %v648_v54 = vld [vmem:[%s3903_s7 + $0x288] sm:$0xff] }
 0x157   : > { %1174 = vmatprep.subr.bf16.mxu0 %v950_v63  ;;  %v713_v63 = vpack.c.bf16 %v605_v57, %v601_v56  ;;  %v718_v1 = vpack.c.bf16 %v614_v61, %v610_v60  ;;  %v652_v55 = vld [vmem:[%s3903_s7 + $0x2a8] sm:$0xff]  ;;  %v650_v56 = vld [vmem:[%s3903_s7 + $0x298] sm:$0xff] }
 0x158   : > { %v654_v57 = vld [vmem:[%s3903_s7 + $0x2b8] sm:$0xff]  ;;  %v736_v60 = vpack.c.bf16 %v652_v55, %v648_v54 }
 0x159   : > { %v738_v61 = vpack.c.bf16 %v654_v57, %v650_v56 }
 0x15d   : > { %982 = vmatpush1.bf16.xpose.msra.mxu1 %v947_v4  ;;  %v609_v4 = vld [vmem:[%s3903_s7 + $0x150] sm:$0xff] }
 0x15e   : > { %1175 = vmatpush1.bf16.xpose.msra.mxu0 %v949_v5  ;;  %v613_v5 = vld [vmem:[%s3903_s7 + $0x170] sm:$0xff] }
 0x15f   : > { %v717_v11 = vpack.c.bf16 %v613_v5, %v609_v4  ;;  %v658_v4 = vld [vmem:[%s3903_s7 + $0x2d8] sm:$0xff] }
 0x160   : > { %v662_v5 = vld [vmem:[%s3903_s7 + $0x2f8] sm:$0xff] }
 0x161   : > { %v742_v9 = vpack.c.bf16 %v662_v5, %v658_v4 }
 0x164   : > { %984 = vmatmul.mubr.bf16.vlgmr.msra.gmra.mrb[0].mxu1 %v695_v14  ;;  %v615_v14 = vld [vmem:[%s3903_s7 + $0x180] sm:$0xff] }
 0x165   : > { %1177 = vmatmul.mubr.bf16.vlgmr.msra.gmra.mrb[0].mxu0 %v697_v15  ;;  %993 = vmatprep.mubr.bf16.mxu1 %v700_v16  ;;  %v619_v15 = vld [vmem:[%s3903_s7 + $0x1a0] sm:$0xff]  ;;  %v617_v16 = vld [vmem:[%s3903_s7 + $0x190] sm:$0xff] }
 0x166   : > { %1186 = vmatprep.mubr.bf16.mxu0 %v702_v17  ;;  %v621_v17 = vld [vmem:[%s3903_s7 + $0x1b0] sm:$0xff]  ;;  %v719_v22 = vpack.c.bf16 %v619_v15, %v615_v14  ;;  %v664_v14 = vld [vmem:[%s3903_s7 + $0x308] sm:$0xff] }
 0x167   : > { %v721_v23 = vpack.c.bf16 %v621_v17, %v617_v16  ;;  %v668_v15 = vld [vmem:[%s3903_s7 + $0x328] sm:$0xff]  ;;  %v666_v16 = vld [vmem:[%s3903_s7 + $0x318] sm:$0xff] }
 0x168   : > { %v670_v17 = vld [vmem:[%s3903_s7 + $0x338] sm:$0xff]  ;;  %v744_v20 = vpack.c.bf16 %v668_v15, %v664_v14 }
 0x169   : > { %v746_v21 = vpack.c.bf16 %v670_v17, %v666_v16 }
 0x16c   : > { %994 = vmatmul.mubr.bf16.gmra.mrb[4].mxu1 %v699_v26  ;;  %v623_v26 = vld [vmem:[%s3903_s7 + $0x1c0] sm:$0xff] }
 0x16d   : > { %1187 = vmatmul.mubr.bf16.gmra.mrb[4].mxu0 %v701_v27  ;;  %1003 = vmatprep.mubr.bf16.mxu1 %v704_v28  ;;  %v627_v27 = vld [vmem:[%s3903_s7 + $0x1e0] sm:$0xff]  ;;  %v625_v28 = vld [vmem:[%s3903_s7 + $0x1d0] sm:$0xff] }
 0x16e   : > { %1196 = vmatprep.mubr.bf16.mxu0 %v706_v29  ;;  %v629_v29 = vld [vmem:[%s3903_s7 + $0x1f0] sm:$0xff]  ;;  %v723_v34 = vpack.c.bf16 %v627_v27, %v623_v26  ;;  %v672_v26 = vld [vmem:[%s3903_s7 + $0x348] sm:$0xff] }
 0x16f   : > { %v725_v35 = vpack.c.bf16 %v629_v29, %v625_v28  ;;  %v676_v27 = vld [vmem:[%s3903_s7 + $0x368] sm:$0xff]  ;;  %v674_v28 = vld [vmem:[%s3903_s7 + $0x358] sm:$0xff] }
 0x170   : > { %v678_v29 = vld [vmem:[%s3903_s7 + $0x378] sm:$0xff]  ;;  %v748_v32 = vpack.c.bf16 %v676_v27, %v672_v26 }
 0x171   : > { %v750_v33 = vpack.c.bf16 %v678_v29, %v674_v28 }
 0x174   : > { %1004 = vmatmul.mubr.bf16.gmra.mrb[8].mxu1 %v703_v38  ;;  %v631_v38 = vld [vmem:[%s3903_s7 + $0x200] sm:$0xff] }
 0x175   : > { %1197 = vmatmul.mubr.bf16.gmra.mrb[8].mxu0 %v705_v39  ;;  %1013 = vmatprep.mubr.bf16.mxu1 %v708_v40  ;;  %v635_v39 = vld [vmem:[%s3903_s7 + $0x220] sm:$0xff]  ;;  %v633_v40 = vld [vmem:[%s3903_s7 + $0x210] sm:$0xff] }
 0x176   : > { %1206 = vmatprep.mubr.bf16.mxu0 %v710_v41  ;;  %v637_v41 = vld [vmem:[%s3903_s7 + $0x230] sm:$0xff]  ;;  %v727_v46 = vpack.c.bf16 %v635_v39, %v631_v38  ;;  %v680_v38 = vld [vmem:[%s3903_s7 + $0x388] sm:$0xff] }
 0x177   : > { %v729_v47 = vpack.c.bf16 %v637_v41, %v633_v40  ;;  %v684_v39 = vld [vmem:[%s3903_s7 + $0x3a8] sm:$0xff]  ;;  %v682_v40 = vld [vmem:[%s3903_s7 + $0x398] sm:$0xff] }
 0x178   : > { %v686_v41 = vld [vmem:[%s3903_s7 + $0x3b8] sm:$0xff]  ;;  %v752_v44 = vpack.c.bf16 %v684_v39, %v680_v38 }
 0x179   : > { %v754_v45 = vpack.c.bf16 %v686_v41, %v682_v40 }
 0x17c   : > { %1014 = vmatmul.mubr.bf16.gmra.mrb[12].mxu1 %v707_v50  ;;  %v639_v50 = vld [vmem:[%s3903_s7 + $0x240] sm:$0xff] }
 0x17d   : > { %1207 = vmatmul.mubr.bf16.gmra.mrb[12].mxu0 %v709_v51  ;;  %1023 = vmatprep.mubr.bf16.mxu1 %v712_v52  ;;  %v643_v51 = vld [vmem:[%s3903_s7 + $0x260] sm:$0xff]  ;;  %v641_v52 = vld [vmem:[%s3903_s7 + $0x250] sm:$0xff] }
 0x17e   : > { %1216 = vmatprep.mubr.bf16.mxu0 %v714_v53  ;;  %v645_v53 = vld [vmem:[%s3903_s7 + $0x270] sm:$0xff]  ;;  %v731_v58 = vpack.c.bf16 %v643_v51, %v639_v50  ;;  %v688_v50 = vld [vmem:[%s3903_s7 + $0x3c8] sm:$0xff] }
 0x17f   : > { %v733_v59 = vpack.c.bf16 %v645_v53, %v641_v52  ;;  %v692_v51 = vld [vmem:[%s3903_s7 + $0x3e8] sm:$0xff]  ;;  %v690_v52 = vld [vmem:[%s3903_s7 + $0x3d8] sm:$0xff] }
 0x180   : > { %v694_v53 = vld [vmem:[%s3903_s7 + $0x3f8] sm:$0xff]  ;;  %v756_v56 = vpack.c.bf16 %v692_v51, %v688_v50 }
 0x181   : > { %v758_v57 = vpack.c.bf16 %v694_v53, %v690_v52 }
 0x184   : > { %1024 = vmatmul.mubr.bf16.gmra.mrb[16].mxu1 %v711_v62  ;;  %v647_v62 = vld [vmem:[%s3903_s7 + $0x280] sm:$0xff] }
 0x185   : > { %1217 = vmatmul.mubr.bf16.gmra.mrb[16].mxu0 %v713_v63  ;;  %1033 = vmatprep.mubr.bf16.mxu1 %v716_v0  ;;  %v651_v63 = vld [vmem:[%s3903_s7 + $0x2a0] sm:$0xff]  ;;  %v649_v0 = vld [vmem:[%s3903_s7 + $0x290] sm:$0xff] }
 0x186   : > { %1226 = vmatprep.mubr.bf16.mxu0 %v718_v1  ;;  %v653_v1 = vld [vmem:[%s3903_s7 + $0x2b0] sm:$0xff]  ;;  %v735_v6 = vpack.c.bf16 %v651_v63, %v647_v62 }
 0x187   : > { %v737_v7 = vpack.c.bf16 %v653_v1, %v649_v0 }
 0x18c   : > { %1034 = vmatmul.mubr.bf16.gmra.mrb[20].mxu1 %v715_v10  ;;  %v655_v10 = vld [vmem:[%s3903_s7 + $0x2c0] sm:$0xff] }
 0x18d   : > { %1227 = vmatmul.mubr.bf16.gmra.mrb[20].mxu0 %v717_v11  ;;  %1043 = vmatprep.mubr.bf16.mxu1 %v720_v12  ;;  %v659_v11 = vld [vmem:[%s3903_s7 + $0x2e0] sm:$0xff]  ;;  %v657_v12 = vld [vmem:[%s3903_s7 + $0x2d0] sm:$0xff] }
 0x18e   : > { %1236 = vmatprep.mubr.bf16.mxu0 %v722_v13  ;;  %v661_v13 = vld [vmem:[%s3903_s7 + $0x2f0] sm:$0xff]  ;;  %v739_v18 = vpack.c.bf16 %v659_v11, %v655_v10 }
 0x18f   : > { %v741_v19 = vpack.c.bf16 %v661_v13, %v657_v12 }
 0x194   : > { %1044 = vmatmul.mubr.bf16.gmra.mrb[24].mxu1 %v719_v22  ;;  %v663_v22 = vld [vmem:[%s3903_s7 + $0x300] sm:$0xff] }
 0x195   : > { %1237 = vmatmul.mubr.bf16.gmra.mrb[24].mxu0 %v721_v23  ;;  %1053 = vmatprep.mubr.bf16.mxu1 %v724_v24  ;;  %v667_v23 = vld [vmem:[%s3903_s7 + $0x320] sm:$0xff]  ;;  %v665_v24 = vld [vmem:[%s3903_s7 + $0x310] sm:$0xff] }
 0x196   : > { %1246 = vmatprep.mubr.bf16.mxu0 %v726_v25  ;;  %v669_v25 = vld [vmem:[%s3903_s7 + $0x330] sm:$0xff]  ;;  %v743_v30 = vpack.c.bf16 %v667_v23, %v663_v22 }
 0x197   : > { %v745_v31 = vpack.c.bf16 %v669_v25, %v665_v24 }
 0x19c   : > { %1054 = vmatmul.mubr.bf16.gmra.mrb[28].mxu1 %v723_v34  ;;  %v671_v34 = vld [vmem:[%s3903_s7 + $0x340] sm:$0xff] }
 0x19d   : > { %1247 = vmatmul.mubr.bf16.gmra.mrb[28].mxu0 %v725_v35  ;;  %1063 = vmatprep.mubr.bf16.mxu1 %v728_v36  ;;  %v675_v35 = vld [vmem:[%s3903_s7 + $0x360] sm:$0xff]  ;;  %v673_v36 = vld [vmem:[%s3903_s7 + $0x350] sm:$0xff] }
 0x19e   : > { %1256 = vmatprep.mubr.bf16.mxu0 %v730_v37  ;;  %v677_v37 = vld [vmem:[%s3903_s7 + $0x370] sm:$0xff]  ;;  %v747_v42 = vpack.c.bf16 %v675_v35, %v671_v34 }
 0x19f   : > { %v749_v43 = vpack.c.bf16 %v677_v37, %v673_v36 }
 0x1a4   : > { %1064 = vmatmul.mubr.bf16.gmra.mrb[32].mxu1 %v727_v46  ;;  %v679_v46 = vld [vmem:[%s3903_s7 + $0x380] sm:$0xff] }
 0x1a5   : > { %1257 = vmatmul.mubr.bf16.gmra.mrb[32].mxu0 %v729_v47  ;;  %1073 = vmatprep.mubr.bf16.mxu1 %v732_v48  ;;  %v683_v47 = vld [vmem:[%s3903_s7 + $0x3a0] sm:$0xff]  ;;  %v681_v48 = vld [vmem:[%s3903_s7 + $0x390] sm:$0xff] }
 0x1a6   : > { %1266 = vmatprep.mubr.bf16.mxu0 %v734_v49  ;;  %v685_v49 = vld [vmem:[%s3903_s7 + $0x3b0] sm:$0xff]  ;;  %v751_v54 = vpack.c.bf16 %v683_v47, %v679_v46 }
 0x1a7   : > { %v753_v55 = vpack.c.bf16 %v685_v49, %v681_v48 }
 0x1ac   : > { %1074 = vmatmul.mubr.bf16.gmra.mrb[36].mxu1 %v731_v58  ;;  %v687_v58 = vld [vmem:[%s3903_s7 + $0x3c0] sm:$0xff] }
 0x1ad   : > { %1267 = vmatmul.mubr.bf16.gmra.mrb[36].mxu0 %v733_v59  ;;  %1083 = vmatprep.mubr.bf16.mxu1 %v736_v60  ;;  %v691_v59 = vld [vmem:[%s3903_s7 + $0x3e0] sm:$0xff]  ;;  %v689_v60 = vld [vmem:[%s3903_s7 + $0x3d0] sm:$0xff] }
 0x1ae   : > { %1276 = vmatprep.mubr.bf16.mxu0 %v738_v61  ;;  %v693_v61 = vld [vmem:[%s3903_s7 + $0x3f0] sm:$0xff]  ;;  %v755_v62 = vpack.c.bf16 %v691_v59, %v687_v58 }
 0x1af   : > { %v757_v63 = vpack.c.bf16 %v693_v61, %v689_v60 }
 0x1b4   : > { %1084 = vmatmul.mubr.bf16.gmra.mrb[40].mxu1 %v735_v6 }
 0x1b5   : > { %1277 = vmatmul.mubr.bf16.gmra.mrb[40].mxu0 %v737_v7  ;;  %1093 = vmatprep.mubr.bf16.mxu1 %v740_v8 }
 0x1b6   : > { %1286 = vmatprep.mubr.bf16.mxu0 %v742_v9 }
 0x1bc   : > { %1094 = vmatmul.mubr.bf16.gmra.mrb[44].mxu1 %v739_v18 }
 0x1bd   : > { %1287 = vmatmul.mubr.bf16.gmra.mrb[44].mxu0 %v741_v19  ;;  %1103 = vmatprep.mubr.bf16.mxu1 %v744_v20 }
 0x1be   : > { %1296 = vmatprep.mubr.bf16.mxu0 %v746_v21 }
 0x1c4   : > { %1104 = vmatmul.mubr.bf16.gmra.mrb[48].mxu1 %v743_v30 }
 0x1c5   : > { %1297 = vmatmul.mubr.bf16.gmra.mrb[48].mxu0 %v745_v31  ;;  %1113 = vmatprep.mubr.bf16.mxu1 %v748_v32 }
 0x1c6   : > { %1306 = vmatprep.mubr.bf16.mxu0 %v750_v33 }
 0x1cc   : > { %1114 = vmatmul.mubr.bf16.gmra.mrb[52].mxu1 %v747_v42 }
 0x1cd   : > { %1307 = vmatmul.mubr.bf16.gmra.mrb[52].mxu0 %v749_v43  ;;  %1123 = vmatprep.mubr.bf16.mxu1 %v752_v44 }
 0x1ce   : > { %1316 = vmatprep.mubr.bf16.mxu0 %v754_v45 }
 0x1d4   : > { %1124 = vmatmul.mubr.bf16.gmra.mrb[56].mxu1 %v751_v54 }
 0x1d5   : > { %1317 = vmatmul.mubr.bf16.gmra.mrb[56].mxu0 %v753_v55  ;;  %1133 = vmatprep.mubr.bf16.mxu1 %v756_v56 }
 0x1d6   : > { %1326 = vmatprep.mubr.bf16.mxu0 %v758_v57 }
 0x1dc   : > { %1134 = vmatmul.mubr.bf16.gmra.mrb[60].mxu1 %v755_v62 }
 0x1dd   : > { %1327 = vmatmul.mubr.bf16.gmra.mrb[60].mxu0 %v757_v63 }
 0x237   : > { %v985_v0 = vpop.f32.mrb[0].mxu1 }
 0x238   : > { %v1178_v1 = vpop.f32.mrb[0].mxu0  ;;  %v987_v2 = vpop.f32.mrb[1].mxu1 }
 0x239   : > { %v1179_v3 = vadd.f32 %v1178_v1, %v985_v0  ;;  %v1180_v4 = vpop.f32.mrb[1].mxu0  ;;  %v989_v5 = vpop.f32.mrb[2].mxu1 }
 0x23a   : > { %v1181_v6 = vadd.f32 %v1180_v4, %v987_v2  ;;  %v1182_v7 = vpop.f32.mrb[2].mxu0  ;;  %v991_v8 = vpop.f32.mrb[3].mxu1 }
 0x23b   : > { %v1183_v9 = vadd.f32 %v1182_v7, %v989_v5  ;;  %v1184_v10 = vpop.f32.mrb[3].mxu0  ;;  %1401 = vst [vmem:[#allocation2] sm:$0xff] %v1179_v3 }
 0x23c   : > { %v1185_v11 = vadd.f32 %v1184_v10, %v991_v8  ;;  %1402 = vst [vmem:[#allocation2 + $0x8] sm:$0xff] %v1181_v6 }
 0x23d   : > { %1403 = vst [vmem:[#allocation2 + $0x10] sm:$0xff] %v1183_v9 }
 0x23e   : > { %1404 = vst [vmem:[#allocation2 + $0x18] sm:$0xff] %v1185_v11 }
 0x23f   : > { %v995_v12 = vpop.f32.mrb[4].mxu1 }
 0x240   : > { %v1188_v13 = vpop.f32.mrb[4].mxu0  ;;  %v997_v14 = vpop.f32.mrb[5].mxu1 }
 0x241   : > { %v1189_v15 = vadd.f32 %v1188_v13, %v995_v12  ;;  %v1190_v16 = vpop.f32.mrb[5].mxu0  ;;  %v999_v17 = vpop.f32.mrb[6].mxu1 }
 0x242   : > { %v1191_v18 = vadd.f32 %v1190_v16, %v997_v14  ;;  %v1192_v19 = vpop.f32.mrb[6].mxu0  ;;  %v1001_v20 = vpop.f32.mrb[7].mxu1 }
 0x243   : > { %v1193_v21 = vadd.f32 %v1192_v19, %v999_v17  ;;  %v1194_v22 = vpop.f32.mrb[7].mxu0  ;;  %1405 = vst [vmem:[#allocation2 + $0x20] sm:$0xff] %v1189_v15 }
 0x244   : > { %v1195_v23 = vadd.f32 %v1194_v22, %v1001_v20  ;;  %1406 = vst [vmem:[#allocation2 + $0x28] sm:$0xff] %v1191_v18 }
 0x245   : > { %1407 = vst [vmem:[#allocation2 + $0x30] sm:$0xff] %v1193_v21 }
 0x246   : > { %1408 = vst [vmem:[#allocation2 + $0x38] sm:$0xff] %v1195_v23 }
 0x247   : > { %v1005_v24 = vpop.f32.mrb[8].mxu1 }
 0x248   : > { %v1198_v25 = vpop.f32.mrb[8].mxu0  ;;  %v1007_v26 = vpop.f32.mrb[9].mxu1 }
 0x249   : > { %v1199_v27 = vadd.f32 %v1198_v25, %v1005_v24  ;;  %v1200_v28 = vpop.f32.mrb[9].mxu0  ;;  %v1009_v29 = vpop.f32.mrb[10].mxu1 }
 0x24a   : > { %v1201_v30 = vadd.f32 %v1200_v28, %v1007_v26  ;;  %v1202_v31 = vpop.f32.mrb[10].mxu0  ;;  %v1011_v32 = vpop.f32.mrb[11].mxu1 }
 0x24b   : > { %v1203_v33 = vadd.f32 %v1202_v31, %v1009_v29  ;;  %v1204_v34 = vpop.f32.mrb[11].mxu0  ;;  %1409 = vst [vmem:[#allocation2 + $0x40] sm:$0xff] %v1199_v27 }
 0x24c   : > { %v1205_v35 = vadd.f32 %v1204_v34, %v1011_v32  ;;  %1410 = vst [vmem:[#allocation2 + $0x48] sm:$0xff] %v1201_v30 }
 0x24d   : > { %1411 = vst [vmem:[#allocation2 + $0x50] sm:$0xff] %v1203_v33 }
 0x24e   : > { %1412 = vst [vmem:[#allocation2 + $0x58] sm:$0xff] %v1205_v35 }
 0x24f   : > { %v1015_v36 = vpop.f32.mrb[12].mxu1 }
 0x250   : > { %v1208_v37 = vpop.f32.mrb[12].mxu0  ;;  %v1017_v38 = vpop.f32.mrb[13].mxu1 }
 0x251   : > { %v1209_v39 = vadd.f32 %v1208_v37, %v1015_v36  ;;  %v1210_v40 = vpop.f32.mrb[13].mxu0  ;;  %v1019_v41 = vpop.f32.mrb[14].mxu1 }
 0x252   : > { %v1211_v42 = vadd.f32 %v1210_v40, %v1017_v38  ;;  %v1212_v43 = vpop.f32.mrb[14].mxu0  ;;  %v1021_v44 = vpop.f32.mrb[15].mxu1 }
 0x253   : > { %v1213_v45 = vadd.f32 %v1212_v43, %v1019_v41  ;;  %v1214_v46 = vpop.f32.mrb[15].mxu0  ;;  %1413 = vst [vmem:[#allocation2 + $0x60] sm:$0xff] %v1209_v39 }
 0x254   : > { %v1215_v47 = vadd.f32 %v1214_v46, %v1021_v44  ;;  %1414 = vst [vmem:[#allocation2 + $0x68] sm:$0xff] %v1211_v42 }
 0x255   : > { %1415 = vst [vmem:[#allocation2 + $0x70] sm:$0xff] %v1213_v45 }
 0x256   : > { %1416 = vst [vmem:[#allocation2 + $0x78] sm:$0xff] %v1215_v47 }
 0x257   : > { %v1025_v48 = vpop.f32.mrb[16].mxu1 }
 0x258   : > { %v1218_v49 = vpop.f32.mrb[16].mxu0  ;;  %v1027_v50 = vpop.f32.mrb[17].mxu1 }
 0x259   : > { %v1219_v51 = vadd.f32 %v1218_v49, %v1025_v48  ;;  %v1220_v52 = vpop.f32.mrb[17].mxu0  ;;  %v1029_v53 = vpop.f32.mrb[18].mxu1 }
 0x25a   : > { %v1221_v54 = vadd.f32 %v1220_v52, %v1027_v50  ;;  %v1222_v55 = vpop.f32.mrb[18].mxu0  ;;  %v1031_v56 = vpop.f32.mrb[19].mxu1 }
 0x25b   : > { %v1223_v57 = vadd.f32 %v1222_v55, %v1029_v53  ;;  %v1224_v58 = vpop.f32.mrb[19].mxu0  ;;  %1417 = vst [vmem:[#allocation2 + $0x80] sm:$0xff] %v1219_v51 }
 0x25c   : > { %v1225_v59 = vadd.f32 %v1224_v58, %v1031_v56  ;;  %1418 = vst [vmem:[#allocation2 + $0x88] sm:$0xff] %v1221_v54 }
 0x25d   : > { %1419 = vst [vmem:[#allocation2 + $0x90] sm:$0xff] %v1223_v57 }
 0x25e   : > { %1420 = vst [vmem:[#allocation2 + $0x98] sm:$0xff] %v1225_v59 }
 0x25f   : > { %v1035_v60 = vpop.f32.mrb[20].mxu1 }
 0x260   : > { %v1228_v61 = vpop.f32.mrb[20].mxu0  ;;  %v1037_v62 = vpop.f32.mrb[21].mxu1 }
 0x261   : > { %v1229_v63 = vadd.f32 %v1228_v61, %v1035_v60  ;;  %v1230_v0 = vpop.f32.mrb[21].mxu0  ;;  %v1039_v1 = vpop.f32.mrb[22].mxu1 }
 0x262   : > { %v1231_v2 = vadd.f32 %v1230_v0, %v1037_v62  ;;  %v1232_v3 = vpop.f32.mrb[22].mxu0  ;;  %v1041_v4 = vpop.f32.mrb[23].mxu1 }
 0x263   : > { %v1233_v5 = vadd.f32 %v1232_v3, %v1039_v1  ;;  %v1234_v6 = vpop.f32.mrb[23].mxu0  ;;  %1421 = vst [vmem:[#allocation2 + $0xa0] sm:$0xff] %v1229_v63 }
 0x264   : > { %v1235_v7 = vadd.f32 %v1234_v6, %v1041_v4  ;;  %1422 = vst [vmem:[#allocation2 + $0xa8] sm:$0xff] %v1231_v2 }
 0x265   : > { %1423 = vst [vmem:[#allocation2 + $0xb0] sm:$0xff] %v1233_v5 }
 0x266   : > { %1424 = vst [vmem:[#allocation2 + $0xb8] sm:$0xff] %v1235_v7 }
 0x267   : > { %v1045_v8 = vpop.f32.mrb[24].mxu1 }
 0x268   : > { %v1238_v9 = vpop.f32.mrb[24].mxu0  ;;  %v1047_v10 = vpop.f32.mrb[25].mxu1 }
 0x269   : > { %v1239_v11 = vadd.f32 %v1238_v9, %v1045_v8  ;;  %v1240_v12 = vpop.f32.mrb[25].mxu0  ;;  %v1049_v13 = vpop.f32.mrb[26].mxu1 }
 0x26a   : > { %v1241_v14 = vadd.f32 %v1240_v12, %v1047_v10  ;;  %v1242_v15 = vpop.f32.mrb[26].mxu0  ;;  %v1051_v16 = vpop.f32.mrb[27].mxu1 }
 0x26b   : > { %v1243_v17 = vadd.f32 %v1242_v15, %v1049_v13  ;;  %v1244_v18 = vpop.f32.mrb[27].mxu0  ;;  %1425 = vst [vmem:[#allocation2 + $0xc0] sm:$0xff] %v1239_v11 }
 0x26c   : > { %v1245_v19 = vadd.f32 %v1244_v18, %v1051_v16  ;;  %1426 = vst [vmem:[#allocation2 + $0xc8] sm:$0xff] %v1241_v14 }
 0x26d   : > { %1427 = vst [vmem:[#allocation2 + $0xd0] sm:$0xff] %v1243_v17 }
 0x26e   : > { %1428 = vst [vmem:[#allocation2 + $0xd8] sm:$0xff] %v1245_v19 }
 0x26f   : > { %v1055_v20 = vpop.f32.mrb[28].mxu1 }
 0x270   : > { %v1248_v21 = vpop.f32.mrb[28].mxu0  ;;  %v1057_v22 = vpop.f32.mrb[29].mxu1 }
 0x271   : > { %v1249_v23 = vadd.f32 %v1248_v21, %v1055_v20  ;;  %v1250_v24 = vpop.f32.mrb[29].mxu0  ;;  %v1059_v25 = vpop.f32.mrb[30].mxu1 }
 0x272   : > { %v1251_v26 = vadd.f32 %v1250_v24, %v1057_v22  ;;  %v1252_v27 = vpop.f32.mrb[30].mxu0  ;;  %v1061_v28 = vpop.f32.mrb[31].mxu1 }
 0x273   : > { %v1253_v29 = vadd.f32 %v1252_v27, %v1059_v25  ;;  %v1254_v30 = vpop.f32.mrb[31].mxu0  ;;  %1429 = vst [vmem:[#allocation2 + $0xe0] sm:$0xff] %v1249_v23 }
 0x274   : > { %v1255_v31 = vadd.f32 %v1254_v30, %v1061_v28  ;;  %1430 = vst [vmem:[#allocation2 + $0xe8] sm:$0xff] %v1251_v26 }
 0x275   : > { %1431 = vst [vmem:[#allocation2 + $0xf0] sm:$0xff] %v1253_v29 }
 0x276   : > { %1432 = vst [vmem:[#allocation2 + $0xf8] sm:$0xff] %v1255_v31 }
 0x277   : > { %v1065_v32 = vpop.f32.mrb[32].mxu1 }
 0x278   : > { %v1258_v33 = vpop.f32.mrb[32].mxu0  ;;  %v1067_v34 = vpop.f32.mrb[33].mxu1 }
 0x279   : > { %v1259_v35 = vadd.f32 %v1258_v33, %v1065_v32  ;;  %v1260_v36 = vpop.f32.mrb[33].mxu0  ;;  %v1069_v37 = vpop.f32.mrb[34].mxu1 }
 0x27a   : > { %v1261_v38 = vadd.f32 %v1260_v36, %v1067_v34  ;;  %v1262_v39 = vpop.f32.mrb[34].mxu0  ;;  %v1071_v40 = vpop.f32.mrb[35].mxu1 }
 0x27b   : > { %v1263_v41 = vadd.f32 %v1262_v39, %v1069_v37  ;;  %v1264_v42 = vpop.f32.mrb[35].mxu0  ;;  %1433 = vst [vmem:[#allocation2 + $0x100] sm:$0xff] %v1259_v35 }
 0x27c   : > { %v1265_v43 = vadd.f32 %v1264_v42, %v1071_v40  ;;  %1434 = vst [vmem:[#allocation2 + $0x108] sm:$0xff] %v1261_v38 }
 0x27d   : > { %1435 = vst [vmem:[#allocation2 + $0x110] sm:$0xff] %v1263_v41 }
 0x27e   : > { %1436 = vst [vmem:[#allocation2 + $0x118] sm:$0xff] %v1265_v43 }
 0x27f   : > { %v1075_v44 = vpop.f32.mrb[36].mxu1 }
 0x280   : > { %v1268_v45 = vpop.f32.mrb[36].mxu0  ;;  %v1077_v46 = vpop.f32.mrb[37].mxu1 }
 0x281   : > { %v1269_v47 = vadd.f32 %v1268_v45, %v1075_v44  ;;  %v1270_v48 = vpop.f32.mrb[37].mxu0  ;;  %v1079_v49 = vpop.f32.mrb[38].mxu1 }
 0x282   : > { %v1271_v50 = vadd.f32 %v1270_v48, %v1077_v46  ;;  %v1272_v51 = vpop.f32.mrb[38].mxu0  ;;  %v1081_v52 = vpop.f32.mrb[39].mxu1 }
 0x283   : > { %v1273_v53 = vadd.f32 %v1272_v51, %v1079_v49  ;;  %v1274_v54 = vpop.f32.mrb[39].mxu0  ;;  %1437 = vst [vmem:[#allocation2 + $0x120] sm:$0xff] %v1269_v47 }
 0x284   : > { %v1275_v55 = vadd.f32 %v1274_v54, %v1081_v52  ;;  %1438 = vst [vmem:[#allocation2 + $0x128] sm:$0xff] %v1271_v50 }
 0x285   : > { %1439 = vst [vmem:[#allocation2 + $0x130] sm:$0xff] %v1273_v53 }
 0x286   : > { %1440 = vst [vmem:[#allocation2 + $0x138] sm:$0xff] %v1275_v55 }
 0x287   : > { %v1085_v56 = vpop.f32.mrb[40].mxu1 }
 0x288   : > { %v1278_v57 = vpop.f32.mrb[40].mxu0  ;;  %v1087_v58 = vpop.f32.mrb[41].mxu1 }
 0x289   : > { %v1279_v59 = vadd.f32 %v1278_v57, %v1085_v56  ;;  %v1280_v60 = vpop.f32.mrb[41].mxu0  ;;  %v1089_v61 = vpop.f32.mrb[42].mxu1 }
 0x28a   : > { %v1281_v62 = vadd.f32 %v1280_v60, %v1087_v58  ;;  %v1282_v63 = vpop.f32.mrb[42].mxu0  ;;  %v1091_v0 = vpop.f32.mrb[43].mxu1 }
 0x28b   : > { %v1283_v1 = vadd.f32 %v1282_v63, %v1089_v61  ;;  %v1284_v2 = vpop.f32.mrb[43].mxu0  ;;  %1441 = vst [vmem:[#allocation2 + $0x140] sm:$0xff] %v1279_v59 }
 0x28c   : > { %v1285_v3 = vadd.f32 %v1284_v2, %v1091_v0  ;;  %1442 = vst [vmem:[#allocation2 + $0x148] sm:$0xff] %v1281_v62 }
 0x28d   : > { %1443 = vst [vmem:[#allocation2 + $0x150] sm:$0xff] %v1283_v1 }
 0x28e   : > { %1444 = vst [vmem:[#allocation2 + $0x158] sm:$0xff] %v1285_v3 }
 0x28f   : > { %v1095_v4 = vpop.f32.mrb[44].mxu1 }
 0x290   : > { %v1288_v5 = vpop.f32.mrb[44].mxu0  ;;  %v1097_v6 = vpop.f32.mrb[45].mxu1 }
 0x291   : > { %v1289_v7 = vadd.f32 %v1288_v5, %v1095_v4  ;;  %v1290_v8 = vpop.f32.mrb[45].mxu0  ;;  %v1099_v9 = vpop.f32.mrb[46].mxu1 }
 0x292   : > { %v1291_v10 = vadd.f32 %v1290_v8, %v1097_v6  ;;  %v1292_v11 = vpop.f32.mrb[46].mxu0  ;;  %v1101_v12 = vpop.f32.mrb[47].mxu1 }
 0x293   : > { %v1293_v13 = vadd.f32 %v1292_v11, %v1099_v9  ;;  %v1294_v14 = vpop.f32.mrb[47].mxu0  ;;  %1445 = vst [vmem:[#allocation2 + $0x160] sm:$0xff] %v1289_v7 }
 0x294   : > { %v1295_v15 = vadd.f32 %v1294_v14, %v1101_v12  ;;  %1446 = vst [vmem:[#allocation2 + $0x168] sm:$0xff] %v1291_v10 }
 0x295   : > { %1447 = vst [vmem:[#allocation2 + $0x170] sm:$0xff] %v1293_v13 }
 0x296   : > { %1448 = vst [vmem:[#allocation2 + $0x178] sm:$0xff] %v1295_v15 }
 0x297   : > { %v1105_v16 = vpop.f32.mrb[48].mxu1 }
 0x298   : > { %v1298_v17 = vpop.f32.mrb[48].mxu0  ;;  %v1107_v18 = vpop.f32.mrb[49].mxu1 }
 0x299   : > { %v1299_v19 = vadd.f32 %v1298_v17, %v1105_v16  ;;  %v1300_v20 = vpop.f32.mrb[49].mxu0  ;;  %v1109_v21 = vpop.f32.mrb[50].mxu1 }
 0x29a   : > { %v1301_v22 = vadd.f32 %v1300_v20, %v1107_v18  ;;  %v1302_v23 = vpop.f32.mrb[50].mxu0  ;;  %v1111_v24 = vpop.f32.mrb[51].mxu1 }
 0x29b   : > { %v1303_v25 = vadd.f32 %v1302_v23, %v1109_v21  ;;  %v1304_v26 = vpop.f32.mrb[51].mxu0  ;;  %1449 = vst [vmem:[#allocation2 + $0x180] sm:$0xff] %v1299_v19 }
 0x29c   : > { %v1305_v27 = vadd.f32 %v1304_v26, %v1111_v24  ;;  %1450 = vst [vmem:[#allocation2 + $0x188] sm:$0xff] %v1301_v22 }
 0x29d   : > { %1451 = vst [vmem:[#allocation2 + $0x190] sm:$0xff] %v1303_v25 }
 0x29e   : > { %1452 = vst [vmem:[#allocation2 + $0x198] sm:$0xff] %v1305_v27 }
 0x29f   : > { %v1115_v28 = vpop.f32.mrb[52].mxu1 }
 0x2a0   : > { %v1308_v29 = vpop.f32.mrb[52].mxu0  ;;  %v1117_v30 = vpop.f32.mrb[53].mxu1 }
 0x2a1   : > { %v1309_v31 = vadd.f32 %v1308_v29, %v1115_v28  ;;  %v1310_v32 = vpop.f32.mrb[53].mxu0  ;;  %v1119_v33 = vpop.f32.mrb[54].mxu1 }
 0x2a2   : > { %v1311_v34 = vadd.f32 %v1310_v32, %v1117_v30  ;;  %v1312_v35 = vpop.f32.mrb[54].mxu0  ;;  %v1121_v36 = vpop.f32.mrb[55].mxu1 }
 0x2a3   : > { %v1313_v37 = vadd.f32 %v1312_v35, %v1119_v33  ;;  %v1314_v38 = vpop.f32.mrb[55].mxu0  ;;  %1453 = vst [vmem:[#allocation2 + $0x1a0] sm:$0xff] %v1309_v31 }
 0x2a4   : > { %v1315_v39 = vadd.f32 %v1314_v38, %v1121_v36  ;;  %1454 = vst [vmem:[#allocation2 + $0x1a8] sm:$0xff] %v1311_v34 }
 0x2a5   : > { %1455 = vst [vmem:[#allocation2 + $0x1b0] sm:$0xff] %v1313_v37 }
 0x2a6   : > { %1456 = vst [vmem:[#allocation2 + $0x1b8] sm:$0xff] %v1315_v39 }
 0x2a7   : > { %v1125_v40 = vpop.f32.mrb[56].mxu1 }
 0x2a8   : > { %v1318_v41 = vpop.f32.mrb[56].mxu0  ;;  %v1127_v42 = vpop.f32.mrb[57].mxu1 }
 0x2a9   : > { %v1319_v43 = vadd.f32 %v1318_v41, %v1125_v40  ;;  %v1320_v44 = vpop.f32.mrb[57].mxu0  ;;  %v1129_v45 = vpop.f32.mrb[58].mxu1 }
 0x2aa   : > { %v1321_v46 = vadd.f32 %v1320_v44, %v1127_v42  ;;  %v1322_v47 = vpop.f32.mrb[58].mxu0  ;;  %v1131_v48 = vpop.f32.mrb[59].mxu1 }
 0x2ab   : > { %v1323_v49 = vadd.f32 %v1322_v47, %v1129_v45  ;;  %v1324_v50 = vpop.f32.mrb[59].mxu0  ;;  %1457 = vst [vmem:[#allocation2 + $0x1c0] sm:$0xff] %v1319_v43 }
 0x2ac   : > { %v1325_v51 = vadd.f32 %v1324_v50, %v1131_v48  ;;  %1458 = vst [vmem:[#allocation2 + $0x1c8] sm:$0xff] %v1321_v46 }
 0x2ad   : > { %1459 = vst [vmem:[#allocation2 + $0x1d0] sm:$0xff] %v1323_v49 }
 0x2ae   : > { %1460 = vst [vmem:[#allocation2 + $0x1d8] sm:$0xff] %v1325_v51 }
 0x2af   : > { %v1135_v52 = vpop.f32.mrb[60].mxu1 }
 0x2b0   : > { %v1328_v53 = vpop.f32.mrb[60].mxu0  ;;  %v1137_v54 = vpop.f32.mrb[61].mxu1  ;;  %1469 = sbr.rel (!%p1465_p9) target bundleno = 951 (0x3b7), region = 68 }
 0x2b1   : > { %v1329_v55 = vadd.f32 %v1328_v53, %v1135_v52  ;;  %v1330_v56 = vpop.f32.mrb[61].mxu0  ;;  %v1139_v57 = vpop.f32.mrb[62].mxu1 }
 0x2b2   : > { %v1331_v58 = vadd.f32 %v1330_v56, %v1137_v54  ;;  %v1332_v59 = vpop.f32.mrb[62].mxu0  ;;  %v1141_v60 = vpop.f32.mrb[63].mxu1 }
 0x2b3   : > { %v1333_v61 = vadd.f32 %v1332_v59, %v1139_v57  ;;  %v1334_v62 = vpop.f32.mrb[63].mxu0  ;;  %1461 = vst [vmem:[#allocation2 + $0x1e0] sm:$0xff] %v1329_v55 }
 0x2b4   : > { %v1335_v63 = vadd.f32 %v1334_v62, %v1141_v60  ;;  %1462 = vst [vmem:[#allocation2 + $0x1e8] sm:$0xff] %v1331_v58 }
 0x2b5   : > { %1463 = vst [vmem:[#allocation2 + $0x1f0] sm:$0xff] %v1333_v61 }
 0x2b6   : > { %1464 = vst [vmem:[#allocation2 + $0x1f8] sm:$0xff] %v1335_v63 }
 0x2b7   : > { %v1536_v0 = vlaneseq  ;;  %v1534_v2 = vld [vmem:[%s361_s30] sm:$0x3]  ;;  %v1476_v9 = vld [vmem:[#allocation2 + $0x30] sm:$0xff]  ;;  %s3495_s26 = smov 64  }
 0x2b8   : > { %v1474_v5 = vld [vmem:[#allocation2 + $0x20] sm:$0xff]  ;;  %v1472_v10 = vld [vmem:[#allocation2 + $0x10] sm:$0xff] }
 0x2b9   : > { %v1537_v1 = vshrl.u32 %v1536_v0, 7  ;;  %v1470_v6 = vld [vmem:[#allocation2] sm:$0xff]  ;;  %v1480_v15 = vld [vmem:[#allocation2 + $0x50] sm:$0xff] }
 0x2ba   : > { %v1478_v16 = vld [vmem:[#allocation2 + $0x40] sm:$0xff]  ;;  %v1484_v19 = vld [vmem:[#allocation2 + $0x70] sm:$0xff] }
 0x2bb   : > { %v1538_v3 = vsub.s32 0, %v1537_v1  ;;  %v1542_v4 = vsub.s32 1, %v1537_v1  ;;  %v1482_v20 = vld [vmem:[#allocation2 + $0x60] sm:$0xff]  ;;  %v1488_v23 = vld [vmem:[#allocation2 + $0x90] sm:$0xff] }
 0x2bc   : > { %v1486_v24 = vld [vmem:[#allocation2 + $0x80] sm:$0xff]  ;;  %v1492_v27 = vld [vmem:[#allocation2 + $0xb0] sm:$0xff] }
 0x2bd   : > { %v4202_v7 = vrot.slane %v1534_v2, %v1538_v3  ;;  %v4204_v8 = vrot.slane %v1534_v2, %v1542_v4  ;;  %v1490_v28 = vld [vmem:[#allocation2 + $0xa0] sm:$0xff]  ;;  %v1496_v31 = vld [vmem:[#allocation2 + $0xd0] sm:$0xff] }
 0x2be   : > { %v1494_v32 = vld [vmem:[#allocation2 + $0xc0] sm:$0xff]  ;;  %v1500_v35 = vld [vmem:[#allocation2 + $0xf0] sm:$0xff] }
 0x2bf   : > { %v4207_v11 = vmul.f32 %v4202_v7, %v1474_v5  ;;  %v4210_v12 = vmul.f32 %v4202_v7, %v1470_v6  ;;  %v4217_v13 = vmul.f32 %v4202_v7, %v1476_v9  ;;  %v4220_v14 = vmul.f32 %v4202_v7, %v1472_v10  ;;  %v1498_v36 = vld [vmem:[#allocation2 + $0xe0] sm:$0xff]  ;;  %v1504_v39 = vld [vmem:[#allocation2 + $0x110] sm:$0xff]  ;;  %v1473_v9 = vld [vmem:[#allocation2 + $0x18] sm:$0xff] }
 0x2c0   : > { %v4227_v17 = vmul.f32 %v4202_v7, %v1480_v15  ;;  %v4230_v18 = vmul.f32 %v4202_v7, %v1478_v16  ;;  %v4237_v21 = vmul.f32 %v4202_v7, %v1484_v19  ;;  %v4240_v22 = vmul.f32 %v4202_v7, %v1482_v20  ;;  %v1502_v40 = vld [vmem:[#allocation2 + $0x100] sm:$0xff]  ;;  %v1508_v43 = vld [vmem:[#allocation2 + $0x130] sm:$0xff]  ;;  %v1471_v10 = vld [vmem:[#allocation2 + $0x8] sm:$0xff] }
 0x2c1   : > { %1678 = vrot.lane.b32.xlu1 %v4207_v11, %s3495_s26  ;;  %1674 = vrot.lane.b32.xlu0 %v4210_v12, %s3495_s26  ;;  %v4247_v25 = vmul.f32 %v4202_v7, %v1488_v23  ;;  %v4250_v26 = vmul.f32 %v4202_v7, %v1486_v24  ;;  %v4257_v29 = vmul.f32 %v4202_v7, %v1492_v27  ;;  %v1506_v44 = vld [vmem:[#allocation2 + $0x120] sm:$0xff]  ;;  %v1512_v47 = vld [vmem:[#allocation2 + $0x150] sm:$0xff]  ;;  %v1477_v19 = vld [vmem:[#allocation2 + $0x38] sm:$0xff] }
 0x2c2   : > { %v4260_v30 = vmul.f32 %v4202_v7, %v1490_v28  ;;  %v4267_v33 = vmul.f32 %v4202_v7, %v1496_v31  ;;  %v4270_v34 = vmul.f32 %v4202_v7, %v1494_v32  ;;  %v4277_v37 = vmul.f32 %v4202_v7, %v1500_v35  ;;  %v1510_v48 = vld [vmem:[#allocation2 + $0x140] sm:$0xff]  ;;  %v1516_v51 = vld [vmem:[#allocation2 + $0x170] sm:$0xff]  ;;  %v1475_v20 = vld [vmem:[#allocation2 + $0x28] sm:$0xff] }
 0x2c3   : > { %v4280_v38 = vmul.f32 %v4202_v7, %v1498_v36  ;;  %v4287_v41 = vmul.f32 %v4202_v7, %v1504_v39  ;;  %v4290_v42 = vmul.f32 %v4202_v7, %v1502_v40  ;;  %v4297_v45 = vmul.f32 %v4202_v7, %v1508_v43  ;;  %v1514_v52 = vld [vmem:[#allocation2 + $0x160] sm:$0xff]  ;;  %v1520_v55 = vld [vmem:[#allocation2 + $0x190] sm:$0xff]  ;;  %v1481_v24 = vld [vmem:[#allocation2 + $0x58] sm:$0xff] }
 0x2c4   : > { %v4300_v46 = vmul.f32 %v4202_v7, %v1506_v44  ;;  %v4307_v49 = vmul.f32 %v4202_v7, %v1512_v47  ;;  %v4310_v50 = vmul.f32 %v4202_v7, %v1510_v48  ;;  %v4317_v53 = vmul.f32 %v4202_v7, %v1516_v51  ;;  %v1518_v56 = vld [vmem:[#allocation2 + $0x180] sm:$0xff]  ;;  %v1524_v59 = vld [vmem:[#allocation2 + $0x1b0] sm:$0xff]  ;;  %v1479_v27 = vld [vmem:[#allocation2 + $0x48] sm:$0xff] }
 0x2c5   : > { %1680 = vrot.lane.b32.xlu1 %v4217_v13, %s3495_s26  ;;  %1676 = vrot.lane.b32.xlu0 %v4220_v14, %s3495_s26  ;;  %v4320_v54 = vmul.f32 %v4202_v7, %v1514_v52  ;;  %v4327_v57 = vmul.f32 %v4202_v7, %v1520_v55  ;;  %v4330_v58 = vmul.f32 %v4202_v7, %v1518_v56  ;;  %v1522_v60 = vld [vmem:[#allocation2 + $0x1a0] sm:$0xff]  ;;  %v1528_v63 = vld [vmem:[#allocation2 + $0x1d0] sm:$0xff]  ;;  %v1485_v32 = vld [vmem:[#allocation2 + $0x78] sm:$0xff] }
 0x2c6   : > { %v4337_v61 = vmul.f32 %v4202_v7, %v1524_v59  ;;  %v4340_v62 = vmul.f32 %v4202_v7, %v1522_v60  ;;  %v1526_v0 = vld [vmem:[#allocation2 + $0x1c0] sm:$0xff]  ;;  %v4347_v1 = vmul.f32 %v4202_v7, %v1528_v63  ;;  %v1532_v3 = vld [vmem:[#allocation2 + $0x1f0] sm:$0xff]  ;;  %v4367_v15 = vmul.f32 %v4204_v8, %v1473_v9  ;;  %v1483_v35 = vld [vmem:[#allocation2 + $0x68] sm:$0xff] }
 0x2c7   : > { %v4350_v2 = vmul.f32 %v4202_v7, %v1526_v0  ;;  %v1530_v4 = vld [vmem:[#allocation2 + $0x1e0] sm:$0xff]  ;;  %v4357_v5 = vmul.f32 %v4202_v7, %v1532_v3  ;;  %v4370_v16 = vmul.f32 %v4204_v8, %v1471_v10  ;;  %v4380_v23 = vmul.f32 %v4204_v8, %v1475_v20  ;;  %v1489_v40 = vld [vmem:[#allocation2 + $0x98] sm:$0xff]  ;;  %v1487_v43 = vld [vmem:[#allocation2 + $0x88] sm:$0xff] }
 0x2c8   : > { %v4360_v6 = vmul.f32 %v4202_v7, %v1530_v4  ;;  %v4377_v7 = vmul.f32 %v4204_v8, %v1477_v19  ;;  %v4387_v28 = vmul.f32 %v4204_v8, %v1481_v24  ;;  %v4390_v31 = vmul.f32 %v4204_v8, %v1479_v27  ;;  %v1493_v48 = vld [vmem:[#allocation2 + $0xb8] sm:$0xff]  ;;  %v1491_v51 = vld [vmem:[#allocation2 + $0xa8] sm:$0xff] }
 0x2c9   : > { %1684 = vrot.lane.b32.xlu1 %v4227_v17, %s3495_s26  ;;  %1682 = vrot.lane.b32.xlu0 %v4230_v18, %s3495_s26  ;;  %v4397_v36 = vmul.f32 %v4204_v8, %v1485_v32  ;;  %v4400_v39 = vmul.f32 %v4204_v8, %v1483_v35  ;;  %v4407_v44 = vmul.f32 %v4204_v8, %v1489_v40  ;;  %v1497_v56 = vld [vmem:[#allocation2 + $0xd8] sm:$0xff]  ;;  %v1495_v59 = vld [vmem:[#allocation2 + $0xc8] sm:$0xff] }
 0x2ca   : > { %v4410_v47 = vmul.f32 %v4204_v8, %v1487_v43  ;;  %v4417_v52 = vmul.f32 %v4204_v8, %v1493_v48  ;;  %v4420_v55 = vmul.f32 %v4204_v8, %v1491_v51  ;;  %v4427_v60 = vmul.f32 %v4204_v8, %v1497_v56  ;;  %v1501_v0 = vld [vmem:[#allocation2 + $0xf8] sm:$0xff]  ;;  %v1499_v3 = vld [vmem:[#allocation2 + $0xe8] sm:$0xff] }
 0x2cb   : > { %5379 = vst [vmem:[#allocation35_spill] sm:$0xff] %v4400_v39  ;;  %5380 = vst [vmem:[#allocation36_spill] sm:$0xff] %v4407_v44  ;;  %v4430_v63 = vmul.f32 %v4204_v8, %v1495_v59  ;;  %v4437_v4 = vmul.f32 %v4204_v8, %v1501_v0  ;;  %v4440_v9 = vmul.f32 %v4204_v8, %v1499_v3  ;;  %v1505_v10 = vld [vmem:[#allocation2 + $0x118] sm:$0xff]  ;;  %v1503_v19 = vld [vmem:[#allocation2 + $0x108] sm:$0xff] }
 0x2cc   : > { %5381 = vst [vmem:[#allocation37_spill] sm:$0xff] %v4410_v47  ;;  %5382 = vst [vmem:[#allocation38_spill] sm:$0xff] %v4417_v52  ;;  %v4447_v20 = vmul.f32 %v4204_v8, %v1505_v10  ;;  %v4450_v24 = vmul.f32 %v4204_v8, %v1503_v19  ;;  %v1509_v27 = vld [vmem:[#allocation2 + $0x138] sm:$0xff]  ;;  %v1507_v32 = vld [vmem:[#allocation2 + $0x128] sm:$0xff] }
 0x2cd   : > { %1688 = vrot.lane.b32.xlu1 %v4237_v21, %s3495_s26  ;;  %1686 = vrot.lane.b32.xlu0 %v4240_v22, %s3495_s26  ;;  %5383 = vst [vmem:[#allocation39_spill] sm:$0xff] %v4420_v55  ;;  %5384 = vst [vmem:[#allocation40_spill] sm:$0xff] %v4427_v60  ;;  %v4457_v35 = vmul.f32 %v4204_v8, %v1509_v27  ;;  %v4460_v40 = vmul.f32 %v4204_v8, %v1507_v32  ;;  %v1513_v43 = vld [vmem:[#allocation2 + $0x158] sm:$0xff]  ;;  %v1511_v48 = vld [vmem:[#allocation2 + $0x148] sm:$0xff] }
 0x2ce   : > { %5385 = vst [vmem:[#allocation41_spill] sm:$0xff] %v4430_v63  ;;  %5386 = vst [vmem:[#allocation42_spill] sm:$0xff] %v4437_v4  ;;  %v4467_v51 = vmul.f32 %v4204_v8, %v1513_v43  ;;  %v4470_v56 = vmul.f32 %v4204_v8, %v1511_v48  ;;  %v1517_v59 = vld [vmem:[#allocation2 + $0x178] sm:$0xff]  ;;  %v1515_v0 = vld [vmem:[#allocation2 + $0x168] sm:$0xff] }
 0x2cf   : > { %5387 = vst [vmem:[#allocation43_spill] sm:$0xff] %v4440_v9  ;;  %5388 = vst [vmem:[#allocation44_spill] sm:$0xff] %v4447_v20  ;;  %v4477_v3 = vmul.f32 %v4204_v8, %v1517_v59  ;;  %v4480_v10 = vmul.f32 %v4204_v8, %v1515_v0  ;;  %v1521_v19 = vld [vmem:[#allocation2 + $0x198] sm:$0xff]  ;;  %v1519_v27 = vld [vmem:[#allocation2 + $0x188] sm:$0xff] }
 0x2d0   : > { %5389 = vst [vmem:[#allocation45_spill] sm:$0xff] %v4450_v24  ;;  %5390 = vst [vmem:[#allocation46_spill] sm:$0xff] %v4457_v35  ;;  %v4487_v32 = vmul.f32 %v4204_v8, %v1521_v19  ;;  %v4490_v43 = vmul.f32 %v4204_v8, %v1519_v27  ;;  %v1525_v48 = vld [vmem:[#allocation2 + $0x1b8] sm:$0xff]  ;;  %v1523_v59 = vld [vmem:[#allocation2 + $0x1a8] sm:$0xff] }
 0x2d1   : > { %1692 = vrot.lane.b32.xlu1 %v4247_v25, %s3495_s26  ;;  %1690 = vrot.lane.b32.xlu0 %v4250_v26, %s3495_s26  ;;  %5391 = vst [vmem:[#allocation47_spill] sm:$0xff] %v4460_v40  ;;  %5392 = vst [vmem:[#allocation48_spill] sm:$0xff] %v4467_v51  ;;  %v4496_v0 = vld [vmem:[%s3923_s20] sm:$0xff]  ;;  %v4509_v27 = vmul.f32 %v4204_v8, %v1525_v48 }
 0x2d2   : > { %5393 = vst [vmem:[#allocation49_spill] sm:$0xff] %v4470_v56  ;;  %5394 = vst [vmem:[#allocation50_spill] sm:$0xff] %v4477_v3  ;;  %v4506_v19 = vld [vmem:[%s4193_s18] sm:$0xff] }
 0x2d3   : > { %5395 = vst [vmem:[#allocation51_spill] sm:$0xff] %v4480_v10  ;;  %5396 = vst [vmem:[#allocation52_spill] sm:$0xff] %v4487_v32 }
 0x2d4   : > { %5397 = vst [vmem:[#allocation53_spill] sm:$0xff] %v4490_v43  ;;  %5398 = vst [vmem:[#allocation54_spill] sm:$0xff] %v4509_v27 }
 0x2d5   : > { %1696 = vrot.lane.b32.xlu1 %v4257_v29, %s3495_s26  ;;  %1694 = vrot.lane.b32.xlu0 %v4260_v30, %s3495_s26 }
 0x2d9   : > { %1700 = vrot.lane.b32.xlu1 %v4267_v33, %s3495_s26  ;;  %1698 = vrot.lane.b32.xlu0 %v4270_v34, %s3495_s26 }
 0x2dd   : > { %1704 = vrot.lane.b32.xlu1 %v4277_v37, %s3495_s26  ;;  %1702 = vrot.lane.b32.xlu0 %v4280_v38, %s3495_s26 }
 0x2e1   : > { %1708 = vrot.lane.b32.xlu1 %v4287_v41, %s3495_s26  ;;  %1706 = vrot.lane.b32.xlu0 %v4290_v42, %s3495_s26 }
 0x2e5   : > { %1712 = vrot.lane.b32.xlu1 %v4297_v45, %s3495_s26  ;;  %1710 = vrot.lane.b32.xlu0 %v4300_v46, %s3495_s26 }
 0x2e9   : > { %1716 = vrot.lane.b32.xlu1 %v4307_v49, %s3495_s26  ;;  %1714 = vrot.lane.b32.xlu0 %v4310_v50, %s3495_s26 }
 0x2ed   : > { %1720 = vrot.lane.b32.xlu1 %v4317_v53, %s3495_s26  ;;  %1718 = vrot.lane.b32.xlu0 %v4320_v54, %s3495_s26 }
 0x2f1   : > { %1724 = vrot.lane.b32.xlu1 %v4327_v57, %s3495_s26  ;;  %1722 = vrot.lane.b32.xlu0 %v4330_v58, %s3495_s26 }
 0x2f5   : > { %1728 = vrot.lane.b32.xlu1 %v4337_v61, %s3495_s26  ;;  %1726 = vrot.lane.b32.xlu0 %v4340_v62, %s3495_s26 }
 0x2f9   : > { %1732 = vrot.lane.b32.xlu1 %v4347_v1, %s3495_s26  ;;  %1730 = vrot.lane.b32.xlu0 %v4350_v2, %s3495_s26 }
 0x2fd   : > { %1736 = vrot.lane.b32.xlu1 %v4357_v5, %s3495_s26  ;;  %1734 = vrot.lane.b32.xlu0 %v4360_v6, %s3495_s26 }
 0x301   : > { %1836 = vrot.lane.b32.xlu1 %v4367_v15, %s3495_s26  ;;  %1834 = vrot.lane.b32.xlu0 %v4370_v16, %s3495_s26 }
 0x305   : > { %1840 = vrot.lane.b32.xlu1 %v4377_v7, %s3495_s26  ;;  %1838 = vrot.lane.b32.xlu0 %v4380_v23, %s3495_s26 }
 0x309   : > { %1844 = vrot.lane.b32.xlu1 %v4387_v28, %s3495_s26  ;;  %1842 = vrot.lane.b32.xlu0 %v4390_v31, %s3495_s26 }
 0x30d   : > { %1848 = vrot.lane.b32.xlu1 %v4397_v36, %s3495_s26  ;;  %1846 = vrot.lane.b32.xlu0 %v4400_v39, %s3495_s26  ;;  %v4600_v39 = vld [vmem:[%s3923_s20 + $0x48] sm:$0xff] }
 0x311   : > { %1852 = vrot.lane.b32.xlu1 %v4407_v44, %s3495_s26  ;;  %1850 = vrot.lane.b32.xlu0 %v4410_v47, %s3495_s26  ;;  %v4574_v47 = vld [vmem:[%s3923_s20 + $0x38] sm:$0xff]  ;;  %v4577_v44 = vld [vmem:[%s3923_s20 + $0x30] sm:$0xff] }
 0x312   : > { %5404 = vst [vmem:[#allocation60_spill] sm:$0xff] %v4577_v44 }
 0x315   : > { %1856 = vrot.lane.b32.xlu1 %v4417_v52, %s3495_s26  ;;  %1854 = vrot.lane.b32.xlu0 %v4420_v55, %s3495_s26  ;;  %v4545_v55 = vld [vmem:[%s3923_s20 + $0x28] sm:$0xff] }
 0x319   : > { %1860 = vrot.lane.b32.xlu1 %v4427_v60, %s3495_s26  ;;  %1858 = vrot.lane.b32.xlu0 %v4430_v63, %s3495_s26  ;;  %v1531_v63 = vld [vmem:[#allocation2 + $0x1e8] sm:$0xff] }
 0x31d   : > { %1864 = vrot.lane.b32.xlu1 %v4437_v4, %s3495_s26  ;;  %1862 = vrot.lane.b32.xlu0 %v4440_v9, %s3495_s26 }
 0x321   : > { %1868 = vrot.lane.b32.xlu1 %v4447_v20, %s3495_s26  ;;  %1866 = vrot.lane.b32.xlu0 %v4450_v24, %s3495_s26  ;;  %v4519_v20 = vld [vmem:[%s3923_s20 + $0x18] sm:$0xff] }
 0x325   : > { %1872 = vrot.lane.b32.xlu1 %v4457_v35, %s3495_s26  ;;  %1870 = vrot.lane.b32.xlu0 %v4460_v40, %s3495_s26  ;;  %v1529_v40 = vld [vmem:[#allocation2 + $0x1d8] sm:$0xff]  ;;  %v1527_v35 = vld [vmem:[#allocation2 + $0x1c8] sm:$0xff] }
 0x329   : > { %1876 = vrot.lane.b32.xlu1 %v4467_v51, %s3495_s26  ;;  %1874 = vrot.lane.b32.xlu0 %v4470_v56, %s3495_s26  ;;  %v4493_v56 = vld [vmem:[%s3923_s20 + $0x10] sm:$0xff] }
 0x32a   : > { %v1740_v51 = vmul.f32 %v4493_v56, %v4207_v11  ;;  %v4528_v11 = vld [vmem:[%s4193_s18 + $0x18] sm:$0xff] }
 0x32d   : > { %1880 = vrot.lane.b32.xlu1 %v4477_v3, %s3495_s26  ;;  %1878 = vrot.lane.b32.xlu0 %v4480_v10, %s3495_s26  ;;  %v4503_v10 = vld [vmem:[%s4193_s18 + $0x10] sm:$0xff]  ;;  %v4512_v3 = vmul.f32 %v4204_v8, %v1523_v59  ;;  %v4534_v59 = vmul.f32 %v4204_v8, %v1527_v35 }
 0x32f   : > { %5399 = vst [vmem:[#allocation55_spill] sm:$0xff] %v4512_v3  ;;  %5401 = vst [vmem:[#allocation57_spill] sm:$0xff] %v4534_v59 }
 0x331   : > { %1884 = vrot.lane.b32.xlu1 %v4487_v32, %s3495_s26  ;;  %1882 = vrot.lane.b32.xlu0 %v4490_v43, %s3495_s26  ;;  %v1738_v32 = vmul.f32 %v4496_v0, %v4210_v12  ;;  %v4531_v12 = vmul.f32 %v4204_v8, %v1529_v40  ;;  %v4548_v40 = vld [vmem:[%s3923_s20 + $0x20] sm:$0xff] }
 0x333   : > { %v1679_v43 = vpop.permute.xlu1 %1678  ;;  %v1675_v24 = vpop.permute.xlu0 %1674  ;;  %5400 = vst [vmem:[#allocation56_spill] sm:$0xff] %v4531_v12 }
 0x334   : > { %v1772_v48 = vmul.f32 %v1679_v43, %v4503_v10  ;;  %v1770_v9 = vmul.f32 %v1675_v24, %v4506_v19  ;;  %v1741_v24 = vmul.f32 %v4519_v20, %v4217_v13  ;;  %v4556_v13 = vld [vmem:[%s4193_s18 + $0x28] sm:$0xff] }
 0x335   : > { %1888 = vrot.lane.b32.xlu1 %v4509_v27, %s3495_s26  ;;  %1886 = vrot.lane.b32.xlu0 %v4512_v3, %s3495_s26  ;;  %v1533_v27 = vld [vmem:[#allocation2 + $0x1f8] sm:$0xff] }
 0x336   : > { %v4536_v4 = vadd.f32 %v1772_v48, %v1740_v51  ;;  %v4538_v43 = vadd.f32 %v1770_v9, %v1738_v32  ;;  %v4559_v9 = vld [vmem:[%s4193_s18 + $0x20] sm:$0xff]  ;;  %v4562_v51 = vmul.f32 %v4204_v8, %v1533_v27  ;;  %v4565_v32 = vmul.f32 %v4204_v8, %v1531_v63 }
 0x337   : > { %v1681_v3 = vpop.permute.xlu1 %1680  ;;  %v4542_v60 = vpop.permute.xlu0 %1676 }
 0x338   : > { %v1773_v35 = vmul.f32 %v1681_v3, %v4528_v11  ;;  %5402 = vst [vmem:[#allocation58_spill] sm:$0xff] %v4562_v51  ;;  %5403 = vst [vmem:[#allocation59_spill] sm:$0xff] %v4565_v32  ;;  %v1743_v3 = vmul.f32 %v4545_v55, %v4227_v17  ;;  %v4586_v17 = vld [vmem:[%s4193_s18 + $0x38] sm:$0xff] }
 0x339   : > { %1892 = vrot.lane.b32.xlu1 %v4531_v12, %s3495_s26  ;;  %1890 = vrot.lane.b32.xlu0 %v4534_v59, %s3495_s26  ;;  %v1742_v59 = vmul.f32 %v4548_v40, %v4230_v18  ;;  %5405 = vst [vmem:[#allocation61_spill] sm:$0xff] %v4586_v17  ;;  %v4589_v18 = vld [vmem:[%s4193_s18 + $0x30] sm:$0xff] }
 0x33a   : > { %v4567_v48 = vadd.f32 %v1773_v35, %v1741_v24 }
 0x33b   : > { %v1685_v12 = vpop.permute.xlu1 %1684  ;;  %v1683_v52 = vpop.permute.xlu0 %1682 }
 0x33c   : > { %v1775_v27 = vmul.f32 %v1685_v12, %v4556_v13  ;;  %v1774_v8 = vmul.f32 %v1683_v52, %v4559_v9  ;;  %v1745_v12 = vmul.f32 %v4574_v47, %v4237_v21  ;;  %v1744_v52 = vmul.f32 %v4577_v44, %v4240_v22  ;;  %v4611_v21 = vld [vmem:[%s4193_s18 + $0x40] sm:$0xff] }
 0x33d   : > { %1896 = vrot.lane.b32.xlu1 %v4562_v51, %s3495_s26  ;;  %1894 = vrot.lane.b32.xlu0 %v4565_v32, %s3495_s26  ;;  %v4603_v32 = vld [vmem:[%s3923_s20 + $0x40] sm:$0xff] }
 0x33e   : > { %v4591_v63 = vadd.f32 %v1775_v27, %v1743_v3  ;;  %v4593_v24 = vadd.f32 %v1774_v8, %v1742_v59  ;;  %5408 = vst [vmem:[#allocation64_spill] sm:$0xff] %v4603_v32  ;;  %v4608_v27 = vld [vmem:[%s4193_s18 + $0x48] sm:$0xff] }
 0x33f   : > { %v1689_v35 = vpop.permute.xlu1 %1688  ;;  %v1687_v51 = vpop.permute.xlu0 %1686  ;;  %5409 = vst [vmem:[#allocation65_spill] sm:$0xff] %v4608_v27 }
 0x340   : > { %5406 = vst [vmem:[#allocation62_spill] sm:$0xff] %v4591_v63  ;;  %5407 = vst [vmem:[#allocation63_spill] sm:$0xff] %v4593_v24  ;;  %v1777_v3 = vmul.f32 %v1689_v35, %v4586_v17  ;;  %v1776_v59 = vmul.f32 %v1687_v51, %v4589_v18  ;;  %v1747_v24 = vmul.f32 %v4600_v39, %v4247_v25  ;;  %v4622_v17 = vld [vmem:[%s3923_s20 + $0x58] sm:$0xff]  ;;  %v4625_v51 = vld [vmem:[%s3923_s20 + $0x50] sm:$0xff] }
 0x341   : > { %v1746_v63 = vmul.f32 %v4603_v32, %v4250_v26  ;;  %5412 = vst [vmem:[#allocation68_spill] sm:$0xff] %v4625_v51  ;;  %v4633_v25 = vld [vmem:[%s4193_s18 + $0x50] sm:$0xff] }
 0x342   : > { %v4613_v8 = vadd.f32 %v1777_v3, %v1745_v12  ;;  %v4615_v22 = vadd.f32 %v1776_v59, %v1744_v52  ;;  %v4630_v3 = vld [vmem:[%s4193_s18 + $0x58] sm:$0xff] }
 0x343   : > { %v1693_v44 = vpop.permute.xlu1 %1692  ;;  %v1691_v35 = vpop.permute.xlu0 %1690  ;;  %5413 = vst [vmem:[#allocation69_spill] sm:$0xff] %v4630_v3 }
 0x344   : > { %5410 = vst [vmem:[#allocation66_spill] sm:$0xff] %v4613_v8  ;;  %5411 = vst [vmem:[#allocation67_spill] sm:$0xff] %v4615_v22  ;;  %v1779_v12 = vmul.f32 %v1693_v44, %v4608_v27  ;;  %v1778_v52 = vmul.f32 %v1691_v35, %v4611_v21  ;;  %v1749_v22 = vmul.f32 %v4622_v17, %v4257_v29  ;;  %v4644_v27 = vld [vmem:[%s3923_s20 + $0x68] sm:$0xff]  ;;  %v4647_v35 = vld [vmem:[%s3923_s20 + $0x60] sm:$0xff] }
 0x345   : > { %v1748_v8 = vmul.f32 %v4625_v51, %v4260_v30  ;;  %5416 = vst [vmem:[#allocation72_spill] sm:$0xff] %v4647_v35  ;;  %v4655_v29 = vld [vmem:[%s4193_s18 + $0x60] sm:$0xff] }
 0x346   : > { %v4635_v59 = vadd.f32 %v1779_v12, %v1747_v24  ;;  %v4637_v26 = vadd.f32 %v1778_v52, %v1746_v63  ;;  %v4652_v12 = vld [vmem:[%s4193_s18 + $0x68] sm:$0xff] }
 0x347   : > { %v1697_v32 = vpop.permute.xlu1 %1696  ;;  %v1695_v44 = vpop.permute.xlu0 %1694  ;;  %5417 = vst [vmem:[#allocation73_spill] sm:$0xff] %v4652_v12 }
 0x348   : > { %5414 = vst [vmem:[#allocation70_spill] sm:$0xff] %v4635_v59  ;;  %5415 = vst [vmem:[#allocation71_spill] sm:$0xff] %v4637_v26  ;;  %v1781_v24 = vmul.f32 %v1697_v32, %v4630_v3  ;;  %v1780_v63 = vmul.f32 %v1695_v44, %v4633_v25  ;;  %v1751_v26 = vmul.f32 %v4644_v27, %v4267_v33  ;;  %v4666_v3 = vld [vmem:[%s3923_s20 + $0x78] sm:$0xff]  ;;  %v4669_v44 = vld [vmem:[%s3923_s20 + $0x70] sm:$0xff] }
 0x349   : > { %v1750_v59 = vmul.f32 %v4647_v35, %v4270_v34  ;;  %5420 = vst [vmem:[#allocation76_spill] sm:$0xff] %v4669_v44  ;;  %v4677_v33 = vld [vmem:[%s4193_s18 + $0x70] sm:$0xff] }
 0x34a   : > { %v4657_v52 = vadd.f32 %v1781_v24, %v1749_v22  ;;  %v4659_v30 = vadd.f32 %v1780_v63, %v1748_v8  ;;  %v4674_v24 = vld [vmem:[%s4193_s18 + $0x78] sm:$0xff] }
 0x34b   : > { %v1701_v51 = vpop.permute.xlu1 %1700  ;;  %v1699_v32 = vpop.permute.xlu0 %1698  ;;  %5421 = vst [vmem:[#allocation77_spill] sm:$0xff] %v4674_v24 }
 0x34c   : > { %5418 = vst [vmem:[#allocation74_spill] sm:$0xff] %v4657_v52  ;;  %5419 = vst [vmem:[#allocation75_spill] sm:$0xff] %v4659_v30  ;;  %v1783_v22 = vmul.f32 %v1701_v51, %v4652_v12  ;;  %v1782_v8 = vmul.f32 %v1699_v32, %v4655_v29  ;;  %v1753_v30 = vmul.f32 %v4666_v3, %v4277_v37  ;;  %v4688_v12 = vld [vmem:[%s3923_s20 + $0x88] sm:$0xff]  ;;  %v4691_v32 = vld [vmem:[%s3923_s20 + $0x80] sm:$0xff] }
 0x34d   : > { %v1752_v52 = vmul.f32 %v4669_v44, %v4280_v38  ;;  %5424 = vst [vmem:[#allocation80_spill] sm:$0xff] %v4691_v32  ;;  %v4699_v37 = vld [vmem:[%s4193_s18 + $0x80] sm:$0xff] }
 0x34e   : > { %v4679_v63 = vadd.f32 %v1783_v22, %v1751_v26  ;;  %v4681_v34 = vadd.f32 %v1782_v8, %v1750_v59  ;;  %v4696_v22 = vld [vmem:[%s4193_s18 + $0x88] sm:$0xff] }
 0x34f   : > { %v1705_v35 = vpop.permute.xlu1 %1704  ;;  %v1703_v51 = vpop.permute.xlu0 %1702  ;;  %5425 = vst [vmem:[#allocation81_spill] sm:$0xff] %v4696_v22 }
 0x350   : > { %5422 = vst [vmem:[#allocation78_spill] sm:$0xff] %v4679_v63  ;;  %5423 = vst [vmem:[#allocation79_spill] sm:$0xff] %v4681_v34  ;;  %v1785_v26 = vmul.f32 %v1705_v35, %v4674_v24  ;;  %v1784_v59 = vmul.f32 %v1703_v51, %v4677_v33  ;;  %v1755_v34 = vmul.f32 %v4688_v12, %v4287_v41  ;;  %v4710_v24 = vld [vmem:[%s3923_s20 + $0x98] sm:$0xff]  ;;  %v4713_v51 = vld [vmem:[%s3923_s20 + $0x90] sm:$0xff] }
 0x351   : > { %v1754_v63 = vmul.f32 %v4691_v32, %v4290_v42  ;;  %5428 = vst [vmem:[#allocation84_spill] sm:$0xff] %v4713_v51  ;;  %v4721_v41 = vld [vmem:[%s4193_s18 + $0x90] sm:$0xff] }
 0x352   : > { %v4701_v8 = vadd.f32 %v1785_v26, %v1753_v30  ;;  %v4703_v38 = vadd.f32 %v1784_v59, %v1752_v52  ;;  %v4718_v26 = vld [vmem:[%s4193_s18 + $0x98] sm:$0xff] }
 0x353   : > { %v1709_v44 = vpop.permute.xlu1 %1708  ;;  %v1707_v35 = vpop.permute.xlu0 %1706  ;;  %5429 = vst [vmem:[#allocation85_spill] sm:$0xff] %v4718_v26 }
 0x354   : > { %5426 = vst [vmem:[#allocation82_spill] sm:$0xff] %v4701_v8  ;;  %5427 = vst [vmem:[#allocation83_spill] sm:$0xff] %v4703_v38  ;;  %v1787_v30 = vmul.f32 %v1709_v44, %v4696_v22  ;;  %v1786_v52 = vmul.f32 %v1707_v35, %v4699_v37  ;;  %v1757_v38 = vmul.f32 %v4710_v24, %v4297_v45  ;;  %v4732_v22 = vld [vmem:[%s3923_s20 + $0xa8] sm:$0xff]  ;;  %v4735_v35 = vld [vmem:[%s3923_s20 + $0xa0] sm:$0xff] }
 0x355   : > { %v1756_v8 = vmul.f32 %v4713_v51, %v4300_v46  ;;  %5432 = vst [vmem:[#allocation88_spill] sm:$0xff] %v4735_v35  ;;  %v4743_v45 = vld [vmem:[%s4193_s18 + $0xa0] sm:$0xff] }
 0x356   : > { %v4723_v59 = vadd.f32 %v1787_v30, %v1755_v34  ;;  %v4725_v42 = vadd.f32 %v1786_v52, %v1754_v63  ;;  %v4740_v30 = vld [vmem:[%s4193_s18 + $0xa8] sm:$0xff] }
 0x357   : > { %v1713_v32 = vpop.permute.xlu1 %1712  ;;  %v1711_v44 = vpop.permute.xlu0 %1710  ;;  %5433 = vst [vmem:[#allocation89_spill] sm:$0xff] %v4740_v30 }
 0x358   : > { %5430 = vst [vmem:[#allocation86_spill] sm:$0xff] %v4723_v59  ;;  %5431 = vst [vmem:[#allocation87_spill] sm:$0xff] %v4725_v42  ;;  %v1789_v34 = vmul.f32 %v1713_v32, %v4718_v26  ;;  %v1788_v63 = vmul.f32 %v1711_v44, %v4721_v41  ;;  %v1759_v42 = vmul.f32 %v4732_v22, %v4307_v49  ;;  %v4754_v26 = vld [vmem:[%s3923_s20 + $0xb8] sm:$0xff]  ;;  %v4757_v44 = vld [vmem:[%s3923_s20 + $0xb0] sm:$0xff] }
 0x359   : > { %v1758_v59 = vmul.f32 %v4735_v35, %v4310_v50  ;;  %5436 = vst [vmem:[#allocation92_spill] sm:$0xff] %v4757_v44  ;;  %v4765_v49 = vld [vmem:[%s4193_s18 + $0xb0] sm:$0xff] }
 0x35a   : > { %v4745_v52 = vadd.f32 %v1789_v34, %v1757_v38  ;;  %v4747_v46 = vadd.f32 %v1788_v63, %v1756_v8  ;;  %v4762_v34 = vld [vmem:[%s4193_s18 + $0xb8] sm:$0xff] }
 0x35b   : > { %v1717_v51 = vpop.permute.xlu1 %1716  ;;  %v1715_v32 = vpop.permute.xlu0 %1714  ;;  %5437 = vst [vmem:[#allocation93_spill] sm:$0xff] %v4762_v34 }
 0x35c   : > { %5434 = vst [vmem:[#allocation90_spill] sm:$0xff] %v4745_v52  ;;  %5435 = vst [vmem:[#allocation91_spill] sm:$0xff] %v4747_v46  ;;  %v1791_v38 = vmul.f32 %v1717_v51, %v4740_v30  ;;  %v1790_v8 = vmul.f32 %v1715_v32, %v4743_v45  ;;  %v1761_v46 = vmul.f32 %v4754_v26, %v4317_v53  ;;  %v4776_v30 = vld [vmem:[%s3923_s20 + $0xc8] sm:$0xff]  ;;  %v4779_v32 = vld [vmem:[%s3923_s20 + $0xc0] sm:$0xff] }
 0x35d   : > { %v1760_v52 = vmul.f32 %v4757_v44, %v4320_v54  ;;  %5440 = vst [vmem:[#allocation96_spill] sm:$0xff] %v4779_v32  ;;  %v4787_v53 = vld [vmem:[%s4193_s18 + $0xc0] sm:$0xff] }
 0x35e   : > { %v4767_v63 = vadd.f32 %v1791_v38, %v1759_v42  ;;  %v4769_v50 = vadd.f32 %v1790_v8, %v1758_v59  ;;  %v4784_v38 = vld [vmem:[%s4193_s18 + $0xc8] sm:$0xff] }
 0x35f   : > { %v1721_v35 = vpop.permute.xlu1 %1720  ;;  %v1719_v51 = vpop.permute.xlu0 %1718  ;;  %5441 = vst [vmem:[#allocation97_spill] sm:$0xff] %v4784_v38 }
 0x360   : > { %5438 = vst [vmem:[#allocation94_spill] sm:$0xff] %v4767_v63  ;;  %5439 = vst [vmem:[#allocation95_spill] sm:$0xff] %v4769_v50  ;;  %v1793_v42 = vmul.f32 %v1721_v35, %v4762_v34  ;;  %v1792_v59 = vmul.f32 %v1719_v51, %v4765_v49  ;;  %v1763_v50 = vmul.f32 %v4776_v30, %v4327_v57  ;;  %v4798_v34 = vld [vmem:[%s3923_s20 + $0xd8] sm:$0xff]  ;;  %v4801_v51 = vld [vmem:[%s3923_s20 + $0xd0] sm:$0xff] }
 0x361   : > { %v1762_v63 = vmul.f32 %v4779_v32, %v4330_v58  ;;  %5444 = vst [vmem:[#allocation100_spill] sm:$0xff] %v4801_v51  ;;  %v4809_v57 = vld [vmem:[%s4193_s18 + $0xd0] sm:$0xff] }
 0x362   : > { %v4789_v8 = vadd.f32 %v1793_v42, %v1761_v46  ;;  %v4791_v54 = vadd.f32 %v1792_v59, %v1760_v52  ;;  %v4806_v42 = vld [vmem:[%s4193_s18 + $0xd8] sm:$0xff]  ;;  %5446 = vst [vmem:[#allocation102_spill] sm:$0xff] %v4809_v57 }
 0x363   : > { %v1725_v44 = vpop.permute.xlu1 %1724  ;;  %v1723_v35 = vpop.permute.xlu0 %1722  ;;  %5445 = vst [vmem:[#allocation101_spill] sm:$0xff] %v4806_v42 }
 0x364   : > { %5442 = vst [vmem:[#allocation98_spill] sm:$0xff] %v4789_v8  ;;  %5443 = vst [vmem:[#allocation99_spill] sm:$0xff] %v4791_v54  ;;  %v1795_v46 = vmul.f32 %v1725_v44, %v4784_v38  ;;  %v1794_v52 = vmul.f32 %v1723_v35, %v4787_v53  ;;  %v1765_v54 = vmul.f32 %v4798_v34, %v4337_v61  ;;  %v4820_v38 = vld [vmem:[%s3923_s20 + $0xe8] sm:$0xff]  ;;  %v4823_v35 = vld [vmem:[%s3923_s20 + $0xe0] sm:$0xff] }
 0x365   : > { %v1764_v8 = vmul.f32 %v4801_v51, %v4340_v62  ;;  %5449 = vst [vmem:[#allocation105_spill] sm:$0xff] %v4820_v38  ;;  %5450 = vst [vmem:[#allocation106_spill] sm:$0xff] %v4823_v35  ;;  %v4831_v61 = vld [vmem:[%s4193_s18 + $0xe0] sm:$0xff] }
 0x366   : > { %v4811_v59 = vadd.f32 %v1795_v46, %v1763_v50  ;;  %v4813_v58 = vadd.f32 %v1794_v52, %v1762_v63  ;;  %v4828_v46 = vld [vmem:[%s4193_s18 + $0xe8] sm:$0xff]  ;;  %5452 = vst [vmem:[#allocation108_spill] sm:$0xff] %v4831_v61 }
 0x367   : > { %v1729_v32 = vpop.permute.xlu1 %1728  ;;  %v1727_v44 = vpop.permute.xlu0 %1726  ;;  %5451 = vst [vmem:[#allocation107_spill] sm:$0xff] %v4828_v46 }
 0x368   : > { %5447 = vst [vmem:[#allocation103_spill] sm:$0xff] %v4811_v59  ;;  %5448 = vst [vmem:[#allocation104_spill] sm:$0xff] %v4813_v58  ;;  %v1797_v50 = vmul.f32 %v1729_v32, %v4806_v42  ;;  %v1796_v63 = vmul.f32 %v1727_v44, %v4809_v57  ;;  %v1767_v58 = vmul.f32 %v4820_v38, %v4347_v1  ;;  %v4842_v42 = vld [vmem:[%s3923_s20 + $0xf8] sm:$0xff]  ;;  %v4845_v44 = vld [vmem:[%s3923_s20 + $0xf0] sm:$0xff] }
 0x369   : > { %v1766_v59 = vmul.f32 %v4823_v35, %v4350_v2  ;;  %v1769_v2 = vmul.f32 %v4842_v42, %v4357_v5  ;;  %v1643_v35 = vld [vmem:[%s4193_s18 + $0x8] sm:$0xff]  ;;  %v1898_v5 = vmul.f32 %v4496_v0, %v4370_v16 }
 0x36a   : > { %v4833_v52 = vadd.f32 %v1797_v50, %v1765_v54  ;;  %v4835_v62 = vadd.f32 %v1796_v63, %v1764_v8  ;;  %v4850_v50 = vld [vmem:[%s4193_s18 + $0xf8] sm:$0xff]  ;;  %v4853_v8 = vld [vmem:[%s4193_s18 + $0xf0] sm:$0xff]  ;;  %v1611_v63 = vld [vmem:[%s3923_s20 + $0x8] sm:$0xff] }
 0x36b   : > { %v1733_v51 = vpop.permute.xlu1 %1732  ;;  %v1731_v32 = vpop.permute.xlu0 %1730 }
 0x36c   : > { %5453 = vst [vmem:[#allocation109_spill] sm:$0xff] %v4833_v52  ;;  %5454 = vst [vmem:[#allocation110_spill] sm:$0xff] %v4835_v62  ;;  %v1799_v57 = vmul.f32 %v1733_v51, %v4828_v46  ;;  %v1798_v54 = vmul.f32 %v1731_v32, %v4831_v61  ;;  %v1768_v52 = vmul.f32 %v4845_v44, %v4360_v6 }
 0x36d   : > { %v1739_v46 = vmul.f32 %v1611_v63, %v4220_v14  ;;  %v1901_v14 = vmul.f32 %v4519_v20, %v4377_v7 }
 0x36e   : > { %v4856_v62 = vadd.f32 %v1799_v57, %v1767_v58  ;;  %v4858_v1 = vadd.f32 %v1798_v54, %v1766_v59  ;;  %v1899_v57 = vmul.f32 %v1611_v63, %v4367_v15  ;;  %v1771_v59 = vmul.f32 %v4542_v60, %v1643_v35 }
 0x36f   : > { %v1737_v38 = vpop.permute.xlu1 %1736  ;;  %v1735_v51 = vpop.permute.xlu0 %1734 }
 0x370   : > { %5455 = vst [vmem:[#allocation111_spill] sm:$0xff] %v4858_v1  ;;  %v1801_v32 = vmul.f32 %v1737_v38, %v4850_v50  ;;  %v1800_v61 = vmul.f32 %v1735_v51, %v4853_v8  ;;  %v1803_v15 = vadd.f32 %v1771_v59, %v1739_v46 }
 0x372   : > { %v4870_v58 = vadd.f32 %v1801_v32, %v1769_v2  ;;  %v4872_v54 = vadd.f32 %v1800_v61, %v1768_v52  ;;  %v1900_v61 = vmul.f32 %v4493_v56, %v4380_v23  ;;  %v1902_v23 = vmul.f32 %v4548_v40, %v4390_v31  ;;  %v5456_v31 = vld [vmem:[#allocation35_spill] sm:$0xff] }
 0x373   : > { %v1837_v6 = vpop.permute.xlu1 %1836  ;;  %v1835_v1 = vpop.permute.xlu0 %1834 }
 0x374   : > { %v1931_v38 = vmul.f32 %v1837_v6, %v1643_v35  ;;  %v1930_v51 = vmul.f32 %v1835_v1, %v4506_v19  ;;  %v1903_v35 = vmul.f32 %v4545_v55, %v4387_v28  ;;  %v1905_v28 = vmul.f32 %v4574_v47, %v4397_v36  ;;  %v5457_v55 = vld [vmem:[#allocation60_spill] sm:$0xff]  ;;  %v5458_v6 = vld [vmem:[#allocation62_spill] sm:$0xff] }
 0x375   : > { %v1904_v40 = vmul.f32 %v5457_v55, %v5456_v31  ;;  %v5461_v36 = vld [vmem:[#allocation36_spill] sm:$0xff]  ;;  %v5471_v31 = vld [vmem:[#allocation71_spill] sm:$0xff] }
 0x376   : > { %v1963_v63 = vadd.f32 %v1931_v38, %v1899_v57  ;;  %v1962_v60 = vadd.f32 %v1930_v51, %v1898_v5  ;;  %v1907_v47 = vmul.f32 %v4600_v39, %v5461_v36  ;;  %v5467_v39 = vld [vmem:[#allocation38_spill] sm:$0xff]  ;;  %v5477_v36 = vld [vmem:[#allocation75_spill] sm:$0xff] }
 0x377   : > { %v1841_v52 = vpop.permute.xlu1 %1840  ;;  %v1839_v2 = vpop.permute.xlu0 %1838 }
 0x378   : > { %v2896_v32 = vpack.c.bf16 %v1963_v63, %v1803_v15  ;;  %v2895_v16 = vpack.c.bf16 %v1962_v60, %v4538_v43  ;;  %v1933_v0 = vmul.f32 %v1841_v52, %v4528_v11  ;;  %v1932_v19 = vmul.f32 %v1839_v2, %v4503_v10  ;;  %v5462_v60 = vld [vmem:[#allocation37_spill] sm:$0xff] }
 0x37a   : > { %2187 = vst [vmem:[%s4196_s1 + $0x8] sm:$0xff] %v2896_v32  ;;  %2186 = vst [vmem:[%s4196_s1] sm:$0xff] %v2895_v16  ;;  %v1965_v7 = vadd.f32 %v1933_v0, %v1901_v14  ;;  %v1964_v20 = vadd.f32 %v1932_v19, %v1900_v61  ;;  %v5463_v61 = vld [vmem:[#allocation64_spill] sm:$0xff]  ;;  %v5464_v16 = vld [vmem:[#allocation66_spill] sm:$0xff] }
 0x37b   : > { %v1845_v56 = vpop.permute.xlu1 %1844  ;;  %v1843_v46 = vpop.permute.xlu0 %1842  ;;  %v1906_v52 = vmul.f32 %v5463_v61, %v5462_v60  ;;  %v5465_v19 = vld [vmem:[#allocation67_spill] sm:$0xff]  ;;  %v5478_v60 = vld [vmem:[#allocation73_spill] sm:$0xff] }
 0x37c   : > { %v2898_v1 = vpack.c.bf16 %v1965_v7, %v4567_v48  ;;  %v2897_v43 = vpack.c.bf16 %v1964_v20, %v4536_v4  ;;  %v1935_v10 = vmul.f32 %v1845_v56, %v4556_v13  ;;  %v1934_v11 = vmul.f32 %v1843_v46, %v4559_v9  ;;  %v5459_v4 = vld [vmem:[#allocation63_spill] sm:$0xff]  ;;  %v5460_v13 = vld [vmem:[#allocation61_spill] sm:$0xff] }
 0x37d   : > { %v5466_v20 = vld [vmem:[#allocation65_spill] sm:$0xff]  ;;  %v1909_v46 = vmul.f32 %v4622_v17, %v5467_v39  ;;  %v5473_v17 = vld [vmem:[#allocation40_spill] sm:$0xff] }
 0x37e   : > { %2189 = vst [vmem:[%s4196_s1 + $0x18] sm:$0xff] %v2898_v1  ;;  %2188 = vst [vmem:[%s4196_s1 + $0x10] sm:$0xff] %v2897_v43  ;;  %v1967_v57 = vadd.f32 %v1935_v10, %v1903_v35  ;;  %v1966_v59 = vadd.f32 %v1934_v11, %v1902_v23  ;;  %v5468_v1 = vld [vmem:[#allocation39_spill] sm:$0xff]  ;;  %v5469_v43 = vld [vmem:[#allocation68_spill] sm:$0xff] }
 0x37f   : > { %v1849_v5 = vpop.permute.xlu1 %1848  ;;  %v1847_v48 = vpop.permute.xlu0 %1846  ;;  %v1908_v10 = vmul.f32 %v5469_v43, %v5468_v1  ;;  %v5484_v39 = vld [vmem:[#allocation77_spill] sm:$0xff] }
 0x380   : > { %v2900_v38 = vpack.c.bf16 %v1967_v57, %v5458_v6  ;;  %v2899_v51 = vpack.c.bf16 %v1966_v59, %v5459_v4  ;;  %v1937_v9 = vmul.f32 %v1849_v5, %v5460_v13  ;;  %v1936_v14 = vmul.f32 %v1847_v48, %v4589_v18  ;;  %v5470_v59 = vld [vmem:[#allocation70_spill] sm:$0xff]  ;;  %v5474_v4 = vld [vmem:[#allocation41_spill] sm:$0xff] }
 0x382   : > { %2191 = vst [vmem:[%s4196_s1 + $0x28] sm:$0xff] %v2900_v38  ;;  %2190 = vst [vmem:[%s4196_s1 + $0x20] sm:$0xff] %v2899_v51  ;;  %v1969_v15 = vadd.f32 %v1937_v9, %v1905_v28  ;;  %v1968_v63 = vadd.f32 %v1936_v14, %v1904_v40  ;;  %v5472_v40 = vld [vmem:[#allocation69_spill] sm:$0xff]  ;;  %v1911_v38 = vmul.f32 %v4644_v27, %v5473_v17  ;;  %v5475_v51 = vld [vmem:[#allocation72_spill] sm:$0xff] }
 0x383   : > { %v1853_v2 = vpop.permute.xlu1 %1852  ;;  %v1851_v32 = vpop.permute.xlu0 %1850  ;;  %v1910_v13 = vmul.f32 %v5475_v51, %v5474_v4  ;;  %v5479_v27 = vld [vmem:[#allocation42_spill] sm:$0xff]  ;;  %v5492_v51 = vld [vmem:[#allocation47_spill] sm:$0xff] }
 0x384   : > { %v2902_v0 = vpack.c.bf16 %v1969_v15, %v5464_v16  ;;  %v2901_v7 = vpack.c.bf16 %v1968_v63, %v5465_v19  ;;  %v1939_v18 = vmul.f32 %v1853_v2, %v5466_v20  ;;  %v1938_v35 = vmul.f32 %v1851_v32, %v4611_v21  ;;  %v5476_v15 = vld [vmem:[#allocation74_spill] sm:$0xff]  ;;  %v5480_v16 = vld [vmem:[#allocation43_spill] sm:$0xff] }
 0x385   : > { %v1913_v32 = vmul.f32 %v4666_v3, %v5479_v27  ;;  %v5485_v3 = vld [vmem:[#allocation44_spill] sm:$0xff] }
 0x386   : > { %2193 = vst [vmem:[%s4196_s1 + $0x38] sm:$0xff] %v2902_v0  ;;  %2192 = vst [vmem:[%s4196_s1 + $0x30] sm:$0xff] %v2901_v7  ;;  %v1971_v23 = vadd.f32 %v1939_v18, %v1907_v47  ;;  %v1970_v56 = vadd.f32 %v1938_v35, %v1906_v52  ;;  %v5481_v0 = vld [vmem:[#allocation76_spill] sm:$0xff]  ;;  %v5482_v18 = vld [vmem:[#allocation78_spill] sm:$0xff] }
 0x387   : > { %v1857_v11 = vpop.permute.xlu1 %1856  ;;  %v1855_v57 = vpop.permute.xlu0 %1854  ;;  %v1912_v19 = vmul.f32 %v5481_v0, %v5480_v16  ;;  %v5499_v16 = vld [vmem:[#allocation88_spill] sm:$0xff] }
 0x388   : > { %v2904_v28 = vpack.c.bf16 %v1971_v23, %v5470_v59  ;;  %v2903_v55 = vpack.c.bf16 %v1970_v56, %v5471_v31  ;;  %v1941_v21 = vmul.f32 %v1857_v11, %v5472_v40  ;;  %v1940_v5 = vmul.f32 %v1855_v57, %v4633_v25  ;;  %v5483_v23 = vld [vmem:[#allocation79_spill] sm:$0xff]  ;;  %v5486_v11 = vld [vmem:[#allocation45_spill] sm:$0xff]  ;;  %v5487_v57 = vld [vmem:[#allocation80_spill] sm:$0xff] }
 0x389   : > { %v1914_v59 = vmul.f32 %v5487_v57, %v5486_v11 }
 0x38a   : > { %2195 = vst [vmem:[%s4196_s1 + $0x48] sm:$0xff] %v2904_v28  ;;  %2194 = vst [vmem:[%s4196_s1 + $0x40] sm:$0xff] %v2903_v55  ;;  %v1973_v48 = vadd.f32 %v1941_v21, %v1909_v46  ;;  %v1972_v6 = vadd.f32 %v1940_v5, %v1908_v10  ;;  %v1915_v10 = vmul.f32 %v4688_v12, %v5485_v3  ;;  %v5488_v55 = vld [vmem:[#allocation82_spill] sm:$0xff]  ;;  %v5489_v21 = vld [vmem:[#allocation83_spill] sm:$0xff] }
 0x38b   : > { %v1861_v9 = vpop.permute.xlu1 %1860  ;;  %v1859_v14 = vpop.permute.xlu0 %1858  ;;  %v5491_v12 = vld [vmem:[#allocation46_spill] sm:$0xff]  ;;  %v5505_v3 = vld [vmem:[#allocation92_spill] sm:$0xff] }
 0x38c   : > { %v2906_v63 = vpack.c.bf16 %v1973_v48, %v5476_v15  ;;  %v2905_v47 = vpack.c.bf16 %v1972_v6, %v5477_v36  ;;  %v1943_v25 = vmul.f32 %v1861_v9, %v5478_v60  ;;  %v1942_v61 = vmul.f32 %v1859_v14, %v4655_v29  ;;  %v5490_v48 = vld [vmem:[#allocation81_spill] sm:$0xff] }
 0x38d   : > { %v1917_v4 = vmul.f32 %v4710_v24, %v5491_v12  ;;  %v5497_v24 = vld [vmem:[#allocation48_spill] sm:$0xff] }
 0x38e   : > { %2197 = vst [vmem:[%s4196_s1 + $0x58] sm:$0xff] %v2906_v63  ;;  %2196 = vst [vmem:[%s4196_s1 + $0x50] sm:$0xff] %v2905_v47  ;;  %v1975_v52 = vadd.f32 %v1943_v25, %v1911_v38  ;;  %v1974_v2 = vadd.f32 %v1942_v61, %v1910_v13  ;;  %v5493_v13 = vld [vmem:[#allocation84_spill] sm:$0xff]  ;;  %v5494_v63 = vld [vmem:[#allocation86_spill] sm:$0xff]  ;;  %v1919_v27 = vmul.f32 %v4732_v22, %v5497_v24 }
 0x38f   : > { %v1865_v7 = vpop.permute.xlu1 %1864  ;;  %v1863_v20 = vpop.permute.xlu0 %1862  ;;  %v1916_v9 = vmul.f32 %v5493_v13, %v5492_v51  ;;  %v5495_v47 = vld [vmem:[#allocation87_spill] sm:$0xff]  ;;  %v5496_v25 = vld [vmem:[#allocation85_spill] sm:$0xff]  ;;  %v5503_v22 = vld [vmem:[#allocation50_spill] sm:$0xff] }
 0x390   : > { %v2908_v35 = vpack.c.bf16 %v1975_v52, %v5482_v18  ;;  %v2907_v56 = vpack.c.bf16 %v1974_v2, %v5483_v23  ;;  %v1945_v29 = vmul.f32 %v1865_v7, %v5484_v39  ;;  %v1944_v46 = vmul.f32 %v1863_v20, %v4677_v33  ;;  %v5500_v20 = vld [vmem:[#allocation90_spill] sm:$0xff]  ;;  %v5518_v24 = vld [vmem:[#allocation103_spill] sm:$0xff] }
 0x391   : > { %v5512_v51 = vld [vmem:[#allocation98_spill] sm:$0xff] }
 0x392   : > { %2199 = vst [vmem:[%s4196_s1 + $0x68] sm:$0xff] %v2908_v35  ;;  %2198 = vst [vmem:[%s4196_s1 + $0x60] sm:$0xff] %v2907_v56  ;;  %v1977_v1 = vadd.f32 %v1945_v29, %v1913_v32  ;;  %v1976_v43 = vadd.f32 %v1944_v46, %v1912_v19  ;;  %v5498_v32 = vld [vmem:[#allocation49_spill] sm:$0xff]  ;;  %v5501_v35 = vld [vmem:[#allocation91_spill] sm:$0xff] }
 0x393   : > { %v1869_v28 = vpop.permute.xlu1 %1868  ;;  %v1867_v31 = vpop.permute.xlu0 %1866  ;;  %v1918_v0 = vmul.f32 %v5499_v16, %v5498_v32  ;;  %v5502_v56 = vld [vmem:[#allocation89_spill] sm:$0xff]  ;;  %v5519_v32 = vld [vmem:[#allocation104_spill] sm:$0xff] }
 0x394   : > { %v2910_v40 = vpack.c.bf16 %v1977_v1, %v5488_v55  ;;  %v2909_v5 = vpack.c.bf16 %v1976_v43, %v5489_v21  ;;  %v1947_v33 = vmul.f32 %v1869_v28, %v5490_v48  ;;  %v1946_v6 = vmul.f32 %v1867_v31, %v4699_v37  ;;  %v5504_v43 = vld [vmem:[#allocation51_spill] sm:$0xff] }
 0x395   : > { %v1921_v1 = vmul.f32 %v4754_v26, %v5503_v22  ;;  %v5507_v31 = vld [vmem:[#allocation95_spill] sm:$0xff]  ;;  %v5509_v26 = vld [vmem:[#allocation52_spill] sm:$0xff]  ;;  %v5526_v22 = vld [vmem:[#allocation109_spill] sm:$0xff] }
 0x396   : > { %2201 = vst [vmem:[%s4196_s1 + $0x78] sm:$0xff] %v2910_v40  ;;  %2200 = vst [vmem:[%s4196_s1 + $0x70] sm:$0xff] %v2909_v5  ;;  %v1979_v17 = vadd.f32 %v1947_v33, %v1915_v10  ;;  %v1978_v38 = vadd.f32 %v1946_v6, %v1914_v59  ;;  %v1920_v10 = vmul.f32 %v5505_v3, %v5504_v43  ;;  %v5506_v59 = vld [vmem:[#allocation94_spill] sm:$0xff]  ;;  %v5508_v40 = vld [vmem:[#allocation93_spill] sm:$0xff] }
 0x397   : > { %v1873_v14 = vpop.permute.xlu1 %1872  ;;  %v1871_v15 = vpop.permute.xlu0 %1870  ;;  %v1923_v33 = vmul.f32 %v4776_v30, %v5509_v26  ;;  %v5510_v6 = vld [vmem:[#allocation53_spill] sm:$0xff]  ;;  %v5515_v30 = vld [vmem:[#allocation54_spill] sm:$0xff] }
 0x398   : > { %v2912_v36 = vpack.c.bf16 %v1979_v17, %v5494_v63  ;;  %v2911_v60 = vpack.c.bf16 %v1978_v38, %v5495_v47  ;;  %v1949_v37 = vmul.f32 %v1873_v14, %v5496_v25  ;;  %v1948_v61 = vmul.f32 %v1871_v15, %v4721_v41  ;;  %v5511_v17 = vld [vmem:[#allocation96_spill] sm:$0xff]  ;;  %v5514_v15 = vld [vmem:[#allocation97_spill] sm:$0xff]  ;;  %v5516_v25 = vld [vmem:[#allocation55_spill] sm:$0xff] }
 0x399   : > { %v1922_v38 = vmul.f32 %v5511_v17, %v5510_v6  ;;  %v5527_v43 = vld [vmem:[#allocation110_spill] sm:$0xff] }
 0x39a   : > { %2203 = vst [vmem:[%s4196_s1 + $0x88] sm:$0xff] %v2912_v36  ;;  %2202 = vst [vmem:[%s4196_s1 + $0x80] sm:$0xff] %v2911_v60  ;;  %v1981_v52 = vadd.f32 %v1949_v37, %v1917_v4  ;;  %v1980_v2 = vadd.f32 %v1948_v61, %v1916_v9  ;;  %v5513_v9 = vld [vmem:[#allocation99_spill] sm:$0xff]  ;;  %v1925_v60 = vmul.f32 %v4798_v34, %v5515_v30  ;;  %v5517_v37 = vld [vmem:[#allocation100_spill] sm:$0xff] }
 0x39b   : > { %v1877_v19 = vpop.permute.xlu1 %1876  ;;  %v1875_v7 = vpop.permute.xlu0 %1874  ;;  %v1924_v61 = vmul.f32 %v5517_v37, %v5516_v25  ;;  %v5522_v34 = vld [vmem:[#allocation56_spill] sm:$0xff] }
 0x39c   : > { %v2914_v18 = vpack.c.bf16 %v1981_v52, %v5500_v20  ;;  %v2913_v23 = vpack.c.bf16 %v1980_v2, %v5501_v35  ;;  %v1951_v41 = vmul.f32 %v1877_v19, %v5502_v56  ;;  %v1950_v39 = vmul.f32 %v1875_v7, %v4743_v45  ;;  %v5521_v19 = vld [vmem:[#allocation102_spill] sm:$0xff]  ;;  %v5523_v35 = vld [vmem:[#allocation105_spill] sm:$0xff] }
 0x39d   : > { %v5524_v56 = vld [vmem:[#allocation57_spill] sm:$0xff] }
 0x39e   : > { %2205 = vst [vmem:[%s4196_s1 + $0x98] sm:$0xff] %v2914_v18  ;;  %2204 = vst [vmem:[%s4196_s1 + $0x90] sm:$0xff] %v2913_v23  ;;  %v1983_v29 = vadd.f32 %v1951_v41, %v1919_v27  ;;  %v1982_v46 = vadd.f32 %v1950_v39, %v1918_v0  ;;  %v5520_v0 = vld [vmem:[#allocation101_spill] sm:$0xff]  ;;  %v1927_v23 = vmul.f32 %v5523_v35, %v5522_v34  ;;  %v5525_v41 = vld [vmem:[#allocation106_spill] sm:$0xff] }
 0x39f   : > { %v1881_v11 = vpop.permute.xlu1 %1880  ;;  %v1879_v57 = vpop.permute.xlu0 %1878  ;;  %v1926_v39 = vmul.f32 %v5525_v41, %v5524_v56 }
 0x3a0   : > { %v2916_v28 = vpack.c.bf16 %v1983_v29, %v5506_v59  ;;  %v2915_v55 = vpack.c.bf16 %v1982_v46, %v5507_v31  ;;  %v1953_v45 = vmul.f32 %v1881_v11, %v5508_v40  ;;  %v1952_v21 = vmul.f32 %v1879_v57, %v4765_v49  ;;  %v5529_v57 = vld [vmem:[#allocation108_spill] sm:$0xff] }
 0x3a2   : > { %2207 = vst [vmem:[%s4196_s1 + $0xa8] sm:$0xff] %v2916_v28  ;;  %2206 = vst [vmem:[%s4196_s1 + $0xa0] sm:$0xff] %v2915_v55  ;;  %v1985_v5 = vadd.f32 %v1953_v45, %v1921_v1  ;;  %v1984_v48 = vadd.f32 %v1952_v21, %v1920_v10  ;;  %v5528_v10 = vld [vmem:[#allocation107_spill] sm:$0xff]  ;;  %v5530_v55 = vld [vmem:[#allocation58_spill] sm:$0xff] }
 0x3a3   : > { %v1885_v12 = vpop.permute.xlu1 %1884  ;;  %v1883_v4 = vpop.permute.xlu0 %1882  ;;  %v1929_v40 = vmul.f32 %v4842_v42, %v5530_v55  ;;  %v5531_v45 = vld [vmem:[#allocation59_spill] sm:$0xff] }
 0x3a4   : > { %v2918_v13 = vpack.c.bf16 %v1985_v5, %v5512_v51  ;;  %v2917_v14 = vpack.c.bf16 %v1984_v48, %v5513_v9  ;;  %v1955_v49 = vmul.f32 %v1885_v12, %v5514_v15  ;;  %v1954_v63 = vmul.f32 %v1883_v4, %v4787_v53 }
 0x3a5   : > { %v1928_v21 = vmul.f32 %v4845_v44, %v5531_v45 }
 0x3a6   : > { %2209 = vst [vmem:[%s4196_s1 + $0xb8] sm:$0xff] %v2918_v13  ;;  %2208 = vst [vmem:[%s4196_s1 + $0xb0] sm:$0xff] %v2917_v14  ;;  %v1987_v36 = vadd.f32 %v1955_v49, %v1923_v33  ;;  %v1986_v47 = vadd.f32 %v1954_v63, %v1922_v38  ;;  %v5532_v33 = vld [vmem:[#allocation111_spill] sm:$0xff] }
 0x3a7   : > { %v1889_v52 = vpop.permute.xlu1 %1888  ;;  %v1887_v2 = vpop.permute.xlu0 %1886 }
 0x3a8   : > { %v2920_v27 = vpack.c.bf16 %v1987_v36, %v5518_v24  ;;  %v2919_v16 = vpack.c.bf16 %v1986_v47, %v5519_v32  ;;  %v1957_v53 = vmul.f32 %v1889_v52, %v5520_v0  ;;  %v1956_v7 = vmul.f32 %v1887_v2, %v5521_v19 }
 0x3aa   : > { %2211 = vst [vmem:[%s4196_s1 + $0xc8] sm:$0xff] %v2920_v27  ;;  %2210 = vst [vmem:[%s4196_s1 + $0xc0] sm:$0xff] %v2919_v16  ;;  %v1989_v20 = vadd.f32 %v1957_v53, %v1925_v60  ;;  %v1988_v18 = vadd.f32 %v1956_v7, %v1924_v61 }
 0x3ab   : > { %v1893_v29 = vpop.permute.xlu1 %1892  ;;  %v1891_v46 = vpop.permute.xlu0 %1890 }
 0x3ac   : > { %v2922_v1 = vpack.c.bf16 %v1989_v20, %v5526_v22  ;;  %v2921_v3 = vpack.c.bf16 %v1988_v18, %v5527_v43  ;;  %v1959_v11 = vmul.f32 %v1893_v29, %v5528_v10  ;;  %v1958_v59 = vmul.f32 %v1891_v46, %v5529_v57 }
 0x3ae   : > { %2213 = vst [vmem:[%s4196_s1 + $0xd8] sm:$0xff] %v2922_v1  ;;  %2212 = vst [vmem:[%s4196_s1 + $0xd0] sm:$0xff] %v2921_v3  ;;  %v1991_v28 = vadd.f32 %v1959_v11, %v1927_v23  ;;  %v1990_v31 = vadd.f32 %v1958_v59, %v1926_v39 }
 0x3af   : > { %v1897_v5 = vpop.permute.xlu1 %1896  ;;  %v1895_v48 = vpop.permute.xlu0 %1894 }
 0x3b0   : > { %v2924_v26 = vpack.c.bf16 %v1991_v28, %v4856_v62  ;;  %v2923_v6 = vpack.c.bf16 %v1990_v31, %v5532_v33  ;;  %v1961_v17 = vmul.f32 %v1897_v5, %v4850_v50  ;;  %v1960_v38 = vmul.f32 %v1895_v48, %v4853_v8 }
 0x3b2   : > { %2215 = vst [vmem:[%s4196_s1 + $0xe8] sm:$0xff] %v2924_v26  ;;  %2214 = vst [vmem:[%s4196_s1 + $0xe0] sm:$0xff] %v2923_v6  ;;  %v1993_v12 = vadd.f32 %v1961_v17, %v1929_v40  ;;  %v1992_v4 = vadd.f32 %v1960_v38, %v1928_v21 }
 0x3b4   : > { %v2926_v51 = vpack.c.bf16 %v1993_v12, %v4870_v58  ;;  %v2925_v42 = vpack.c.bf16 %v1992_v4, %v4872_v54 }
 0x3b6   : > { %2217 = vst [vmem:[%s4196_s1 + $0xf8] sm:$0xff] %v2926_v51  ;;  %2216 = vst [vmem:[%s4196_s1 + $0xf0] sm:$0xff] %v2925_v42 }
 0x3b7 PF: > { %s5533_s15 = sld [smem:[#allocation22_spill]] }
 0x3bd   : > { %p2218_p3 = scmp.ge.s32.totalorder %s5533_s15, 3 }
 0x3be   : > { %v2289_v62 = vlaneseq (%p2218_p3)  ;;  %v2287_v50 = vld [vmem:[%s361_s30] sm:$0x3] (%p2218_p3)  ;;  %v2224_v13 = vld [vmem:[#allocation2 + $0x8] sm:$0xff] (%p2218_p3)  ;;  %v2225_v15 = vld [vmem:[#allocation2 + $0x10] sm:$0xff] (%p2218_p3) }
 0x3bf   : > { %2222 = sbr.rel (!%p2218_p3) target bundleno = 995 (0x3e3), region = 72  ;;  %v2223_v8 = vld [vmem:[#allocation2] sm:$0xff] (%p2218_p3)  ;;  %v2226_v49 = vld [vmem:[#allocation2 + $0x18] sm:$0xff] (%p2218_p3)  ;;  %v2228_v36 = vld [vmem:[#allocation2 + $0x28] sm:$0xff] (%p2218_p3) }
 0x3c0   : > { %v2290_v44 = vshrl.u32 (%p2218_p3), %v2289_v62, 7  ;;  %v2227_v58 = vld [vmem:[#allocation2 + $0x20] sm:$0xff] (%p2218_p3)  ;;  %v2229_v47 = vld [vmem:[#allocation2 + $0x30] sm:$0xff] (%p2218_p3)  ;;  %v2230_v30 = vld [vmem:[#allocation2 + $0x38] sm:$0xff] (%p2218_p3) }
 0x3c1   : > { %v2231_v60 = vld [vmem:[#allocation2 + $0x40] sm:$0xff] (%p2218_p3)  ;;  %v2232_v25 = vld [vmem:[#allocation2 + $0x48] sm:$0xff] (%p2218_p3)  ;;  %v2233_v24 = vld [vmem:[#allocation2 + $0x50] sm:$0xff] (%p2218_p3) }
 0x3c2   : > { %v2291_v9 = vsub.s32 (%p2218_p3), 0, %v2290_v44  ;;  %v2295_v14 = vsub.s32 (%p2218_p3), 1, %v2290_v44  ;;  %v2234_v27 = vld [vmem:[#allocation2 + $0x58] sm:$0xff] (%p2218_p3)  ;;  %v2235_v19 = vld [vmem:[#allocation2 + $0x60] sm:$0xff] (%p2218_p3)  ;;  %v2236_v7 = vld [vmem:[#allocation2 + $0x68] sm:$0xff] (%p2218_p3) }
 0x3c3   : > { %v2237_v20 = vld [vmem:[#allocation2 + $0x70] sm:$0xff] (%p2218_p3)  ;;  %v2238_v56 = vld [vmem:[#allocation2 + $0x78] sm:$0xff] (%p2218_p3)  ;;  %v2239_v41 = vld [vmem:[#allocation2 + $0x80] sm:$0xff] (%p2218_p3) }
 0x3c4   : > { %v5033_v63 = vrot.slane (%p2218_p3), %v2287_v50, %v2291_v9  ;;  %v5035_v54 = vrot.slane (%p2218_p3), %v2287_v50, %v2295_v14  ;;  %v2240_v39 = vld [vmem:[#allocation2 + $0x88] sm:$0xff] (%p2218_p3)  ;;  %v2241_v43 = vld [vmem:[#allocation2 + $0x90] sm:$0xff] (%p2218_p3)  ;;  %v2242_v3 = vld [vmem:[#allocation2 + $0x98] sm:$0xff] (%p2218_p3) }
 0x3c5   : > { %v2243_v10 = vld [vmem:[#allocation2 + $0xa0] sm:$0xff] (%p2218_p3)  ;;  %v2244_v31 = vld [vmem:[#allocation2 + $0xa8] sm:$0xff] (%p2218_p3)  ;;  %v2245_v55 = vld [vmem:[#allocation2 + $0xb0] sm:$0xff] (%p2218_p3) }
 0x3c6   : > { %v2299_v37 = vmul.f32 %v5033_v63, %v2223_v8  ;;  %v2300_v61 = vmul.f32 %v5035_v54, %v2224_v13  ;;  %v2301_v52 = vmul.f32 %v5033_v63, %v2225_v15  ;;  %v2302_v2 = vmul.f32 %v5035_v54, %v2226_v49  ;;  %v2246_v48 = vld [vmem:[#allocation2 + $0xb8] sm:$0xff]  ;;  %v2247_v26 = vld [vmem:[#allocation2 + $0xc0] sm:$0xff]  ;;  %v2248_v33 = vld [vmem:[#allocation2 + $0xc8] sm:$0xff] }
 0x3c7   : > { %v2303_v32 = vmul.f32 %v5033_v63, %v2227_v58  ;;  %v2304_v16 = vmul.f32 %v5035_v54, %v2228_v36  ;;  %v2305_v0 = vmul.f32 %v5033_v63, %v2229_v47  ;;  %v2306_v53 = vmul.f32 %v5035_v54, %v2230_v30  ;;  %v2249_v4 = vld [vmem:[#allocation2 + $0xd0] sm:$0xff]  ;;  %v2250_v51 = vld [vmem:[#allocation2 + $0xd8] sm:$0xff]  ;;  %v2251_v42 = vld [vmem:[#allocation2 + $0xe0] sm:$0xff] }
 0x3c8   : > { %v2928_v18 = vpack.c.bf16 %v2300_v61, %v2299_v37  ;;  %v2929_v34 = vpack.c.bf16 %v2302_v2, %v2301_v52  ;;  %v2307_v35 = vmul.f32 %v5033_v63, %v2231_v60  ;;  %v2308_v23 = vmul.f32 %v5035_v54, %v2232_v25  ;;  %v2252_v13 = vld [vmem:[#allocation2 + $0xe8] sm:$0xff]  ;;  %v2253_v9 = vld [vmem:[#allocation2 + $0xf0] sm:$0xff]  ;;  %v2254_v36 = vld [vmem:[#allocation2 + $0xf8] sm:$0xff] }
 0x3c9   : > { %v2930_v29 = vpack.c.bf16 %v2304_v16, %v2303_v32  ;;  %v2931_v46 = vpack.c.bf16 %v2306_v53, %v2305_v0  ;;  %v2309_v22 = vmul.f32 %v5033_v63, %v2233_v24  ;;  %v2310_v1 = vmul.f32 %v5035_v54, %v2234_v27  ;;  %v2255_v47 = vld [vmem:[#allocation2 + $0x100] sm:$0xff]  ;;  %v2256_v30 = vld [vmem:[#allocation2 + $0x108] sm:$0xff]  ;;  %v2257_v52 = vld [vmem:[#allocation2 + $0x110] sm:$0xff] }
 0x3ca   : > { %2555 = vst [vmem:[%s4196_s1] sm:$0xff] %v2928_v18  ;;  %2556 = vst [vmem:[%s4196_s1 + $0x8] sm:$0xff] %v2929_v34  ;;  %v2932_v11 = vpack.c.bf16 %v2308_v23, %v2307_v35  ;;  %v2311_v57 = vmul.f32 %v5033_v63, %v2235_v19  ;;  %v2312_v59 = vmul.f32 %v5035_v54, %v2236_v7  ;;  %v2258_v2 = vld [vmem:[#allocation2 + $0x118] sm:$0xff]  ;;  %v2259_v24 = vld [vmem:[#allocation2 + $0x120] sm:$0xff] }
 0x3cb   : > { %v2313_v28 = vmul.f32 %v5033_v63, %v2237_v20  ;;  %2557 = vst [vmem:[%s4196_s1 + $0x10] sm:$0xff] %v2930_v29  ;;  %2558 = vst [vmem:[%s4196_s1 + $0x18] sm:$0xff] %v2931_v46  ;;  %v2933_v40 = vpack.c.bf16 %v2310_v1, %v2309_v22  ;;  %v2314_v45 = vmul.f32 %v5035_v54, %v2238_v56  ;;  %v2260_v53 = vld [vmem:[#allocation2 + $0x128] sm:$0xff]  ;;  %v2261_v19 = vld [vmem:[#allocation2 + $0x130] sm:$0xff] }
 0x3cc   : > { %v2315_v21 = vmul.f32 %v5033_v63, %v2239_v41  ;;  %v2316_v5 = vmul.f32 %v5035_v54, %v2240_v39  ;;  %2559 = vst [vmem:[%s4196_s1 + $0x20] sm:$0xff] %v2932_v11  ;;  %v2934_v6 = vpack.c.bf16 %v2312_v59, %v2311_v57  ;;  %v2317_v17 = vmul.f32 %v5033_v63, %v2241_v43  ;;  %v2262_v35 = vld [vmem:[#allocation2 + $0x138] sm:$0xff]  ;;  %v2263_v23 = vld [vmem:[#allocation2 + $0x140] sm:$0xff]  ;;  %v2264_v56 = vld [vmem:[#allocation2 + $0x148] sm:$0xff] }
 0x3cd   : > { %v2318_v38 = vmul.f32 %v5035_v54, %v2242_v3  ;;  %v2319_v12 = vmul.f32 %v5033_v63, %v2243_v10  ;;  %2560 = vst [vmem:[%s4196_s1 + $0x28] sm:$0xff] %v2933_v40  ;;  %v2935_v62 = vpack.c.bf16 %v2314_v45, %v2313_v28  ;;  %v2320_v50 = vmul.f32 %v5035_v54, %v2244_v31  ;;  %v2265_v22 = vld [vmem:[#allocation2 + $0x150] sm:$0xff]  ;;  %v2266_v1 = vld [vmem:[#allocation2 + $0x158] sm:$0xff]  ;;  %v2267_v43 = vld [vmem:[#allocation2 + $0x160] sm:$0xff] }
 0x3ce   : > { %v2936_v44 = vpack.c.bf16 %v2316_v5, %v2315_v21  ;;  %v2321_v8 = vmul.f32 %v5033_v63, %v2245_v55  ;;  %2561 = vst [vmem:[%s4196_s1 + $0x30] sm:$0xff] %v2934_v6  ;;  %v2322_v15 = vmul.f32 %v5035_v54, %v2246_v48  ;;  %v2323_v49 = vmul.f32 %v5033_v63, %v2247_v26  ;;  %v2268_v59 = vld [vmem:[#allocation2 + $0x168] sm:$0xff]  ;;  %v2269_v28 = vld [vmem:[#allocation2 + $0x170] sm:$0xff]  ;;  %v2270_v21 = vld [vmem:[#allocation2 + $0x178] sm:$0xff] }
 0x3cf   : > { %v2937_v14 = vpack.c.bf16 %v2318_v38, %v2317_v17  ;;  %v2324_v58 = vmul.f32 %v5035_v54, %v2248_v33  ;;  %2562 = vst [vmem:[%s4196_s1 + $0x38] sm:$0xff] %v2935_v62  ;;  %v2938_v60 = vpack.c.bf16 %v2320_v50, %v2319_v12  ;;  %v2325_v25 = vmul.f32 %v5033_v63, %v2249_v4  ;;  %v2271_v5 = vld [vmem:[#allocation2 + $0x180] sm:$0xff]  ;;  %v2272_v48 = vld [vmem:[#allocation2 + $0x188] sm:$0xff]  ;;  %v2273_v38 = vld [vmem:[#allocation2 + $0x190] sm:$0xff] }
 0x3d0   : > { %2563 = vst [vmem:[%s4196_s1 + $0x40] sm:$0xff] %v2936_v44  ;;  %v2326_v37 = vmul.f32 %v5035_v54, %v2250_v51  ;;  %v2327_v61 = vmul.f32 %v5033_v63, %v2251_v42  ;;  %v2939_v27 = vpack.c.bf16 %v2322_v15, %v2321_v8  ;;  %v2328_v16 = vmul.f32 %v5035_v54, %v2252_v13  ;;  %v2274_v12 = vld [vmem:[#allocation2 + $0x198] sm:$0xff]  ;;  %v2275_v4 = vld [vmem:[#allocation2 + $0x1a0] sm:$0xff]  ;;  %v2276_v50 = vld [vmem:[#allocation2 + $0x1a8] sm:$0xff] }
 0x3d1   : > { %2564 = vst [vmem:[%s4196_s1 + $0x48] sm:$0xff] %v2937_v14  ;;  %v2940_v32 = vpack.c.bf16 %v2324_v58, %v2323_v49  ;;  %v2329_v0 = vmul.f32 %v5033_v63, %v2253_v9  ;;  %2565 = vst [vmem:[%s4196_s1 + $0x50] sm:$0xff] %v2938_v60  ;;  %v2330_v20 = vmul.f32 %v5035_v54, %v2254_v36  ;;  %v2277_v8 = vld [vmem:[#allocation2 + $0x1b0] sm:$0xff]  ;;  %v2278_v49 = vld [vmem:[#allocation2 + $0x1b8] sm:$0xff] }
 0x3d2   : > { %v2941_v7 = vpack.c.bf16 %v2326_v37, %v2325_v25  ;;  %v2331_v18 = vmul.f32 %v5033_v63, %v2255_v47  ;;  %v2332_v34 = vmul.f32 %v5035_v54, %v2256_v30  ;;  %2566 = vst [vmem:[%s4196_s1 + $0x58] sm:$0xff] %v2939_v27  ;;  %v2942_v41 = vpack.c.bf16 %v2328_v16, %v2327_v61  ;;  %v2279_v58 = vld [vmem:[#allocation2 + $0x1c0] sm:$0xff]  ;;  %v2280_v36 = vld [vmem:[#allocation2 + $0x1c8] sm:$0xff]  ;;  %v2281_v37 = vld [vmem:[#allocation2 + $0x1d0] sm:$0xff] }
 0x3d3   : > { %2567 = vst [vmem:[%s4196_s1 + $0x60] sm:$0xff] %v2940_v32  ;;  %v2333_v39 = vmul.f32 %v5033_v63, %v2257_v52  ;;  %v2334_v29 = vmul.f32 %v5035_v54, %v2258_v2  ;;  %v2335_v46 = vmul.f32 %v5033_v63, %v2259_v24  ;;  %v2943_v3 = vpack.c.bf16 %v2330_v20, %v2329_v0  ;;  %v2282_v61 = vld [vmem:[#allocation2 + $0x1d8] sm:$0xff]  ;;  %v2283_v52 = vld [vmem:[#allocation2 + $0x1e0] sm:$0xff]  ;;  %v2284_v16 = vld [vmem:[#allocation2 + $0x1e8] sm:$0xff] }
 0x3d4   : > { %2568 = vst [vmem:[%s4196_s1 + $0x68] sm:$0xff] %v2941_v7  ;;  %v2944_v10 = vpack.c.bf16 %v2332_v34, %v2331_v18  ;;  %v2336_v11 = vmul.f32 %v5035_v54, %v2260_v53  ;;  %v2337_v57 = vmul.f32 %v5033_v63, %v2261_v19  ;;  %2569 = vst [vmem:[%s4196_s1 + $0x70] sm:$0xff] %v2942_v41  ;;  %v2285_v0 = vld [vmem:[#allocation2 + $0x1f0] sm:$0xff]  ;;  %v2286_v18 = vld [vmem:[#allocation2 + $0x1f8] sm:$0xff] }
 0x3d5   : > { %v2945_v31 = vpack.c.bf16 %v2334_v29, %v2333_v39  ;;  %v2338_v55 = vmul.f32 %v5035_v54, %v2262_v35  ;;  %v2339_v40 = vmul.f32 %v5033_v63, %v2263_v23  ;;  %v2340_v45 = vmul.f32 %v5035_v54, %v2264_v56  ;;  %2570 = vst [vmem:[%s4196_s1 + $0x78] sm:$0xff] %v2943_v3 }
 0x3d6   : > { %2571 = vst [vmem:[%s4196_s1 + $0x80] sm:$0xff] %v2944_v10  ;;  %v2946_v26 = vpack.c.bf16 %v2336_v11, %v2335_v46  ;;  %v2341_v33 = vmul.f32 %v5033_v63, %v2265_v22  ;;  %v2342_v6 = vmul.f32 %v5035_v54, %v2266_v1  ;;  %v2343_v17 = vmul.f32 %v5033_v63, %v2267_v43 }
 0x3d7   : > { %2572 = vst [vmem:[%s4196_s1 + $0x88] sm:$0xff] %v2945_v31  ;;  %v2947_v51 = vpack.c.bf16 %v2338_v55, %v2337_v57  ;;  %v2948_v42 = vpack.c.bf16 %v2340_v45, %v2339_v40  ;;  %v2344_v62 = vmul.f32 %v5035_v54, %v2268_v59  ;;  %v2345_v44 = vmul.f32 %v5033_v63, %v2269_v28 }
 0x3d8   : > { %2573 = vst [vmem:[%s4196_s1 + $0x90] sm:$0xff] %v2946_v26  ;;  %v2949_v13 = vpack.c.bf16 %v2342_v6, %v2341_v33  ;;  %v2346_v9 = vmul.f32 %v5035_v54, %v2270_v21  ;;  %v2347_v14 = vmul.f32 %v5033_v63, %v2271_v5  ;;  %v2348_v15 = vmul.f32 %v5035_v54, %v2272_v48 }
 0x3d9   : > { %2574 = vst [vmem:[%s4196_s1 + $0x98] sm:$0xff] %v2947_v51  ;;  %2575 = vst [vmem:[%s4196_s1 + $0xa0] sm:$0xff] %v2948_v42  ;;  %v2950_v47 = vpack.c.bf16 %v2344_v62, %v2343_v17  ;;  %v2349_v30 = vmul.f32 %v5033_v63, %v2273_v38  ;;  %v2350_v60 = vmul.f32 %v5035_v54, %v2274_v12 }
 0x3da   : > { %v2351_v25 = vmul.f32 %v5033_v63, %v2275_v4  ;;  %2576 = vst [vmem:[%s4196_s1 + $0xa8] sm:$0xff] %v2949_v13  ;;  %v2951_v2 = vpack.c.bf16 %v2346_v9, %v2345_v44  ;;  %v2952_v24 = vpack.c.bf16 %v2348_v15, %v2347_v14  ;;  %v2352_v27 = vmul.f32 %v5035_v54, %v2276_v50 }
 0x3db   : > { %v2353_v32 = vmul.f32 %v5033_v63, %v2277_v8  ;;  %2577 = vst [vmem:[%s4196_s1 + $0xb0] sm:$0xff] %v2950_v47  ;;  %v2953_v53 = vpack.c.bf16 %v2350_v60, %v2349_v30  ;;  %v2354_v19 = vmul.f32 %v5035_v54, %v2278_v49  ;;  %v2355_v7 = vmul.f32 %v5033_v63, %v2279_v58 }
 0x3dc   : > { %v2356_v20 = vmul.f32 %v5035_v54, %v2280_v36  ;;  %2578 = vst [vmem:[%s4196_s1 + $0xb8] sm:$0xff] %v2951_v2  ;;  %2579 = vst [vmem:[%s4196_s1 + $0xc0] sm:$0xff] %v2952_v24  ;;  %v2954_v34 = vpack.c.bf16 %v2352_v27, %v2351_v25  ;;  %v2357_v35 = vmul.f32 %v5033_v63, %v2281_v37 }
 0x3dd   : > { %v2358_v23 = vmul.f32 %v5035_v54, %v2282_v61  ;;  %v2359_v56 = vmul.f32 %v5033_v63, %v2283_v52  ;;  %2580 = vst [vmem:[%s4196_s1 + $0xc8] sm:$0xff] %v2953_v53  ;;  %v2955_v41 = vpack.c.bf16 %v2354_v19, %v2353_v32  ;;  %v2360_v29 = vmul.f32 %v5035_v54, %v2284_v16 }
 0x3de   : > { %v2956_v39 = vpack.c.bf16 %v2356_v20, %v2355_v7  ;;  %v2361_v46 = vmul.f32 %v5033_v63, %v2285_v0  ;;  %2581 = vst [vmem:[%s4196_s1 + $0xd0] sm:$0xff] %v2954_v34  ;;  %v2362_v1 = vmul.f32 %v5035_v54, %v2286_v18 }
 0x3df   : > { %v2957_v22 = vpack.c.bf16 %v2358_v23, %v2357_v35  ;;  %2582 = vst [vmem:[%s4196_s1 + $0xd8] sm:$0xff] %v2955_v41  ;;  %v2958_v43 = vpack.c.bf16 %v2360_v29, %v2359_v56 }
 0x3e0   : > { %2583 = vst [vmem:[%s4196_s1 + $0xe0] sm:$0xff] %v2956_v39  ;;  %v2959_v3 = vpack.c.bf16 %v2362_v1, %v2361_v46 }
 0x3e1   : > { %2584 = vst [vmem:[%s4196_s1 + $0xe8] sm:$0xff] %v2957_v22  ;;  %2585 = vst [vmem:[%s4196_s1 + $0xf0] sm:$0xff] %v2958_v43 }
 0x3e2   : > { %2586 = vst [vmem:[%s4196_s1 + $0xf8] sm:$0xff] %v2959_v3 }
 0x3e3 PF: > { %s5534_s22 = sld [smem:[#allocation22_spill]]  ;;  %s5535_s9 = sld [smem:[#allocation23_spill]] }
 0x3e4   : > { %s5537_s10 = sld [smem:[#allocation30_spill]]  ;;  %s2604_s27 = sshll.u32 %s4196_s1, 4  ;;  %s5136_s27 = int_to_ptr.vmem [resolvable:$true] %s2604_s27 }
 0x3e5   : > { %s5538_s5 = sld [smem:[#allocation115_spill]]  ;;  %s5145_s3 = scalar_lea.sflag [#allocation5], %s423_s21 }
 0x3e6   : > { %s3330_s0 = scalar_lea.vmem %s5136_s27, 4096  ;;  %s3496_s30 = smov [#allocation12]  }
 0x3e7   : > { %p3331_p8 = scmp.ne.s32.totalorder %s5136_s27, %s3330_s0  ;;  %s3334_s19 = sshll.u32 %s3496_s30, 4  ;;  %s3335_s19 = int_to_ptr.vmem [resolvable:$false] %s3334_s19 }
 0x3e8   : > { %s3336_s20 = scalar_lea.vmem %s3335_s19, 8192  ;;  %p3337_p12 = scmp.lt.s32.totalorder %s5136_s27, %s3335_s19 }
 0x3e9   : > { %s2882_s7 = sshll.u32 %s5534_s22, 1  ;;  %s2960_s24 = sshll.u32 %s5535_s9, 8 }
 0x3ea   : > { %s2601_s11 = sadd.s32 %s2960_s24, %s2882_s7  ;;  %p5539_p1 = scmp.ne.s32.totalorder %s5537_s10, 0 }
 0x3eb   : > { %s2884_s12 = sshll.u32 %s2601_s11, 6  ;;  %p3338_p6 = scmp.lt.s32.totalorder %s3336_s20, %s3330_s0 }
 0x3ec   : > { %s5141_s28 = scalar_lea.hbm %s5538_s5, %s2884_s12  ;;  %p3332_p11 = pnand %p3331_p8, %p5539_p1 }
 0x3ed   : > { %p3339_p5 = por %p3338_p6, %p3337_p12 }
 0x3ee   : > { %p3333_p4 = pneg %p3332_p11 }
 0x3f0   : > { %p3340_p0 = pnand %p3339_p5, %p3333_p4 }
 0x3f2   : > { %3343 = shalt.err (!%p3340_p0)
}
 0x3f3   : > { %s3344_s6 = scalar_lea.hbm %s5141_s28, 4096  ;;  %s3348_s8 = scalar_lea.hbm %s5538_s5, 32768 }
 0x3f4   : > { %p3345_p10 = scmp.ne.s32.totalorder %s5141_s28, %s3344_s6  ;;  %p3349_p13 = scmp.lt.u32.totalorder %s5141_s28, %s5538_s5 }
 0x3f5   : > { %p3350_p9 = scmp.lt.u32.totalorder %s3348_s8, %s3344_s6  ;;  %p3352_p8 = scmp.lt.u32.totalorder %s3344_s6, %s5141_s28 }
 0x3f6   : > { %p3346_p2 = pnand %p3345_p10, %p5539_p1 }
 0x3f7   : > { %p3351_p3 = por %p3350_p9, %p3349_p13 }
 0x3f8   : > { %p3347_p7 = pneg %p3346_p2 }
 0x3f9   : > { %p3353_p11 = por %p3352_p8, %p3351_p3 }
 0x3fb   : > { %p3354_p4 = pnand %p3353_p11, %p3347_p7 }
 0x3fd   : > { %3357 = shalt.err (!%p3354_p4)
}
 0x3fe   : > { %s3497_s26 = smov 128   ;;  %s3498_s15 = smov 512  }
 0x3ff   : > { %s3499_s22 = smov 8  }
 0x400   : > { %3035 = dma.vmem_to_hbm [thread:$0]  (%p5539_p1), %s5136_s27, 4096, %s5141_s28, %s5145_s3, %s3497_s26, %s3498_s15, %s3499_s22  }
 0x401 PF: > { %s5540_s9 = sld [smem:[#allocation25_spill]]  ;;  %s5541_s16 = sld [smem:[#allocation17_spill]] }
 0x402   : > { %s5542_s7 = sld [smem:[#allocation31_spill]] }
 0x407   : > { %p3058_p12 = scmp.ge.s32.totalorder %s5540_s9, 2  ;;  %s2619_s24 = sand.u32 1, %s5541_s16  }
 0x408   : > { %p5543_p6 = scmp.ne.s32.totalorder %s5542_s7, 0  ;;  %s2620_s11 = scalar_lea.sflag [#allocation5], %s2619_s24 }
 0x40a   : > { %p3054_p5 = pnand %p3058_p12, %p5543_p6 }
 0x40c   : > { %3427 = dma.done.wait (!%p3054_p5), %s2620_s11, 4096  }
 0x40d   : > { %3429 = vsyncadd (!%p3054_p5), %s2620_s11, 4294963200  ;;  %s27_s6 = sadd.s32 1, %s5540_s9   ;;  %s5545_s18 = sld [smem:[#allocation18_spill]] }
 0x40e   : > { %p5174_p0 = scmp.ge.s32.totalorder %s27_s6, 10   ;;  %s5546_s19 = sld [smem:[#allocation19_spill]] }
 0x40f   : > { %s5547_s20 = sld [smem:[#allocation34_spill]]  ;;  %s5548_s21 = sld [smem:[#allocation20_spill]] }
 0x410   : > { %s5549_s10 = sld [smem:[#allocation29_spill]]  ;;  %s5550_s27 = sld [smem:[#allocation21_spill]] }
 0x411   : > { %s5551_s26 = sld [smem:[#allocation33_spill]]  ;;  %s5552_s28 = sld [smem:[#allocation24_spill]] }
 0x412   : > { %s5553_s14 = sld [smem:[#allocation27_spill]]  ;;  %s5554_s30 = sld [smem:[#allocation32_spill]] }
 0x413   : > { %s5555_s22 = smov %s3452_s23  ;;  %s5557_s24 = smov %s3460_s25 }
 0x414   :  { %26 = sbr.rel (!%p5174_p0) target bundleno = 19 (0x13), region = 145 }
 0x416   : > { %s5556_s23 = smov %s5549_s10  ;;  %s5558_s25 = smov %s5550_s27 }
 0x417   : > { %s5559_s27 = smov %s3476_s29 }
 0x418   : > { %s5560_s29 = smov %s5553_s14 }
 0x41b   :  { %2625 = vsyncpa [#allocation4], 1 }
 0x41c   :  { %2627 = vsyncpa [#allocation4 + $0x1], 1 }
 0x41d   :  { %2628 = vsyncpa [#allocation7], 1 }
 0x41e   :  { %2630 = vsyncpa [#allocation7 + $0x1], 1 }
 0x41f   :  { %2631 = vsyncpa [#allocation10], 1 }
 0x420   :  { %2633 = vsyncpa [#allocation10 + $0x1], 1 }
 0x421   :  { %2634 = vsyncpa [#allocation5], 1 }
 0x422   :  { %2636 = vsyncpa [#allocation5 + $0x1], 1 }

</bundles_post_ra>
